<compile_context>
chip_gen: v7x
topology: tpu7x:2x2x1
jax: 0.10.0
libtpu: 0.0.40
codegen_flags: <defaults>
</compile_context>

<pallas_src>
import functools
import math

import jax
import jax.numpy as jnp
from jax.experimental import pallas as pl
from jax.experimental.pallas import tpu as pltpu


def _polar2cart_kernel(pc_ref, out_ref, *, degrees: bool):
    """Fused, lane-dense polar->cartesian on interleaved lanes.

    Input block  (TB, TW): lanes hold [r0, phi0, r1, phi1, ...].
    Output block (TB, TW): lanes hold [x0, y0,  x1, y1,  ...].
    """
    v = pc_ref[...].astype(jnp.float32)  # f32 compute (bf16-safe)
    tw = v.shape[-1]

    # Scale once; only the odd (phi) lanes of this array are ever consumed.
    phi_lanes = v * jnp.float32(math.pi / 180.0) if degrees else v

    # XLU rotations bring each point's partner value into lane:
    #   roll by tw-1 (== -1): even lane 2k   <- phi_k (radians)
    #   roll by 1           : odd  lane 2k+1 <- r_k
    # Wrap-around lanes land on the unused parity, so block-edge wraps are harmless.
    phi_at_even = pltpu.roll(phi_lanes, tw - 1, 1)
    r_at_odd = pltpu.roll(v, 1, 1)

    x = v * jnp.cos(phi_at_even)       # valid at even lanes: r_k * cos(phi_k)
    y = r_at_odd * jnp.sin(phi_lanes)  # valid at odd  lanes: r_k * sin(phi_k)

    lane = jax.lax.broadcasted_iota(jnp.int32, v.shape, 1)
    out_ref[...] = jnp.where((lane & 1) == 0, x, y).astype(out_ref.dtype)


def polar2cart_pallas(batch: jax.Array, degrees: bool = True,
                      *, row_tile: int = 256, lane_tile: int = 2048) -> jax.Array:
    """Pallas equivalent of Polar2Cart(dim=-1, degrees=degrees).forward(batch).

    Args:
        batch: (B, P, 2) array; last axis is (r, phi).
    Returns:
        (B, P, 2) array; last axis is (x, y).
    """
    assert batch.ndim == 3 and batch.shape[-1] == 2
    B, P, _ = batch.shape
    W = 2 * P
    # Free, contiguous reshape: (r, phi) pairs become interleaved lanes.
    flat = batch.reshape(B, W)

    # Lane-dense tiles (multiples of (8, 128)); use the full dim when it is smaller
    # than the tile (always legal for a BlockSpec).  W = 2P is always even, so
    # (r, phi) pairs never straddle a lane-tile boundary.
    tb = B if B <= row_tile else row_tile
    tw = W if W <= lane_tile else lane_tile
    grid = (pl.cdiv(B, tb), pl.cdiv(W, tw))

    itemsize = jnp.dtype(batch.dtype).itemsize
    cost = pl.CostEstimate(
        flops=4 * B * P,
        transcendentals=2 * B * P,
        bytes_accessed=4 * B * P * itemsize,
    )

    out_flat = pl.pallas_call(
        functools.partial(_polar2cart_kernel, degrees=degrees),
        out_shape=jax.ShapeDtypeStruct((B, W), batch.dtype),
        grid=grid,
        in_specs=[pl.BlockSpec((tb, tw), lambda i, j: (i, j))],
        out_specs=pl.BlockSpec((tb, tw), lambda i, j: (i, j)),
        compiler_params=pltpu.CompilerParams(
            dimension_semantics=("parallel", "parallel"),
            vmem_limit_bytes=32 * 1024 * 1024,
        ),
        cost_estimate=cost,
    )(flat)

    return out_flat.reshape(B, P, 2)


if __name__ == "__main__":
    key = jax.random.PRNGKey(0)
    k_r, k_phi = jax.random.split(key)

    # Small, but large enough to exercise the lane-tiled grid (grid = (1, 2)).
    B, P = 8, 2048
    r = jax.random.uniform(k_r, (B, P), dtype=jnp.float32, minval=0.0, maxval=50.0)
    phi = jax.random.uniform(k_phi, (B, P), dtype=jnp.float32, minval=-180.0, maxval=180.0)
    batch = jnp.stack([r, phi], axis=-1)  # (B, P, 2) polar coordinates

    out = jax.block_until_ready(polar2cart_pallas(batch, degrees=True))

    # Reference check (plain JAX).
    phi_rad = jnp.deg2rad(batch[..., 1])
    ref = jnp.stack([batch[..., 0] * jnp.cos(phi_rad),
                     batch[..., 0] * jnp.sin(phi_rad)], axis=-1)
    assert out.shape == batch.shape and out.dtype == batch.dtype
    assert jnp.allclose(out, ref, atol=1e-5, rtol=1e-5), float(jnp.max(jnp.abs(out - ref)))

    print("KERNEL_OK")
</pallas_src>

<mosaic_0001>
module attributes {stable_mosaic.version = 11 : i64} {
  func.func @_polar2cart_kernel(%arg0: i32, %arg1: i32, %arg2: memref<8x2048xf32, #tpu.memory_space<vmem>>, %arg3: memref<8x2048xf32, #tpu.memory_space<vmem>>) attributes {dimension_semantics = [#tpu.dimension_semantics<parallel>, #tpu.dimension_semantics<parallel>], iteration_bounds = array<i64: 1, 2>, scalar_prefetch = 0 : i64, scratch_operands = 0 : i64, tpu.core_type = #tpu.core_type<tc>, window_params = [{transform_indices = @transform_0, window_bounds = array<i64: 8, 2048>}, {transform_indices = @transform_1, window_bounds = array<i64: 8, 2048>}]} {
    %c0 = arith.constant 0 : index
    %c0_0 = arith.constant 0 : index
    %0 = vector.load %arg2[%c0, %c0_0] : memref<8x2048xf32, #tpu.memory_space<vmem>>, vector<8x2048xf32>
    %cst = arith.constant 0.0174532924 : f32
    %1 = vector.broadcast %cst : f32 to vector<8x2048xf32>
    %2 = arith.mulf %0, %1 : vector<8x2048xf32>
    %c2047_i32 = arith.constant 2047 : i32
    %3 = tpu.dynamic_rotate %2 by %c2047_i32 dim 1 : vector<8x2048xf32>, i32 -> vector<8x2048xf32>
    %c1_i32 = arith.constant 1 : i32
    %4 = tpu.dynamic_rotate %0 by %c1_i32 dim 1 : vector<8x2048xf32>, i32 -> vector<8x2048xf32>
    %5 = math.cos %3 : vector<8x2048xf32>
    %6 = arith.mulf %0, %5 : vector<8x2048xf32>
    %7 = math.sin %2 : vector<8x2048xf32>
    %8 = arith.mulf %4, %7 : vector<8x2048xf32>
    %9 = tpu.iota {dimensions = array<i32: 1>} : vector<8x2048xi32>
    %c1_i32_1 = arith.constant 1 : i32
    %10 = vector.broadcast %c1_i32_1 : i32 to vector<8x2048xi32>
    %11 = arith.andi %9, %10 : vector<8x2048xi32>
    %c0_i32 = arith.constant 0 : i32
    %12 = vector.broadcast %c0_i32 : i32 to vector<8x2048xi32>
    %13 = arith.cmpi eq, %11, %12 : vector<8x2048xi32>
    %14 = arith.select %13, %6, %8 : vector<8x2048xi1>, vector<8x2048xf32>
    %c0_2 = arith.constant 0 : index
    %c0_3 = arith.constant 0 : index
    %15 = vector.load %arg3[%c0_2, %c0_3] : memref<8x2048xf32, #tpu.memory_space<vmem>>, vector<8x2048xf32>
    tpu.vector_store %arg3[%c0_2, %c0_3], %14 {strides = array<i32>} : memref<8x2048xf32, #tpu.memory_space<vmem>>, vector<8x2048xf32>,
    return
  }
  func.func @transform_0(%arg0: i32, %arg1: i32) -> (i32, i32) {
    %c0_i32 = arith.constant 0 : i32
    return %arg0, %arg1 : i32, i32
  }
  func.func @transform_1(%arg0: i32, %arg1: i32) -> (i32, i32) {
    %c0_i32 = arith.constant 0 : i32
    return %arg0, %arg1 : i32, i32
  }
}

</mosaic_0001>

<bundles_post_ra>
// kernel: tpu_custom_call.1
= control target key start
LH: loop header
LB: loop body
LE: loop exit
PB: predicated region body
PF: predicated region fallthrough
CT: control target
= control target key end

     0   :  { %6 = vsyncpa [#allocation3], 0  ;;  %s8493_s0 = inlined_call_operand.hbm [shape: f32[8,4096], index: 0, kind: input, shape index: {}]   ;;  %s8494_s1 = inlined_call_operand.hbm [shape: f32[8,4096], index: 1, kind: output, shape index: {}]  }
   0x1   :  { %8 = vsyncpa [#allocation3 + $0x1], 0 }
   0x2   :  { %9 = vsyncpa [#allocation4], 0 }
   0x3   :  { %11 = vsyncpa [#allocation4 + $0x1], 0  ;;  %s4430_s6 = smov 0   ;;  %s4432_s7 = smov 0  }
   0x4   :  { %s4434_s8 = smov 0   ;;  %s4436_s9 = smov 0  }
   0x5   :  { %s4438_s10 = smov 0   ;;  %s4440_s11 = smov 0  }
   0x6 LB: > { %s3809_s12 = sadd.s32 4294967295, %s4408_s11   ;;  %s3810_s13 = sadd.s32 4294967294, %s4408_s11   ;;  %s4408_s11 = sphi %s4440_s11, %s17_s11   ;;  %s4404_s10 = sphi %s4438_s10, %s8854_s10   ;;  %s4400_s9 = sphi %s4436_s9, %s8853_s9   ;;  %s4396_s8 = sphi %s4434_s8, %s8852_s8   ;;  %s4392_s7 = sphi %s4432_s7, %s8851_s7   ;;  %s4388_s6 = sphi %s4430_s6, %s8850_s6  }
   0x7   : > { %s26_s14 = sadd.s32 1, %s4404_s10  ;;  %s38_s15 = sadd.s32 1, %s4396_s8 }
   0x8   : > { %p27_p0 = scmp.ge.s32.totalorder %s26_s14, 2  ;;  %p45_p1 = scmp.ne.s32.totalorder %s4396_s8, %s4392_s7 }
   0x9   : > { %p46_p2 = scmp.eq.s32.totalorder %s4408_s11, 0  ;;  %p51_p3 = scmp.ne.s32.totalorder %s4392_s7, %s4388_s6 }
   0xa   : > { %s8856_s14 = smov (%p27_p0, %s26_s14), 0  ;;  %p52_p5 = scmp.eq.s32.totalorder %s3809_s12, 0 }
   0xb   : > { %p4471_p4 = por %p46_p2, %p45_p1  ;;  %s34_s17 = ssub.s32 %s4404_s10, %s8856_s14 }
   0xc   : > { %p77_p6 = scmp.eq.s32.totalorder %s3809_s12, 1  ;;  %p36_p7 = scmp.eq.s32.totalorder %s34_s17, 0 }
   0xd   : > { %p4477_p8 = por %p52_p5, %p51_p3  ;;  %p83_p10 = scmp.eq.s32.totalorder %s3810_s13, 1 }
   0xe   : > { %p4481_p9 = por %p77_p6, %p45_p1  ;;  %p4094_p13 = scmp.lt.s32.totalorder %s4408_s11, 2 }
   0xf   : > { %s4486_s20 = scalar_select %p36_p7, %s4396_s8, %s38_s15  }
  0x10   : > { %s8593_s19 = scalar_select %p4481_p9, 1, 0 }
  0x11   : > { %p4488_p11 = por %p83_p10, %p51_p3  ;;  %s103_s22 = sand.u32 1, %s4396_s8  }
  0x12   : > { %s3813_s23 = sshll.u32 %s103_s22, 7  ;;  %s3952_s24 = sshll.u32 %s4404_s10, 11 }
  0x13   : > { %s8594_s21 = scalar_select %p4488_p11, 1, 0 }
  0x14   : > { %s4499_s27 = scalar_lea.hbm %s8493_s0, %s3952_s24  ;;  %s107_s28 = scalar_lea.vmem [#allocation2], %s3813_s23 }
  0x15   : > { %s117_s29 = sshll.u32 %s107_s28, 4  ;;  %p4505_p0 = pnand %p4094_p13, %p4471_p4  ;;  %s4501_s29 = int_to_ptr.vmem [resolvable:$true] %s117_s29 }
  0x16   : > { %s104_s2 = scalar_lea.sflag [#allocation3], %s103_s22  ;;  %s4296_s3 = scalar_lea.hbm %s4499_s27, 2048 }
  0x17   : > { %p4297_p3 = scmp.ne.s32.totalorder %s4499_s27, %s4296_s3  ;;  %p4298_p5 = pneg %p4505_p0 }
  0x18   : > { %s4301_s12 = scalar_lea.hbm %s8493_s0, 4096  ;;  %p4302_p4 = scmp.lt.u32.totalorder %s4499_s27, %s8493_s0 }
  0x19   : > { %p4299_p6 = pnand %p4298_p5, %p4297_p3  ;;  %p4303_p10 = scmp.lt.u32.totalorder %s4301_s12, %s4296_s3 }
  0x1a   : > { %p4305_p12 = scmp.lt.u32.totalorder %s4296_s3, %s4499_s27 }
  0x1b   : > { %p4300_p7 = pneg %p4299_p6  ;;  %p4304_p13 = por %p4303_p10, %p4302_p4 }
  0x1d   : > { %p4306_p1 = por %p4305_p12, %p4304_p13 }
  0x1f   : > { %p4307_p2 = pnand %p4306_p1, %p4300_p7 }
  0x21   : > { %4310 = shalt.err (!%p4307_p2)
}
  0x22   : > { %s4311_s16 = scalar_lea.vmem %s4501_s29, 2048  ;;  %s4410_s17 = smov [#allocation2]  }
  0x23   : > { %p4312_p3 = scmp.ne.s32.totalorder %s4501_s29, %s4311_s16  ;;  %s4316_s22 = sshll.u32 %s4410_s17, 4  ;;  %s4317_s22 = int_to_ptr.vmem [resolvable:$false] %s4316_s22 }
  0x24   : > { %s4318_s23 = scalar_lea.vmem %s4317_s22, 4096  ;;  %p4319_p9 = scmp.lt.s32.totalorder %s4501_s29, %s4317_s22 }
  0x25   : > { %p4314_p6 = pnand %p4312_p3, %p4298_p5  ;;  %p4320_p4 = scmp.lt.s32.totalorder %s4318_s23, %s4311_s16 }
  0x27   : > { %p4315_p11 = pneg %p4314_p6  ;;  %p4321_p10 = por %p4320_p4, %p4319_p9 }
  0x29   : > { %p4322_p12 = pnand %p4321_p10, %p4315_p11 }
  0x2b   : > { %4325 = shalt.err (!%p4322_p12)
}
  0x2c   : > { %4089 = dma.hbm_to_vmem [thread:$0]  (!%p4505_p0), %s4499_s27, 2048, %s4501_s29, %s104_s2  }
  0x2d   : > { %p8596_p1 = scmp.lt.s32.totalorder %s4408_s11, 3  ;;  %p8597_p2 = scmp.ge.s32.totalorder %s4408_s11, 1 }
  0x2f   : > { %p123_p5 = pnand %p8597_p2, %p8596_p1 }
  0x31   : > { %126 = sbr.rel (%p123_p5) target bundleno = 1045 (0x415), region = 24 }
  0x38   : > { %s4541_s24 = sand.u32 1, %s4392_s7  }
  0x39   : > { %s3817_s25 = sshll.u32 %s4541_s24, 7  ;;  %s129_s26 = scalar_lea.sflag [#allocation3], %s4541_s24 }
  0x3a   : > { %s4547_s28 = scalar_lea.vmem [#allocation2], %s3817_s25 }
  0x3b   : > { %4379 = dma.done.wait (%p4477_p8), %s129_s26, 2048  }
  0x3c   : > { %4381 = vsyncadd (%p4477_p8), %s129_s26, 4294965248  ;;  %v155_v0 = vld [vmem:[%s4547_s28 + $0x10] sm:$0xff]  ;;  %v153_v1 = vld [vmem:[%s4547_s28] sm:$0xff]  ;;  %s4411_s27 = smov 127   ;;  %s4412_s18 = smov 1   ;;  %v217_v32 = vlaneseq }
  0x3d   : > { %v156_v2 = vld [vmem:[%s4547_s28 + $0x18] sm:$0xff]  ;;  %v4556_v3 = vmul.f32 0.017453292, %v155_v0  ;;  %v4558_v4 = vmul.f32 0.017453292, %v153_v1  ;;  %v154_v5 = vld [vmem:[%s4547_s28 + $0x8] sm:$0xff] }
  0x3e   : > { %v4565_v6 = vmul.f32 0.017453292, %v156_v2  ;;  %v4567_v7 = vmul.f32 0.017453292, %v154_v5  ;;  %v158_v8 = vld [vmem:[%s4547_s28 + $0x28] sm:$0xff]  ;;  %v157_v9 = vld [vmem:[%s4547_s28 + $0x20] sm:$0xff] }
  0x3f   : > { %8598 = vst [vmem:[#allocation8_spill] sm:$0xff] %v4556_v3  ;;  %8599 = vst [vmem:[#allocation9_spill] sm:$0xff] %v4558_v4  ;;  %189 = vrot.lane.b32.xlu1 %v4556_v3, %s4411_s27  ;;  %185 = vrot.lane.b32.xlu0 %v4558_v4, %s4411_s27  ;;  %v4575_v10 = vmul.f32 0.017453292, %v158_v8  ;;  %v4577_v11 = vmul.f32 0.017453292, %v157_v9 }
  0x40   : > { %8600 = vst [vmem:[#allocation10_spill] sm:$0xff] %v4565_v6  ;;  %8601 = vst [vmem:[#allocation11_spill] sm:$0xff] %v4567_v7  ;;  %v160_v12 = vld [vmem:[%s4547_s28 + $0x38] sm:$0xff]  ;;  %v159_v13 = vld [vmem:[%s4547_s28 + $0x30] sm:$0xff]  ;;  %v4633_v33 = vand.u32 127, %v217_v32  ;;  %s6994_s29 = scalar_lea.vmem [#allocation5], %s3817_s25 }
  0x41   : > { %8602 = vst [vmem:[#allocation12_spill] sm:$0xff] %v4575_v10  ;;  %8603 = vst [vmem:[#allocation13_spill] sm:$0xff] %v4577_v11  ;;  %v4585_v14 = vmul.f32 0.017453292, %v160_v12  ;;  %v4587_v15 = vmul.f32 0.017453292, %v159_v13 }
  0x42   : > { %v162_v16 = vld [vmem:[%s4547_s28 + $0x48] sm:$0xff]  ;;  %v161_v17 = vld [vmem:[%s4547_s28 + $0x40] sm:$0xff]  ;;  %v164_v20 = vld [vmem:[%s4547_s28 + $0x58] sm:$0xff]  ;;  %8614 = vst [vmem:[#allocation24_spill] sm:$0xff] %v4633_v33  ;;  %vm219_vm0 = vcmp.lt.s32.totalorder %v4633_v33, 127  ;;  %s3953_s30 = sshll.u32 %s4400_s9, 11 }
  0x43   : > { %191 = vrot.lane.b32.xlu1 %v4565_v6, %s4411_s27  ;;  %187 = vrot.lane.b32.xlu0 %v4567_v7, %s4411_s27  ;;  %8604 = vst [vmem:[#allocation14_spill] sm:$0xff] %v4585_v14  ;;  %8605 = vst [vmem:[#allocation15_spill] sm:$0xff] %v4587_v15  ;;  %v4595_v18 = vmul.f32 0.017453292, %v162_v16  ;;  %v4597_v19 = vmul.f32 0.017453292, %v161_v17  ;;  %s8443_s5 = scalar_lea.hbm %s8494_s1, %s3953_s30 }
  0x44   : > { %v163_v21 = vld [vmem:[%s4547_s28 + $0x50] sm:$0xff]  ;;  %v4605_v22 = vmul.f32 0.017453292, %v164_v20  ;;  %v166_v24 = vld [vmem:[%s4547_s28 + $0x68] sm:$0xff]  ;;  %v165_v25 = vld [vmem:[%s4547_s28 + $0x60] sm:$0xff]  ;;  %s3725_s2 = sshll.u32 %s6994_s29, 4  ;;  %s8445_s2 = int_to_ptr.vmem [resolvable:$true] %s3725_s2 }
  0x45   : > { %8606 = vst [vmem:[#allocation16_spill] sm:$0xff] %v4595_v18  ;;  %8607 = vst [vmem:[#allocation17_spill] sm:$0xff] %v4597_v19  ;;  %v4607_v23 = vmul.f32 0.017453292, %v163_v21  ;;  %v4615_v26 = vmul.f32 0.017453292, %v166_v24 }
  0x46   : > { %8608 = vst [vmem:[#allocation18_spill] sm:$0xff] %v4605_v22  ;;  %v4617_v27 = vmul.f32 0.017453292, %v165_v25  ;;  %v168_v28 = vld [vmem:[%s4547_s28 + $0x78] sm:$0xff]  ;;  %v167_v29 = vld [vmem:[%s4547_s28 + $0x70] sm:$0xff]  ;;  %s3709_s12 = scalar_lea.sflag [#allocation4], %s4541_s24 }
  0x47   : > { %195 = vrot.lane.b32.xlu1 %v4575_v10, %s4411_s27  ;;  %193 = vrot.lane.b32.xlu0 %v4577_v11, %s4411_s27  ;;  %8609 = vst [vmem:[#allocation19_spill] sm:$0xff] %v4607_v23  ;;  %8610 = vst [vmem:[#allocation20_spill] sm:$0xff] %v4615_v26  ;;  %v4625_v30 = vmul.f32 0.017453292, %v168_v28  ;;  %v4627_v31 = vmul.f32 0.017453292, %v167_v29 }
  0x48   : > { %8611 = vst [vmem:[#allocation21_spill] sm:$0xff] %v4617_v27  ;;  %v8503_v54 = vmov 2475754826   ;;  %v8501_v56 = vmov 2131351028   ;;  %s4326_s13 = scalar_lea.vmem %s8445_s2, 2048 }
  0x49   : > { %8612 = vst [vmem:[#allocation22_spill] sm:$0xff] %v4625_v30  ;;  %8613 = vst [vmem:[#allocation23_spill] sm:$0xff] %v4627_v31  ;;  %v8505_v58 = vmov 2102212464   ;;  %v8509_v61 = vmov 920167782   ;;  %p4327_p8 = scmp.ne.s32.totalorder %s8445_s2, %s4326_s13 }
  0x4a   : > { %p8847_p9 = scmp.ne.s32.totalorder %s8593_s19, 0  ;;  %s4419_s9 = smov [#allocation5]  }
  0x4b   : > { %199 = vrot.lane.b32.xlu1 %v4585_v14, %s4411_s27  ;;  %197 = vrot.lane.b32.xlu0 %v4587_v15, %s4411_s27  ;;  %s4330_s15 = sshll.u32 %s4419_s9, 4  ;;  %s4331_s15 = int_to_ptr.vmem [resolvable:$false] %s4330_s15 }
  0x4c   : > { %p4328_p11 = pnand %p4327_p8, %p8847_p9  ;;  %s4332_s16 = scalar_lea.vmem %s4331_s15, 4096 }
  0x4d   : > { %p4333_p7 = scmp.lt.s32.totalorder %s8445_s2, %s4331_s15  ;;  %p4334_p13 = scmp.lt.s32.totalorder %s4332_s16, %s4326_s13 }
  0x4e   : > { %p4329_p0 = pneg %p4328_p11 }
  0x4f   : > { %203 = vrot.lane.b32.xlu1 %v4595_v18, %s4411_s27  ;;  %201 = vrot.lane.b32.xlu0 %v4597_v19, %s4411_s27  ;;  %p4335_p3 = por %p4334_p13, %p4333_p7 }
  0x51   : > { %p4336_p6 = pnand %p4335_p3, %p4329_p0 }
  0x53   : > { %207 = vrot.lane.b32.xlu1 %v4605_v22, %s4411_s27  ;;  %205 = vrot.lane.b32.xlu0 %v4607_v23, %s4411_s27 }
  0x57   : > { %211 = vrot.lane.b32.xlu1 %v4615_v26, %s4411_s27  ;;  %209 = vrot.lane.b32.xlu0 %v4617_v27, %s4411_s27 }
  0x5b   : > { %215 = vrot.lane.b32.xlu1 %v4625_v30, %s4411_s27  ;;  %213 = vrot.lane.b32.xlu0 %v4627_v31, %s4411_s27 }
  0x5f   : > { %238 = vrot.lane.b32.xlu1 %v154_v5, %s4412_s18  ;;  %236 = vrot.lane.b32.xlu0 %v153_v1, %s4412_s18  ;;  %v8499_v5 = vmov 683565275  }
  0x63   : > { %242 = vrot.lane.b32.xlu1 %v156_v2, %s4412_s18  ;;  %240 = vrot.lane.b32.xlu0 %v155_v0, %s4412_s18  ;;  %v8507_v0 = vmov 1326507024  }
  0x67   : > { %246 = vrot.lane.b32.xlu1 %v158_v8, %s4412_s18  ;;  %244 = vrot.lane.b32.xlu0 %v157_v9, %s4412_s18 }
  0x6b   : > { %250 = vrot.lane.b32.xlu1 %v160_v12, %s4412_s18  ;;  %248 = vrot.lane.b32.xlu0 %v159_v13, %s4412_s18 }
  0x6f   : > { %254 = vrot.lane.b32.xlu1 %v162_v16, %s4412_s18  ;;  %252 = vrot.lane.b32.xlu0 %v161_v17, %s4412_s18 }
  0x73   : > { %258 = vrot.lane.b32.xlu1 %v164_v20, %s4412_s18  ;;  %256 = vrot.lane.b32.xlu0 %v163_v21, %s4412_s18 }
  0x77   : > { %262 = vrot.lane.b32.xlu1 %v166_v24, %s4412_s18  ;;  %260 = vrot.lane.b32.xlu0 %v165_v25, %s4412_s18 }
  0x7b   : > { %266 = vrot.lane.b32.xlu1 %v168_v28, %s4412_s18  ;;  %264 = vrot.lane.b32.xlu0 %v167_v29, %s4412_s18 }
  0xb1   : > { %v190_v34 = vpop.permute.xlu1 %189  ;;  %v4635_v35 = vpop.permute.xlu0 %185 }
  0xb2   : > { %8615 = vst [vmem:[#allocation25_spill] sm:$0xff] %v4635_v35 }
  0xb5   : > { %v4638_v36 = vpop.permute.xlu1 %191  ;;  %v188_v37 = vpop.permute.xlu0 %187 }
  0xb6   : > { %v4643_v38 = vsel %vm219_vm0, %v190_v34, %v4638_v36  ;;  %v4648_v39 = vsel %vm219_vm0, %v4635_v35, %v188_v37  ;;  %v4655_v51 = vsel %vm219_vm0, %v188_v37, %v190_v34 }
  0xb7   : > { %v494_v40 = vand.u32 2139095040, %v4643_v38  ;;  %v288_v41 = vand.u32 2139095040, %v4648_v39  ;;  %v8497_v49 = vand.u32 2147483647, %v4643_v38  ;;  %v391_v17 = vand.u32 2139095040, %v4655_v51 }
  0xb9   : > { %v495_v42 = vshrl.u32 %v494_v40, 23  ;;  %v289_v44 = vshrl.u32 %v288_v41, 23  ;;  %v498_v2 = vand.u32 8388607, %v8497_v49  ;;  %v392_v32 = vshrl.u32 %v391_v17, 23 }
  0xbb   : > { %v3827_v43 = vadd.s32 4294967169, %v495_v42  ;;  %v3819_v47 = vadd.s32 4294967169, %v289_v44  ;;  %v499_v34 = vor.u32 8388608, %v498_v2  ;;  %v8496_v2 = vand.u32 2147483647, %v4648_v39 }
  0xbd   : > { %v501_v45 = vadd.s32 1, %v3827_v43  ;;  %v295_v52 = vadd.s32 1, %v3819_v47  ;;  %v539_v47 = vshll.u32 %v499_v34, 8 }
  0xbf   : > { %vm502_vm1 = vcmp.gt.s32.totalorder %v501_v45, 0  ;;  %vm296_vm2 = vcmp.gt.s32.totalorder %v295_v52, 0 }
  0xc0   : > { %v503_v46 = vsel %vm502_vm1, %v501_v45, 0  ;;  %v297_v29 = vsel %vm296_vm2, %v295_v52, 0  ;;  %v3823_v45 = vadd.s32 4294967169, %v392_v32 }
  0xc1   : > { %v505_v48 = vand.u32 31, %v503_v46  ;;  %v4657_v53 = vshrl.u32 %v503_v46, 5  ;;  %v299_v43 = vand.u32 31, %v297_v29 }
  0xc3   : > { %v506_v50 = vsub.s32 32, %v505_v48  ;;  %v517_v60 = vshll.u32 %v8505_v58, %v505_v48  ;;  %v520_v63 = vshll.u32 %v8509_v61, %v505_v48  ;;  %v508_v8 = vshll.u32 %v8499_v5, %v505_v48 }
  0xc4   : > { %v511_v9 = vshll.u32 %v8503_v54, %v505_v48  ;;  %v514_v12 = vshll.u32 %v8501_v56, %v505_v48  ;;  %vm526_vm3 = vcmp.lt.s32.totalorder %v4657_v53, 4  ;;  %vm523_vm4 = vcmp.lt.s32.totalorder %v4657_v53, 1 }
  0xc5   : > { %v509_v55 = vshrl.u32 %v8503_v54, %v506_v50  ;;  %v512_v57 = vshrl.u32 %v8501_v56, %v506_v50  ;;  %v515_v59 = vshrl.u32 %v8505_v58, %v506_v50  ;;  %v518_v62 = vshrl.u32 %v8509_v61, %v506_v50 }
  0xc6   : > { %v521_v1 = vshrl.u32 %v8507_v0, %v506_v50  ;;  %vm525_vm5 = vcmp.lt.s32.totalorder %v4657_v53, 3  ;;  %vm524_vm6 = vcmp.lt.s32.totalorder %v4657_v53, 2  ;;  %v314_v32 = vshll.u32 %v8509_v61, %v299_v43 }
  0xc7   : > { %v519_v13 = vor.u32 %v518_v62, %v517_v60  ;;  %v510_v20 = vor.u32 %v509_v55, %v508_v8  ;;  %v513_v21 = vor.u32 %v512_v57, %v511_v9  ;;  %v516_v24 = vor.u32 %v515_v59, %v514_v12 }
  0xc8   : > { %v522_v16 = vor.u32 %v521_v1, %v520_v63  ;;  %v4696_v55 = vsub.s32 32, %v299_v43  ;;  %v398_v60 = vadd.s32 1, %v3823_v45  ;;  %v507_v1 = vshrl.u32 %v8499_v5, %v506_v50 }
  0xc9   : > { %v532_v25 = vsel %vm526_vm3, %v519_v13, 920167782  ;;  %v531_v37 = vsel %vm523_vm4, %v510_v20, %v513_v21  ;;  %v535_v41 = vsel %vm523_vm4, %v513_v21, %v516_v24  ;;  %v528_v62 = vsel %vm526_vm3, %v516_v24, 2102212464 }
  0xca   : > { %v536_v28 = vsel %vm526_vm3, %v522_v16, 1326507024  ;;  %v533_v40 = vsel %vm525_vm5, %v516_v24, %v532_v25  ;;  %v312_v63 = vshrl.u32 %v8509_v61, %v4696_v55  ;;  %v4707_v8 = vshrl.u32 %v297_v29, 5 }
  0xcb   : > { %v537_v42 = vsel %vm525_vm5, %v519_v13, %v536_v28  ;;  %v534_v44 = vsel %vm524_vm6, %v531_v37, %v533_v40  ;;  %vm399_vm7 = vcmp.gt.s32.totalorder %v398_v60, 0  ;;  %v302_v9 = vshll.u32 %v8499_v5, %v299_v43 }
  0xcc   : > { %v538_v46 = vsel %vm524_vm6, %v535_v41, %v537_v42  ;;  %v4692_v48 = vmul.u32.u64.low %v539_v47, %v534_v44  ;;  %v4693_v52 = vmul.u32.u64.high %v539_v47, %v534_v44, %v4692_v48  ;;  %v303_v12 = vshrl.u32 %v8503_v54, %v4696_v55 }
  0xcd   : > { %v4698_v57 = vmul.u32.u64.low %v539_v47, %v538_v46  ;;  %v4699_v59 = vmul.u32.u64.high %v539_v47, %v538_v46, %v4698_v57  ;;  %v311_v13 = vshll.u32 %v8505_v58, %v299_v43  ;;  %v315_v16 = vshrl.u32 %v8507_v0, %v4696_v55 }
  0xce   : > { %v527_v17 = vsel %vm523_vm4, %v507_v1, %v510_v20  ;;  %v529_v50 = vsel %vm525_vm5, %v513_v21, %v528_v62  ;;  %v306_v24 = vshrl.u32 %v8501_v56, %v4696_v55  ;;  %v309_v25 = vshrl.u32 %v8505_v58, %v4696_v55 }
  0xcf   : > { %v549_v28 = vadd.s32 1, %v4693_v52  ;;  %v313_v29 = vor.u32 %v312_v63, %v311_v13  ;;  %v400_v34 = vsel %vm399_vm7, %v398_v60, 0  ;;  %vm548_vm8 = vc.u32 %v4699_v59, %v4692_v48 }
  0xd0   : > { %v305_v20 = vshll.u32 %v8503_v54, %v299_v43  ;;  %v308_v37 = vshll.u32 %v8501_v56, %v299_v43  ;;  %v530_v21 = vsel %vm524_vm6, %v527_v17, %v529_v50  ;;  %v292_v40 = vand.u32 8388607, %v8496_v2  ;;  %v4787_v2 = vpop.permute.xlu0 %193 }
  0xd1   : > { %v304_v41 = vor.u32 %v303_v12, %v302_v9  ;;  %v316_v42 = vor.u32 %v315_v16, %v314_v32  ;;  %vm320_vm9 = vcmp.lt.s32.totalorder %v4707_v8, 4  ;;  %v402_v46 = vand.u32 31, %v400_v34 }
  0xd2   : > { %v307_v44 = vor.u32 %v306_v24, %v305_v20  ;;  %v310_v45 = vor.u32 %v309_v25, %v308_v37  ;;  %v550_v57 = vsel %vm548_vm8, %v549_v28, %v4693_v52  ;;  %v326_v60 = vsel %vm320_vm9, %v313_v29, 920167782 }
  0xd3   : > { %v546_v62 = vmul.u32 %v539_v47, %v530_v21  ;;  %v293_v43 = vor.u32 8388608, %v292_v40  ;;  %vm317_vm10 = vcmp.lt.s32.totalorder %v4707_v8, 1  ;;  %vm319_vm11 = vcmp.lt.s32.totalorder %v4707_v8, 3 }
  0xd4   : > { %v330_v53 = vsel %vm320_vm9, %v316_v42, 1326507024  ;;  %v325_v1 = vsel %vm317_vm10, %v304_v41, %v307_v44  ;;  %v327_v9 = vsel %vm319_vm11, %v310_v45, %v326_v60  ;;  %v4745_v52 = vsub.s32 32, %v402_v46 }
  0xd5   : > { %v551_v63 = vadd.s32 %v550_v57, %v546_v62  ;;  %vm318_vm12 = vcmp.lt.s32.totalorder %v4707_v8, 2  ;;  %v329_v47 = vsel %vm317_vm10, %v307_v44, %v310_v45  ;;  %v331_v12 = vsel %vm319_vm11, %v313_v29, %v330_v53 }
  0xd6   : > { %v328_v13 = vsel %vm318_vm12, %v325_v1, %v327_v9  ;;  %v333_v17 = vshll.u32 %v293_v43, 8  ;;  %v415_v50 = vshrl.u32 %v8509_v61, %v4745_v52  ;;  %v332_v24 = vsel %vm318_vm12, %v329_v47, %v331_v12 }
  0xd7   : > { %v552_v16 = vadd.s32 536870912, %v551_v63  ;;  %v8498_v25 = vand.u32 2147483647, %v4655_v51  ;;  %v418_v28 = vshrl.u32 %v8507_v0, %v4745_v52  ;;  %v4765_v29 = vshrl.u32 %v400_v34, 5 }
  0xd8   : > { %v4761_v32 = vmul.u32.u64.low %v333_v17, %v328_v13  ;;  %v4762_v20 = vmul.u32.u64.high %v333_v17, %v328_v13, %v4761_v32  ;;  %v414_v37 = vshll.u32 %v8505_v58, %v402_v46  ;;  %v406_v21 = vshrl.u32 %v8503_v54, %v4745_v52 }
  0xd9   : > { %v409_v40 = vshrl.u32 %v8501_v56, %v4745_v52  ;;  %v412_v42 = vshrl.u32 %v8505_v58, %v4745_v52  ;;  %v417_v57 = vshll.u32 %v8509_v61, %v402_v46  ;;  %v4775_v60 = vshrl.u32 %v552_v16, 30 }
  0xda   : > { %v4777_v62 = vmul.u32.u64.low %v333_v17, %v332_v24  ;;  %v4778_v43 = vmul.u32.u64.high %v333_v17, %v332_v24, %v4777_v62  ;;  %v416_v34 = vor.u32 %v415_v50, %v414_v37  ;;  %v405_v53 = vshll.u32 %v8499_v5, %v402_v46 }
  0xdb   : > { %v408_v1 = vshll.u32 %v8503_v54, %v402_v46  ;;  %v411_v9 = vshll.u32 %v8501_v56, %v402_v46  ;;  %v419_v47 = vor.u32 %v418_v28, %v417_v57  ;;  %v322_v12 = vsel %vm320_vm9, %v310_v45, 2102212464 }
  0xdc   : > { %v395_v13 = vand.u32 8388607, %v8498_v25  ;;  %v407_v16 = vor.u32 %v406_v21, %v405_v53  ;;  %vm423_vm13 = vcmp.lt.s32.totalorder %v4765_v29, 4  ;;  %v301_v50 = vshrl.u32 %v8499_v5, %v4696_v55 }
  0xdd   : > { %v410_v49 = vor.u32 %v409_v40, %v408_v1  ;;  %v413_v24 = vor.u32 %v412_v42, %v411_v9  ;;  %v429_v46 = vsel %vm423_vm13, %v416_v34, 920167782  ;;  %v554_v28 = vshll.u32 %v4775_v60, 30 }
  0xde   : > { %v433_v45 = vsel %vm423_vm13, %v419_v47, 1326507024  ;;  %v4801_v37 = vsel %vm219_vm0, %v4638_v36, %v4787_v2  ;;  %v321_v21 = vsel %vm317_vm10, %v301_v50, %v304_v41  ;;  %v323_v55 = vsel %vm319_vm11, %v307_v44, %v322_v12 }
  0xdf   : > { %8616 = vst [vmem:[#allocation26_spill] sm:$0xff] %v4801_v37  ;;  %vm420_vm14 = vcmp.lt.s32.totalorder %v4765_v29, 1  ;;  %vm422_vm15 = vcmp.lt.s32.totalorder %v4765_v29, 3  ;;  %v343_v40 = vadd.s32 1, %v4762_v20  ;;  %v396_v42 = vor.u32 8388608, %v395_v13 }
  0xe0   : > { %v428_v57 = vsel %vm420_vm14, %v407_v16, %v410_v49  ;;  %v430_v36 = vsel %vm422_vm15, %v413_v24, %v429_v46  ;;  %vm342_vm1 = vc.u32 %v4778_v43, %v4761_v32  ;;  %v432_v41 = vsel %vm420_vm14, %v410_v49, %v413_v24 }
  0xe1   : > { %v434_v44 = vsel %vm422_vm15, %v416_v34, %v433_v45  ;;  %v597_v62 = vand.u32 2139095040, %v4801_v37  ;;  %v4821_v53 = vsub.s32 %v551_v63, %v554_v28  ;;  %v324_v1 = vsel %vm318_vm12, %v321_v21, %v323_v55 }
  0xe2   : > { %vm421_vm2 = vcmp.lt.s32.totalorder %v4765_v29, 2  ;;  %v344_v47 = vsel %vm342_vm1, %v343_v40, %v4762_v20  ;;  %v436_v13 = vshll.u32 %v396_v42, 8  ;;  %v340_v50 = vmul.u32 %v333_v17, %v324_v1 }
  0xe3   : > { %v431_v9 = vsel %vm421_vm2, %v428_v57, %v430_v36  ;;  %v435_v12 = vsel %vm421_vm2, %v432_v41, %v434_v44  ;;  %v598_v34 = vshrl.u32 %v597_v62, 23  ;;  %v557_v46 = vsub.s32 0, %v4821_v53 }
  0xe4   : > { %v4832_v63 = vmul.u32.u64.low %v436_v13, %v431_v9  ;;  %v4833_v28 = vmul.u32.u64.high %v436_v13, %v431_v9, %v4832_v63  ;;  %v345_v8 = vadd.s32 %v344_v47, %v340_v50  ;;  %v425_v20 = vsel %vm423_vm13, %v413_v24, 2102212464 }
  0xe5   : > { %v4836_v45 = vmul.u32.u64.low %v436_v13, %v435_v12  ;;  %v4837_v21 = vmul.u32.u64.high %v436_v13, %v435_v12, %v4836_v45  ;;  %v3831_v55 = vadd.s32 4294967169, %v598_v34  ;;  %v3828_v57 = vmin.u32 %v557_v46, %v4821_v53 }
  0xe6   : > { %v2160_v40 = vand.u32 2139095040, %v4556_v3  ;;  %v346_v17 = vadd.s32 536870912, %v345_v8  ;;  %v404_v42 = vshrl.u32 %v8499_v5, %v4745_v52  ;;  %v1952_v36 = vand.u32 2139095040, %v4558_v4  ;;  %v4857_v52 = vpop.permute.xlu1 %195 }
  0xe7   : > { %v2264_v41 = vand.u32 2139095040, %v4565_v6  ;;  %v426_v62 = vsel %vm422_vm15, %v410_v49, %v425_v20  ;;  %v604_v1 = vadd.s32 1, %v3831_v55  ;;  %v2056_v9 = vand.u32 2139095040, %v4567_v7 }
  0xe8   : > { %v424_v44 = vsel %vm420_vm14, %v404_v42, %v407_v16  ;;  %v559_v24 = vclz %v3828_v57  ;;  %v446_v47 = vadd.s32 1, %v4833_v28  ;;  %v2161_v12 = vshrl.u32 %v2160_v40, 23 }
  0xe9   : > { %v4853_v50 = vshrl.u32 %v346_v17, 30  ;;  %vm445_vm3 = vc.u32 %v4837_v21, %v4832_v63  ;;  %v1953_v34 = vshrl.u32 %v1952_v36, 23  ;;  %v2472_v16 = vand.u32 2139095040, %v4575_v10 }
  0xea   : > { %v427_v49 = vsel %vm421_vm2, %v424_v44, %v426_v62  ;;  %v2265_v46 = vshrl.u32 %v2264_v41, 23  ;;  %v2368_v45 = vand.u32 2139095040, %v4577_v11  ;;  %v2680_v55 = vand.u32 2139095040, %v4585_v14 }
  0xeb   : > { %vm605_vm4 = vcmp.gt.s32.totalorder %v604_v1, 0  ;;  %v2057_v57 = vshrl.u32 %v2056_v9, 23  ;;  %v3829_v20 = vadd.s32 4294967294, %v559_v24  ;;  %v447_v40 = vsel %vm445_vm3, %v446_v47, %v4833_v28 }
  0xec   : > { %v4869_v17 = vsel %vm219_vm0, %v4787_v2, %v4857_v52  ;;  %v4871_v42 = vadd.s32 4294967169, %v2161_v12  ;;  %v2576_v29 = vand.u32 2139095040, %v4587_v15  ;;  %v348_v36 = vshll.u32 %v4853_v50, 30 }
  0xed   : > { %v443_v41 = vmul.u32 %v436_v13, %v427_v49  ;;  %v2473_v44 = vshrl.u32 %v2472_v16, 23  ;;  %v2888_v62 = vand.u32 2139095040, %v4595_v18  ;;  %v2784_v9 = vand.u32 2139095040, %v4597_v19 }
  0xee   : > { %8617 = vst [vmem:[#allocation27_spill] sm:$0xff] %v4871_v42  ;;  %v606_v24 = vsel %vm605_vm4, %v604_v1, 0  ;;  %v4877_v28 = vadd.s32 4294967169, %v1953_v34  ;;  %v4879_v47 = vadd.s32 4294967169, %v2265_v46  ;;  %v700_v2 = vand.u32 2139095040, %v4869_v17 }
  0xef   : > { %v4881_v25 = vadd.s32 %v447_v40, %v443_v41  ;;  %v4884_v12 = vadd.s32 4294967169, %v2057_v57  ;;  %v2369_v5 = vshrl.u32 %v2368_v45, 23  ;;  %v2681_v56 = vshrl.u32 %v2680_v55, 23 }
  0xf0   : > { %8618 = vst [vmem:[#allocation28_spill] sm:$0xff] %v4877_v28  ;;  %8619 = vst [vmem:[#allocation29_spill] sm:$0xff] %v4879_v47  ;;  %vm3830_vm5 = vcmp.lt.s32.totalorder %v3829_v20, 0  ;;  %v2577_v13 = vshrl.u32 %v2576_v29, 23  ;;  %v4886_v16 = vsub.s32 %v345_v8, %v348_v36  ;;  %v608_v49 = vand.u32 31, %v606_v24 }
  0xf1   : > { %8620 = vst [vmem:[#allocation30_spill] sm:$0xff] %v4884_v12  ;;  %v701_v54 = vshrl.u32 %v700_v2, 23  ;;  %v4888_v58 = vadd.s32 4294967169, %v2473_v44  ;;  %v2889_v1 = vshrl.u32 %v2888_v62, 23  ;;  %v2785_v34 = vshrl.u32 %v2784_v9, 23 }
  0xf2   : > { %v3096_v46 = vand.u32 2139095040, %v4605_v22  ;;  %v2992_v40 = vand.u32 2139095040, %v4607_v23  ;;  %v562_v41 = vsel %vm3830_vm5, 0, %v3829_v20  ;;  %v449_v57 = vadd.s32 536870912, %v4881_v25 }
  0xf3   : > { %8621 = vst [vmem:[#allocation31_spill] sm:$0xff] %v4888_v58  ;;  %v3835_v0 = vadd.s32 4294967169, %v701_v54  ;;  %v4893_v45 = vadd.s32 4294967169, %v2369_v5  ;;  %v4895_v55 = vadd.s32 4294967169, %v2681_v56  ;;  %v3304_v8 = vand.u32 2139095040, %v4615_v26 }
  0xf4   : > { %v3200_v29 = vand.u32 2139095040, %v4617_v27  ;;  %v4899_v36 = vadd.s32 4294967169, %v2577_v13  ;;  %v351_v44 = vsub.s32 0, %v4886_v16  ;;  %v4902_v62 = vsub.s32 32, %v608_v49 }
  0xf5   : > { %8622 = vst [vmem:[#allocation32_spill] sm:$0xff] %v4893_v45  ;;  %8623 = vst [vmem:[#allocation33_spill] sm:$0xff] %v4895_v55  ;;  %v707_v9 = vadd.s32 1, %v3835_v0  ;;  %v4904_v2 = vadd.s32 4294967169, %v2889_v1  ;;  %v4906_v20 = vadd.s32 4294967169, %v2785_v34  ;;  %v563_v54 = vsub.s32 32, %v562_v41 }
  0xf6   : > { %8624 = vst [vmem:[#allocation34_spill] sm:$0xff] %v4899_v36  ;;  %v4909_v56 = vshrl.u32 %v3096_v46, 23  ;;  %v4911_v61 = vshrl.u32 %v2992_v40, 23  ;;  %v4913_v26 = vshrl.u32 %v449_v57, 30  ;;  %v4915_v13 = vshrl.u32 %v3304_v8, 23 }
  0xf7   : > { %8625 = vst [vmem:[#allocation35_spill] sm:$0xff] %v4904_v2  ;;  %8626 = vst [vmem:[#allocation36_spill] sm:$0xff] %v4906_v20  ;;  %vm708_vm6 = vcmp.gt.s32.totalorder %v707_v9, 0  ;;  %v4917_v27 = vshrl.u32 %v3200_v29, 23  ;;  %v547_v0 = vadd.s32 %v4692_v48, %v4699_v59  ;;  %v567_v22 = vsub.s32 4294967266, %v562_v41 }
  0xf8   : > { %8627 = vst [vmem:[#allocation37_spill] sm:$0xff] %v4913_v26  ;;  %v709_v1 = vsel %vm708_vm6, %v707_v9, 0  ;;  %v3820_v5 = vmin.u32 %v351_v44, %v4886_v16  ;;  %v8628_v46 = vmov 920167782   ;;  %v8629_v8 = vand.u32 2147483647, %v4801_v37 }
  0xf9   : > { %v621_v40 = vshrl.u32 %v8628_v46, %v4902_v62  ;;  %v565_v23 = vshrl.u32 %v547_v0, %v563_v54  ;;  %v8630_v29 = vmov 1326507024   ;;  %v451_v48 = vshll.u32 %v4913_v26, 30 }
  0xfa   : > { %v601_v2 = vand.u32 8388607, %v8629_v8  ;;  %v624_v18 = vshrl.u32 %v8630_v29, %v4902_v62  ;;  %v4931_v59 = vshrl.u32 %v606_v24, 5  ;;  %v8631_v9 = vmov 2102212464   ;;  %v4941_v8 = vpop.permute.xlu0 %197 }
  0xfb   : > { %v620_v34 = vshll.u32 %v8631_v9, %v608_v49  ;;  %v711_v19 = vand.u32 31, %v709_v1  ;;  %v8632_v44 = vmov 2475754826   ;;  %v8633_v14 = vmov 2131351028  }
  0xfc   : > { %v612_v20 = vshrl.u32 %v8632_v44, %v4902_v62  ;;  %v615_v57 = vshrl.u32 %v8633_v14, %v4902_v62  ;;  %v618_v54 = vshrl.u32 %v8631_v9, %v4902_v62  ;;  %v623_v0 = vshll.u32 %v8628_v46, %v608_v49 }
  0xfd   : > { %v564_v55 = vshll.u32 %v4821_v53, %v562_v41  ;;  %v568_v24 = vadd.s32 127, %v567_v22  ;;  %v353_v36 = vclz %v3820_v5  ;;  %v622_v15 = vor.u32 %v621_v40, %v620_v34 }
  0xfe   : > { %v8634_v58 = vmov 683565275   ;;  %v614_v11 = vshll.u32 %v8632_v44, %v608_v49  ;;  %v617_v45 = vshll.u32 %v8633_v14, %v608_v49  ;;  %v625_v47 = vor.u32 %v624_v18, %v623_v0 }
  0xff   : > { %v611_v10 = vshll.u32 %v8634_v58, %v608_v49  ;;  %v4947_v6 = vor.u32 %v565_v23, %v564_v55  ;;  %v4950_v3 = vsub.s32 %v4881_v25, %v451_v48  ;;  %v4952_v42 = vsub.s32 32, %v711_v19 }
 0x100   : > { %v4958_v22 = vsel %vm219_vm0, %v4857_v52, %v4941_v8  ;;  %v4962_v41 = vor.u32 %v615_v57, %v614_v11  ;;  %v619_v5 = vor.u32 %v618_v54, %v617_v45  ;;  %vm629_vm7 = vcmp.lt.s32.totalorder %v4931_v59, 4 }
 0x101   : > { %v4960_v53 = vor.u32 %v612_v20, %v611_v10  ;;  %v569_v18 = vshll.u32 %v568_v24, 23  ;;  %v3821_v23 = vadd.s32 4294967294, %v353_v36  ;;  %v602_v49 = vor.u32 8388608, %v601_v2 }
 0x102   : > { %v635_v25 = vsel %vm629_vm7, %v622_v15, 920167782  ;;  %vm626_vm8 = vcmp.lt.s32.totalorder %v4931_v59, 1  ;;  %v639_v55 = vsel %vm629_vm7, %v625_v47, 1326507024  ;;  %v803_v10 = vand.u32 2139095040, %v4958_v22 }
 0x103   : > { %v454_v11 = vsub.s32 0, %v4950_v3  ;;  %vm627_vm9 = vcmp.lt.s32.totalorder %v4931_v59, 2  ;;  %vm628_vm10 = vcmp.lt.s32.totalorder %v4931_v59, 3  ;;  %v724_v45 = vshrl.u32 %v8628_v46, %v4952_v42 }
 0x104   : > { %v634_v36 = vsel %vm626_vm8, %v4960_v53, %v4962_v41  ;;  %v636_v47 = vsel %vm628_vm10, %v619_v5, %v635_v25  ;;  %v638_v2 = vsel %vm626_vm8, %v4962_v41, %v619_v5  ;;  %v727_v20 = vshrl.u32 %v8630_v29, %v4952_v42 }
 0x105   : > { %v640_v34 = vsel %vm628_vm10, %v622_v15, %v639_v55  ;;  %v4990_v40 = vshrl.u32 %v709_v1, 5  ;;  %v715_v57 = vshrl.u32 %v8632_v44, %v4952_v42  ;;  %v723_v48 = vshll.u32 %v8631_v9, %v711_v19 }
 0x106   : > { %v718_v54 = vshrl.u32 %v8633_v14, %v4952_v42  ;;  %v721_v0 = vshrl.u32 %v8631_v9, %v4952_v42  ;;  %v726_v24 = vshll.u32 %v8628_v46, %v711_v19  ;;  %v804_v25 = vshrl.u32 %v803_v10, 23 }
 0x107   : > { %v570_v52 = vor.u32 4788187, %v569_v18  ;;  %v637_v15 = vsel %vm627_vm9, %v634_v36, %v636_v47  ;;  %v5002_v1 = vshll.u32 %v602_v49, 8  ;;  %v725_v55 = vor.u32 %v724_v45, %v723_v48 }
 0x108   : > { %v714_v4 = vshll.u32 %v8634_v58, %v711_v19  ;;  %v717_v28 = vshll.u32 %v8632_v44, %v711_v19  ;;  %v720_v7 = vshll.u32 %v8633_v14, %v711_v19  ;;  %v728_v12 = vor.u32 %v727_v20, %v726_v24 }
 0x109   : > { %v3824_v35 = vmin.u32 %v454_v11, %v4950_v3  ;;  %v641_v37 = vsel %vm627_vm9, %v638_v2, %v640_v34  ;;  %v8635_v18 = vand.u32 2147483647, %v4869_v17  ;;  %v3839_v26 = vadd.s32 4294967169, %v804_v25 }
 0x10a   : > { %v716_v36 = vor.u32 %v715_v57, %v714_v4  ;;  %v719_v49 = vor.u32 %v718_v54, %v717_v28  ;;  %v722_v47 = vor.u32 %v721_v0, %v720_v7  ;;  %vm732_vm11 = vcmp.lt.s32.totalorder %v4990_v40, 4 }
 0x10b   : > { %v704_v10 = vand.u32 8388607, %v8635_v18  ;;  %vm3822_vm12 = vcmp.lt.s32.totalorder %v3821_v23, 0  ;;  %v5014_v45 = vmul.u32.u64.low %v5002_v1, %v637_v15  ;;  %v5015_v48 = vmul.u32.u64.high %v5002_v1, %v637_v15, %v5014_v45 }
 0x10c   : > { %v738_v19 = vsel %vm732_vm11, %v725_v55, 920167782  ;;  %v5021_v11 = vmul.u32.u64.low %v5002_v1, %v641_v37  ;;  %v5022_v2 = vmul.u32.u64.high %v5002_v1, %v641_v37, %v5021_v11  ;;  %v742_v4 = vsel %vm732_vm11, %v728_v12, 1326507024 }
 0x10d   : > { %v810_v28 = vadd.s32 1, %v3839_v26  ;;  %v571_v7 = vand.u32 2147483647, %v570_v52  ;;  %v631_v20 = vsel %vm629_vm7, %v619_v5, 2102212464  ;;  %vm729_vm13 = vcmp.lt.s32.totalorder %v4990_v40, 1 }
 0x10e   : > { %vm731_vm14 = vcmp.lt.s32.totalorder %v4990_v40, 3  ;;  %v456_v34 = vclz %v3824_v35  ;;  %v705_v57 = vor.u32 8388608, %v704_v10  ;;  %v737_v54 = vsel %vm729_vm13, %v716_v36, %v719_v49 }
 0x10f   : > { %v739_v37 = vsel %vm731_vm14, %v722_v47, %v738_v19  ;;  %v610_v12 = vshrl.u32 %v8634_v58, %v4902_v62  ;;  %v741_v26 = vsel %vm729_vm13, %v719_v49, %v722_v47  ;;  %v743_v5 = vsel %vm731_vm14, %v725_v55, %v742_v4 }
 0x110   : > { %vm811_vm15 = vcmp.gt.s32.totalorder %v810_v28, 0  ;;  %v5041_v52 = vadd.s32 4294967169, %v4909_v56  ;;  %v5044_v35 = vadd.s32 4294967169, %v4911_v61  ;;  %v5047_v0 = vsel %vm3822_vm12, 0, %v3821_v23 }
 0x111   : > { %vm730_vm1 = vcmp.lt.s32.totalorder %v4990_v40, 2  ;;  %v573_v62 = vcvt.s32.f32 %v4947_v6  ;;  %v630_v24 = vsel %vm626_vm8, %v610_v12, %v4960_v53  ;;  %v632_v25 = vsel %vm628_vm10, %v4962_v41, %v631_v20 }
 0x112   : > { %8636 = vst [vmem:[#allocation38_spill] sm:$0xff] %v5041_v52  ;;  %8637 = vst [vmem:[#allocation39_spill] sm:$0xff] %v5044_v35  ;;  %v740_v56 = vsel %vm730_vm1, %v737_v54, %v739_v37  ;;  %v3825_v61 = vadd.s32 4294967294, %v456_v34  ;;  %v744_v23 = vsel %vm730_vm1, %v741_v26, %v743_v5  ;;  %v5061_v15 = vshll.u32 %v705_v57, 8  ;;  %v5095_v26 = vpop.permute.xlu1 %199 }
 0x113   : > { %v812_v55 = vsel %vm811_vm15, %v810_v28, 0  ;;  %v5064_v6 = vadd.s32 4294967169, %v4915_v13  ;;  %v574_v18 = vmul.f32 %v573_v62, %v571_v7  ;;  %v361_v53 = vsub.s32 4294967266, %v5047_v0 }
 0x114   : > { %v652_v10 = vadd.s32 1, %v5015_v48  ;;  %v633_v41 = vsel %vm627_vm9, %v630_v24, %v632_v25  ;;  %vm651_vm2 = vc.u32 %v5022_v2, %v5014_v45  ;;  %v734_v13 = vsel %vm732_vm11, %v722_v47, 2102212464 }
 0x115   : > { %8638 = vst [vmem:[#allocation40_spill] sm:$0xff] %v5064_v6  ;;  %v5073_v19 = vmul.u32.u64.low %v5061_v15, %v740_v56  ;;  %v5074_v11 = vmul.u32.u64.high %v5061_v15, %v740_v56, %v5073_v19  ;;  %v5080_v4 = vmul.u32.u64.low %v5061_v15, %v744_v23  ;;  %v5081_v28 = vmul.u32.u64.high %v5061_v15, %v744_v23, %v5080_v4 }
 0x116   : > { %v814_v7 = vand.u32 31, %v812_v55  ;;  %v5084_v20 = vadd.s32 4294967169, %v4917_v27  ;;  %v577_v59 = vsub.s32 4, %v4775_v60  ;;  %vm3826_vm3 = vcmp.lt.s32.totalorder %v3825_v61, 0 }
 0x117   : > { %v713_v34 = vshrl.u32 %v8634_v58, %v4952_v42  ;;  %v8640_v57 = vand.u32 2139095040, %v4625_v30  ;;  %v357_v47 = vsub.s32 32, %v5047_v0  ;;  %v362_v37 = vadd.s32 127, %v361_v53 }
 0x118   : > { %8639 = vst [vmem:[#allocation41_spill] sm:$0xff] %v5084_v20  ;;  %v653_v12 = vsel %vm651_vm2, %v652_v10, %v5015_v48  ;;  %v575_v5 = vxor.u32 2147483648, %v574_v18  ;;  %v649_v27 = vmul.u32 %v5002_v1, %v633_v41  ;;  %v735_v42 = vsel %vm731_vm14, %v719_v49, %v734_v13 }
 0x119   : > { %v5091_v54 = vshrl.u32 %v8640_v57, 23  ;;  %v733_v62 = vsel %vm729_vm13, %v713_v34, %v716_v36  ;;  %vm493_vm4 = vcmp.lt.s32.totalorder %v4643_v38, 0  ;;  %v341_v24 = vadd.s32 %v4761_v32, %v4778_v43 }
 0x11a   : > { %v5105_v25 = vsel %vm3826_vm3, 0, %v3825_v61  ;;  %v5107_v56 = vsub.s32 32, %v814_v7  ;;  %v8641_v48 = vand.u32 2139095040, %v4627_v31  ;;  %v5114_v1 = vsel %vm493_vm4, %v577_v59, %v4775_v60 }
 0x11b   : > { %v5116_v36 = vadd.s32 %v653_v12, %v649_v27  ;;  %v5122_v49 = vsel %vm219_vm0, %v4941_v8, %v5095_v26  ;;  %v8642_v32 = vand.u32 2147483647, %v4643_v38  ;;  %v358_v61 = vshll.u32 %v4886_v16, %v5047_v0 }
 0x11c   : > { %v5111_v23 = vshrl.u32 %v8641_v48, 23  ;;  %v359_v53 = vshrl.u32 %v341_v24, %v357_v47  ;;  %v444_v60 = vadd.s32 %v4832_v63, %v4837_v21  ;;  %v736_v10 = vsel %vm730_vm1, %v733_v62, %v735_v42 }
 0x11d   : > { %vm5126_vm5 = vcmp.le.f32.partialorder %v8642_v32, 0.7853982  ;;  %v576_v41 = vsel %vm493_vm4, %v575_v5, %v574_v18  ;;  %v363_v13 = vshll.u32 %v362_v37, 23  ;;  %v460_v8 = vsub.s32 32, %v5105_v25 }
 0x11e   : > { %v755_v4 = vadd.s32 1, %v5074_v11  ;;  %vm754_vm6 = vc.u32 %v5081_v28, %v5073_v19  ;;  %v827_v59 = vshrl.u32 %v8628_v46, %v5107_v56  ;;  %v830_v16 = vshrl.u32 %v8630_v29, %v5107_v56 }
 0x11f   : > { %v906_v63 = vand.u32 2139095040, %v5122_v49  ;;  %v464_v21 = vsub.s32 4294967266, %v5105_v25  ;;  %v655_v40 = vadd.s32 536870912, %v5116_v36  ;;  %v752_v0 = vmul.u32 %v5061_v15, %v736_v10 }
 0x120   : > { %v8548_v18 = vand.u32 2147483647, %v4958_v22  ;;  %v818_v34 = vshrl.u32 %v8632_v44, %v5107_v56  ;;  %v821_v57 = vshrl.u32 %v8633_v14, %v5107_v56  ;;  %v826_v47 = vshll.u32 %v8631_v9, %v814_v7 }
 0x121   : > { %v829_v37 = vshll.u32 %v8628_v46, %v814_v7  ;;  %v756_v12 = vsel %vm754_vm6, %v755_v4, %v5074_v11  ;;  %v5156_v5 = vshrl.u32 %v812_v55, 5  ;;  %v817_v27 = vshll.u32 %v8634_v58, %v814_v7 }
 0x122   : > { %v824_v15 = vshrl.u32 %v8631_v9, %v5107_v56  ;;  %v820_v62 = vshll.u32 %v8632_v44, %v814_v7  ;;  %v828_v42 = vor.u32 %v827_v59, %v826_v47  ;;  %v907_v48 = vshrl.u32 %v906_v63, 23 }
 0x123   : > { %v831_v24 = vor.u32 %v830_v16, %v829_v37  ;;  %v360_v32 = vor.u32 %v359_v53, %v358_v61  ;;  %v5162_v10 = vshrl.u32 %v655_v40, 30  ;;  %v807_v30 = vand.u32 8388607, %v8548_v18 }
 0x124   : > { %v823_v11 = vshll.u32 %v8633_v14, %v814_v7  ;;  %v5167_v55 = vadd.s32 %v756_v12, %v752_v0  ;;  %v5169_v4 = vor.u32 %v818_v34, %v817_v27  ;;  %v5171_v31 = vor.u32 %v821_v57, %v820_v62 }
 0x125   : > { %v3843_v6 = vadd.s32 4294967169, %v907_v48  ;;  %v579_v59 = vsel %vm5126_vm5, %v4643_v38, %v576_v41  ;;  %v364_v16 = vor.u32 4788187, %v363_v13  ;;  %vm835_vm7 = vcmp.lt.s32.totalorder %v5156_v5, 4 }
 0x126   : > { %v825_v61 = vor.u32 %v824_v15, %v823_v11  ;;  %v462_v53 = vshrl.u32 %v444_v60, %v460_v8  ;;  %v465_v63 = vadd.s32 127, %v464_v21  ;;  %v841_v7 = vsel %vm835_vm7, %v828_v42, 920167782 }
 0x127   : > { %v845_v40 = vsel %vm835_vm7, %v831_v24, 1326507024  ;;  %v461_v0 = vshll.u32 %v4950_v3, %v5105_v25  ;;  %v657_v34 = vshll.u32 %v5162_v10, 30  ;;  %vm832_vm8 = vcmp.lt.s32.totalorder %v5156_v5, 1 }
 0x128   : > { %v913_v41 = vadd.s32 1, %v3843_v6  ;;  %v758_v13 = vadd.s32 536870912, %v5167_v55  ;;  %v808_v57 = vor.u32 8388608, %v807_v30  ;;  %vm834_vm9 = vcmp.lt.s32.totalorder %v5156_v5, 3 }
 0x129   : > { %v840_v60 = vsel %vm832_vm8, %v5169_v4, %v5171_v31  ;;  %v842_v8 = vsel %vm834_vm9, %v825_v61, %v841_v7  ;;  %v844_v3 = vsel %vm832_vm8, %v5171_v31, %v825_v61  ;;  %v846_v6 = vsel %vm834_vm9, %v828_v42, %v845_v40 }
 0x12a   : > { %vm914_vm10 = vcmp.gt.s32.totalorder %v913_v41, 0  ;;  %v365_v25 = vand.u32 2147483647, %v364_v16  ;;  %v5198_v30 = vor.u32 %v462_v53, %v461_v0  ;;  %v466_v21 = vshll.u32 %v465_v63, 23 }
 0x12b   : > { %v915_v47 = vsel %vm914_vm10, %v913_v41, 0  ;;  %v5201_v37 = vadd.s32 4294967169, %v5091_v54  ;;  %v367_v12 = vcvt.s32.f32 %v360_v32  ;;  %vm833_vm11 = vcmp.lt.s32.totalorder %v5156_v5, 2 }
 0x12c   : > { %v917_v27 = vand.u32 31, %v915_v47  ;;  %v5205_v15 = vsub.s32 %v5116_v36, %v657_v34  ;;  %v5207_v62 = vshrl.u32 %v758_v13, 30  ;;  %v843_v42 = vsel %vm833_vm11, %v840_v60, %v842_v8 }
 0x12d   : > { %8645 = vst [vmem:[#allocation42_spill] sm:$0xff] %v5201_v37  ;;  %v847_v24 = vsel %vm833_vm11, %v844_v3, %v846_v6  ;;  %v580_v54 = vsel %vm5126_vm5, 0, %v5114_v1  ;;  %4152 = vcosq.f32 %v579_v59  ;;  %v5216_v48 = vshll.u32 %v808_v57, 8  ;;  %v5232_v1 = vpop.permute.xlu0 %201 }
 0x12e   : > { %v5218_v32 = vsub.s32 32, %v917_v27  ;;  %4154 = vsinq.f32 %v579_v59  ;;  %v5220_v36 = vmul.f32 %v367_v12, %v365_v25  ;;  %v467_v11 = vor.u32 4788187, %v466_v21 }
 0x12f   : > { %v470_v16 = vcvt.s32.f32 %v5198_v30  ;;  %v5224_v53 = vmul.u32.u64.low %v5216_v48, %v847_v24  ;;  %v5225_v63 = vmul.u32.u64.high %v5216_v48, %v847_v24, %v5224_v53  ;;  %v660_v43 = vsub.s32 0, %v5205_v15 }
 0x130   : > { %v5228_v7 = vmul.u32.u64.low %v5216_v48, %v843_v42  ;;  %v5229_v40 = vmul.u32.u64.high %v5216_v48, %v843_v42, %v5228_v7  ;;  %v760_v59 = vshll.u32 %v5207_v62, 30  ;;  %v8550_v0 = vand.u32 2147483647, %v5122_v49 }
 0x131   : > { %v930_v34 = vshrl.u32 %v8628_v46, %v5218_v32  ;;  %v921_v41 = vshrl.u32 %v8632_v44, %v5218_v32  ;;  %v924_v13 = vshrl.u32 %v8633_v14, %v5218_v32  ;;  %v927_v57 = vshrl.u32 %v8631_v9, %v5218_v32 }
 0x132   : > { %v933_v60 = vshrl.u32 %v8630_v29, %v5218_v32  ;;  %v837_v8 = vsel %vm835_vm7, %v825_v61, 2102212464  ;;  %v929_v3 = vshll.u32 %v8631_v9, %v917_v27  ;;  %v932_v6 = vshll.u32 %v8628_v46, %v917_v27 }
 0x133   : > { %v5255_v25 = vsel %vm219_vm0, %v5095_v26, %v5232_v1  ;;  %v5257_v30 = vshrl.u32 %v915_v47, 5  ;;  %v920_v21 = vshll.u32 %v8634_v58, %v917_v27  ;;  %v923_v12 = vshll.u32 %v8632_v44, %v917_v27 }
 0x134   : > { %v926_v42 = vshll.u32 %v8633_v14, %v917_v27  ;;  %v468_v24 = vand.u32 2147483647, %v467_v11  ;;  %v816_v61 = vshrl.u32 %v8634_v58, %v5107_v56  ;;  %v931_v53 = vor.u32 %v930_v34, %v929_v3 }
 0x135   : > { %v934_v18 = vor.u32 %v933_v60, %v932_v6  ;;  %v910_v37 = vand.u32 8388607, %v8550_v0  ;;  %v5266_v20 = vor.u32 %v921_v41, %v920_v21  ;;  %v5268_v26 = vor.u32 %v924_v13, %v923_v12 }
 0x136   : > { %v928_v47 = vor.u32 %v927_v57, %v926_v42  ;;  %vm287_vm12 = vcmp.lt.s32.totalorder %v4648_v39, 0  ;;  %v3832_v52 = vmin.u32 %v660_v43, %v5205_v15  ;;  %v836_v27 = vsel %vm832_vm8, %v816_v61, %v5169_v4 }
 0x137   : > { %v838_v56 = vsel %vm834_vm9, %v5171_v31, %v837_v8  ;;  %v1009_v11 = vand.u32 2139095040, %v5255_v25  ;;  %v5279_v34 = vpop.eup %4152  ;;  %v5282_v41 = vsub.s32 %v5167_v55, %v760_v59  ;;  %vm857_vm13 = vc.u32 %v5225_v63, %v5228_v7 }
 0x138   : > { %v858_v43 = vadd.s32 1, %v5229_v40  ;;  %vm938_vm14 = vcmp.lt.s32.totalorder %v5257_v30, 4  ;;  %v5288_v13 = vpop.eup %4154  ;;  %vm935_vm15 = vcmp.lt.s32.totalorder %v5257_v30, 1  ;;  %vm937_vm1 = vcmp.lt.s32.totalorder %v5257_v30, 3 }
 0x139   : > { %v944_v31 = vsel %vm938_vm14, %v931_v53, 920167782  ;;  %v948_v55 = vsel %vm938_vm14, %v934_v18, 1326507024  ;;  %v8646_v4 = vand.u32 2147483647, %v4648_v39  ;;  %v839_v57 = vsel %vm833_vm11, %v836_v27, %v838_v56 }
 0x13a   : > { %vm390_vm3 = vcmp.lt.s32.totalorder %v4655_v51, 0  ;;  %v911_v60 = vor.u32 8388608, %v910_v37  ;;  %v943_v8 = vsel %vm935_vm15, %v5266_v20, %v5268_v26  ;;  %v945_v18 = vsel %vm937_vm1, %v928_v47, %v944_v31 }
 0x13b   : > { %vm5298_vm2 = vcmp.le.f32.partialorder %v8646_v4, 0.7853982  ;;  %v662_v3 = vclz %v3832_v52  ;;  %v947_v6 = vsel %vm935_vm15, %v5268_v26, %v928_v47  ;;  %v949_v21 = vsel %vm937_vm1, %v931_v53, %v948_v55  ;;  %v8649_v55 = vld [vmem:[#allocation37_spill] sm:$0xff] }
 0x13c   : > { %v1010_v12 = vshrl.u32 %v1009_v11, 23  ;;  %v584_v5 = vand.u32 3, %v580_v54  ;;  %v369_v37 = vxor.u32 2147483648, %v5220_v36  ;;  %v859_v42 = vsel %vm857_vm13, %v858_v43, %v5229_v40 }
 0x13d   : > { %vm936_vm4 = vcmp.lt.s32.totalorder %v5257_v30, 2  ;;  %v471_v61 = vmul.f32 %v470_v16, %v468_v24  ;;  %v855_v52 = vmul.u32 %v5216_v48, %v839_v57  ;;  %v371_v53 = vsub.s32 4, %v4853_v50 }
 0x13e   : > { %v946_v27 = vsel %vm936_vm4, %v943_v8, %v945_v18  ;;  %v3847_v56 = vadd.s32 4294967169, %v1010_v12  ;;  %v763_v54 = vsub.s32 0, %v5282_v41  ;;  %v950_v11 = vsel %vm936_vm4, %v947_v6, %v949_v21 }
 0x13f   : > { %v5329_v31 = vshll.u32 %v911_v60, 8  ;;  %v474_v40 = vsub.s32 4, %v8649_v55  ;;  %v3833_v43 = vadd.s32 4294967294, %v662_v3  ;;  %v5332_v4 = vadd.s32 %v859_v42, %v855_v52 }
 0x140   : > { %v1016_v16 = vadd.s32 1, %v3847_v56  ;;  %v370_v48 = vsel %vm287_vm12, %v369_v37, %v5220_v36  ;;  %v8650_v24 = vand.u32 2147483647, %v4655_v51  ;;  %v472_v18 = vxor.u32 2147483648, %v471_v61 }
 0x141   : > { %v5344_v8 = vmul.u32.u64.low %v5329_v31, %v946_v27  ;;  %v5345_v60 = vmul.u32.u64.high %v5329_v31, %v946_v27, %v5344_v8  ;;  %v5349_v3 = vmul.u32.u64.low %v5329_v31, %v950_v11  ;;  %v5350_v6 = vmul.u32.u64.high %v5329_v31, %v950_v11, %v5349_v3 }
 0x142   : > { %vm5339_vm5 = vcmp.le.f32.partialorder %v8650_v24, 0.7853982  ;;  %vm1017_vm6 = vcmp.gt.s32.totalorder %v1016_v16, 0  ;;  %vm586_vm7 = vcmp.eq.s32.totalorder %v584_v5, 0  ;;  %v372_v36 = vsel %vm287_vm12, %v371_v53, %v4853_v50 }
 0x143   : > { %v3836_v21 = vmin.u32 %v763_v54, %v5282_v41  ;;  %v1018_v12 = vsel %vm1017_vm6, %v1016_v16, 0  ;;  %v373_v37 = vsel %vm5298_vm2, %v4648_v39, %v370_v48  ;;  %v475_v42 = vsel %vm390_vm3, %v474_v40, %v8649_v55 }
 0x144   : > { %vm3834_vm8 = vcmp.lt.s32.totalorder %v3833_v43, 0  ;;  %v861_v52 = vadd.s32 536870912, %v5332_v4  ;;  %v587_v27 = vxor.u32 2147483648, %v5288_v13  ;;  %vm589_vm9 = vcmp.eq.s32.totalorder %v584_v5, 2 }
 0x145   : > { %v590_v56 = vxor.u32 2147483648, %v5279_v34  ;;  %v940_v50 = vsel %vm938_vm14, %v928_v47, 2102212464  ;;  %v374_v53 = vsel %vm5298_vm2, 0, %v372_v36  ;;  %v473_v54 = vsel %vm390_vm3, %v472_v18, %v471_v61 }
 0x146   : > { %v919_v11 = vshrl.u32 %v8634_v58, %v5218_v32  ;;  %v1020_v55 = vand.u32 31, %v1018_v12  ;;  %4156 = vcosq.f32 %v373_v37  ;;  %v477_v40 = vsel %vm5339_vm5, 0, %v475_v42 }
 0x147   : > { %v5375_v16 = vsel %vm3834_vm8, 0, %v3833_v43  ;;  %v765_v48 = vclz %v3836_v21  ;;  %4158 = vsinq.f32 %v373_v37  ;;  %v5377_v24 = vshrl.u32 %v861_v52, 30  ;;  %v5410_v37 = vpop.permute.xlu1 %203 }
 0x148   : > { %v939_v47 = vsel %vm935_vm15, %v919_v11, %v5266_v20  ;;  %v941_v59 = vsel %vm937_vm1, %v5268_v26, %v940_v50  ;;  %v588_v32 = vsel %vm586_vm7, %v5279_v34, %v587_v27  ;;  %v591_v61 = vsel %vm589_vm9, %v590_v56, %v5288_v13 }
 0x149   : > { %v476_v43 = vsel %vm5339_vm5, %v4655_v51, %v473_v54  ;;  %v961_v18 = vadd.s32 1, %v5345_v60  ;;  %v5394_v3 = vadd.s32 4294967169, %v5111_v23  ;;  %v670_v20 = vsub.s32 4294967266, %v5375_v16 }
 0x14a   : > { %vm960_vm10 = vc.u32 %v5350_v6, %v5344_v8  ;;  %v5399_v26 = vsub.s32 32, %v1020_v55  ;;  %vm585_vm11 = vcmp.lt.s32.totalorder %v584_v5, 2  ;;  %v5401_v34 = vand.u32 3, %v374_v53 }
 0x14b   : > { %8653 = vst [vmem:[#allocation37_spill] sm:$0xff] %v5394_v3  ;;  %v3837_v13 = vadd.s32 4294967294, %v765_v48  ;;  %v942_v57 = vsel %vm936_vm4, %v939_v47, %v941_v59  ;;  %v5405_v36 = vsel %vm585_vm11, %v588_v32, %v591_v61  ;;  %4160 = vcosq.f32 %v476_v43 }
 0x14c   : > { %v5407_v21 = vand.u32 3, %v477_v40  ;;  %v863_v23 = vshll.u32 %v5377_v24, 30  ;;  %4162 = vsinq.f32 %v476_v43  ;;  %v650_v42 = vadd.s32 %v5014_v45, %v5022_v2 }
 0x14d   : > { %v666_v5 = vsub.s32 32, %v5375_v16  ;;  %v962_v52 = vsel %vm960_vm10, %v961_v18, %v5345_v60  ;;  %v667_v30 = vshll.u32 %v5205_v15, %v5375_v16  ;;  %v671_v27 = vadd.s32 127, %v670_v20 }
 0x14e   : > { %v958_v56 = vmul.u32 %v5329_v31, %v942_v57  ;;  %v1033_v50 = vshrl.u32 %v8628_v46, %v5399_v26  ;;  %vm3838_vm12 = vcmp.lt.s32.totalorder %v3837_v13, 0  ;;  %v5425_v53 = vsel %vm219_vm0, %v5232_v1, %v5410_v37 }
 0x14f   : > { %8654 = vst [vmem:[#allocation43_spill] sm:$0xff] %v5425_v53  ;;  %v8549_v45 = vand.u32 2147483647, %v5255_v25  ;;  %v1036_v2 = vshrl.u32 %v8630_v29, %v5399_v26  ;;  %v5431_v15 = vsub.s32 %v5332_v4, %v863_v23  ;;  %v5435_v31 = vshrl.u32 %v1018_v12, 5 }
 0x150   : > { %v5433_v60 = vadd.s32 %v962_v52, %v958_v56  ;;  %v1032_v54 = vshll.u32 %v8631_v9, %v1020_v55  ;;  %v4157_v11 = vpop.eup %4156  ;;  %vm583_vm13 = vweird.f32 %v4643_v38  ;;  %v1024_v1 = vshrl.u32 %v8632_v44, %v5399_v26 }
 0x151   : > { %v1027_v40 = vshrl.u32 %v8633_v14, %v5399_v26  ;;  %v1030_v16 = vshrl.u32 %v8631_v9, %v5399_v26  ;;  %v1035_v4 = vshll.u32 %v8628_v46, %v1020_v55  ;;  %v4159_v48 = vpop.eup %4158  ;;  %vm380_vm14 = vcmp.eq.s32.totalorder %v5401_v34, 0 }
 0x152   : > { %vm383_vm15 = vcmp.eq.s32.totalorder %v5401_v34, 2  ;;  %v668_v12 = vshrl.u32 %v650_v42, %v666_v5  ;;  %v672_v47 = vshll.u32 %v671_v27, 23  ;;  %v5449_v59 = vsel %vm3838_vm12, 0, %v3837_v13 }
 0x153   : > { %v1034_v32 = vor.u32 %v1033_v50, %v1032_v54  ;;  %v1023_v61 = vshll.u32 %v8634_v58, %v1020_v55  ;;  %v1026_v43 = vshll.u32 %v8632_v44, %v1020_v55  ;;  %v1029_v18 = vshll.u32 %v8633_v14, %v1020_v55 }
 0x154   : > { %v1037_v20 = vor.u32 %v1036_v2, %v1035_v4  ;;  %v866_v57 = vsub.s32 0, %v5431_v15  ;;  %v964_v23 = vadd.s32 536870912, %v5433_v60  ;;  %v1013_v52 = vand.u32 8388607, %v8549_v45 }
 0x155   : > { %v1112_v42 = vand.u32 2139095040, %v5425_v53  ;;  %vm379_vm1 = vcmp.lt.s32.totalorder %v5401_v34, 2  ;;  %v5460_v13 = vor.u32 %v1024_v1, %v1023_v61  ;;  %v5462_v5 = vor.u32 %v1027_v40, %v1026_v43  ;;  %v4161_v55 = vpop.eup %4160 }
 0x156   : > { %v5464_v27 = vor.u32 %v1030_v16, %v1029_v18  ;;  %vm1041_vm2 = vcmp.lt.s32.totalorder %v5435_v31, 4  ;;  %v381_v56 = vxor.u32 2147483648, %v4159_v48  ;;  %v384_v50 = vxor.u32 2147483648, %v4157_v11  ;;  %v4163_v4 = vpop.eup %4162  ;;  %v8655_v18 = vld [vmem:[#allocation26_spill] sm:$0xff] }
 0x157   : > { %v1047_v2 = vsel %vm1041_vm2, %v1034_v32, 920167782  ;;  %v1113_v54 = vshrl.u32 %v1112_v42, 23  ;;  %v669_v45 = vor.u32 %v668_v12, %v667_v30  ;;  %v673_v0 = vor.u32 4788187, %v672_v47 }
 0x158   : > { %v773_v3 = vsub.s32 4294967266, %v5449_v59  ;;  %v1051_v1 = vsel %vm1041_vm2, %v1037_v20, 1326507024  ;;  %v3840_v40 = vmin.u32 %v866_v57, %v5431_v15  ;;  %vm1038_vm3 = vcmp.lt.s32.totalorder %v5435_v31, 1 }
 0x159   : > { %vm1040_vm4 = vcmp.lt.s32.totalorder %v5435_v31, 3  ;;  %v3851_v16 = vadd.s32 4294967169, %v1113_v54  ;;  %vm377_vm5 = vweird.f32 %v4648_v39  ;;  %v5476_v61 = vshrl.u32 %v964_v23, 30 }
 0x15a   : > { %v1014_v43 = vor.u32 8388608, %v1013_v52  ;;  %v1046_v30 = vsel %vm1038_vm3, %v5460_v13, %v5462_v5  ;;  %v1048_v12 = vsel %vm1040_vm4, %v5464_v27, %v1047_v2  ;;  %v593_v47 = vsel %vm583_vm13, nan, %v5405_v36 }
 0x15b   : > { %vm596_vm6 = vcmp.lt.s32.totalorder %v8655_v18, 0  ;;  %v1050_v20 = vsel %vm1038_vm3, %v5462_v5, %v5464_v27  ;;  %v1052_v57 = vsel %vm1040_vm4, %v1034_v32, %v1051_v1  ;;  %v1119_v23 = vadd.s32 1, %v3851_v16 }
 0x15c   : > { %v382_v52 = vsel %vm380_vm14, %v4157_v11, %v381_v56  ;;  %v385_v42 = vsel %vm383_vm15, %v384_v50, %v4159_v48  ;;  %v674_v2 = vand.u32 2147483647, %v673_v0  ;;  %vm1039_vm7 = vcmp.lt.s32.totalorder %v5435_v31, 2 }
 0x15d   : > { %v676_v38 = vcvt.s32.f32 %v669_v45  ;;  %v868_v36 = vclz %v3840_v40  ;;  %v1049_v54 = vsel %vm1039_vm7, %v1046_v30, %v1048_v12  ;;  %vm1120_vm8 = vcmp.gt.s32.totalorder %v1119_v23, 0 }
 0x15e   : > { %v8656_v35 = vand.u32 2147483647, %v8655_v18  ;;  %v774_v1 = vadd.s32 127, %v773_v3  ;;  %v966_v11 = vshll.u32 %v5476_v61, 30  ;;  %v1053_v0 = vsel %vm1039_vm7, %v1050_v20, %v1052_v57  ;;  %v5527_v57 = vpop.permute.xlu0 %205 }
 0x15f   : > { %v5511_v48 = vshll.u32 %v1014_v43, 8  ;;  %v386_v45 = vsel %vm379_vm1, %v382_v52, %v385_v42  ;;  %v487_v56 = vxor.u32 2147483648, %v4161_v55  ;;  %v680_v50 = vsub.s32 4, %v5162_v10 }
 0x160   : > { %vm5504_vm9 = vcmp.le.f32.partialorder %v8656_v35, 0.7853982  ;;  %v1121_v40 = vsel %vm1120_vm8, %v1119_v23, 0  ;;  %vm482_vm10 = vcmp.lt.s32.totalorder %v5407_v21, 2  ;;  %v484_v35 = vxor.u32 2147483648, %v4163_v4 }
 0x161   : > { %v677_v16 = vmul.f32 %v676_v38, %v674_v2  ;;  %v5518_v3 = vmul.u32.u64.low %v5511_v48, %v1049_v54  ;;  %v5519_v30 = vmul.u32.u64.high %v5511_v48, %v1049_v54, %v5518_v3  ;;  %v769_v43 = vsub.s32 32, %v5449_v59  ;;  %v4280_v2 = vld [vmem:[%s4547_s28 + $0x10] sm:$0xff] }
 0x162   : > { %v3841_v12 = vadd.s32 4294967294, %v868_v36  ;;  %v5524_v34 = vmul.u32.u64.low %v5511_v48, %v1053_v0  ;;  %v5525_v20 = vmul.u32.u64.high %v5511_v48, %v1053_v0, %v5524_v34  ;;  %vm483_vm11 = vcmp.eq.s32.totalorder %v5407_v21, 0 }
 0x163   : > { %v775_v23 = vshll.u32 %v774_v1, 23  ;;  %v5531_v52 = vsub.s32 %v5433_v60, %v966_v11  ;;  %v1123_v42 = vand.u32 31, %v1121_v40  ;;  %v5534_v38 = vmul.f32 %v4280_v2, %v593_v47  ;;  %v4281_v11 = vld [vmem:[%s4547_s28] sm:$0xff] }
 0x164   : > { %v387_v36 = vsel %vm377_vm5, nan, %v386_v45  ;;  %vm486_vm12 = vcmp.eq.s32.totalorder %v5407_v21, 2  ;;  %v753_v54 = vadd.s32 %v5073_v19, %v5081_v28  ;;  %v485_v0 = vsel %vm483_vm11, %v4161_v55, %v484_v35 }
 0x165   : > { %8659 = vst [vmem:[#allocation26_spill] sm:$0xff] %v5534_v38  ;;  %v488_v34 = vsel %vm486_vm12, %v487_v56, %v4163_v4  ;;  %v5544_v60 = vsel %vm596_vm6, %v680_v50, %v5162_v10  ;;  %v5550_v47 = vsel %vm219_vm0, %v5410_v37, %v5527_v57  ;;  %v678_v39 = vxor.u32 2147483648, %v677_v16 }
 0x166   : > { %8660 = vst [vmem:[#allocation44_spill] sm:$0xff] %v5550_v47  ;;  %v771_v1 = vshrl.u32 %v753_v54, %v769_v43  ;;  %vm3842_vm13 = vcmp.lt.s32.totalorder %v3841_v12, 0  ;;  %v1043_v19 = vsel %vm1041_vm2, %v5464_v27, 2102212464  ;;  %v776_v28 = vor.u32 4788187, %v775_v23 }
 0x167   : > { %v969_v55 = vsub.s32 0, %v5531_v52  ;;  %v1022_v10 = vshrl.u32 %v8634_v58, %v5399_v26  ;;  %v5558_v4 = vsub.s32 32, %v1123_v42  ;;  %v5561_v45 = vmul.f32 %v4281_v11, %v387_v36 }
 0x168   : > { %v770_v56 = vshll.u32 %v5282_v41, %v5449_v59  ;;  %v1215_v27 = vand.u32 2139095040, %v5550_v47  ;;  %v5569_v50 = vsel %vm3842_vm13, 0, %v3841_v12  ;;  %v1044_v35 = vsel %vm1040_vm4, %v5462_v5, %v1043_v19 }
 0x169   : > { %8661 = vst [vmem:[#allocation45_spill] sm:$0xff] %v5561_v45  ;;  %v1042_v26 = vsel %vm1038_vm3, %v1022_v10, %v5460_v13  ;;  %v1064_v43 = vadd.s32 1, %v5519_v30  ;;  %v5580_v23 = vsel %vm482_vm10, %v485_v0, %v488_v34  ;;  %v679_v41 = vsel %vm596_vm6, %v678_v39, %v677_v16 }
 0x16a   : > { %vm1063_vm14 = vc.u32 %v5525_v20, %v5518_v3  ;;  %v772_v12 = vor.u32 %v771_v1, %v770_v56  ;;  %v777_v13 = vand.u32 2147483647, %v776_v28  ;;  %v3844_v2 = vmin.u32 %v969_v55, %v5531_v52 }
 0x16b   : > { %v1136_v5 = vshrl.u32 %v8628_v46, %v5558_v4  ;;  %v876_v36 = vsub.s32 4294967266, %v5569_v50  ;;  %v1045_v21 = vsel %vm1039_vm7, %v1042_v26, %v1044_v35  ;;  %v1139_v16 = vshrl.u32 %v8630_v29, %v5558_v4 }
 0x16c   : > { %v1216_v54 = vshrl.u32 %v1215_v27, 23  ;;  %v1065_v0 = vsel %vm1063_vm14, %v1064_v43, %v5519_v30  ;;  %v8552_v34 = vand.u32 2147483647, %v5425_v53  ;;  %v5597_v39 = vshrl.u32 %v1121_v40, 5 }
 0x16d   : > { %v1135_v1 = vshll.u32 %v8631_v9, %v1123_v42  ;;  %v1127_v19 = vshrl.u32 %v8632_v44, %v5558_v4  ;;  %v1130_v28 = vshrl.u32 %v8633_v14, %v5558_v4  ;;  %v1133_v31 = vshrl.u32 %v8631_v9, %v5558_v4 }
 0x16e   : > { %v1138_v55 = vshll.u32 %v8628_v46, %v1123_v42  ;;  %v971_v10 = vclz %v3844_v2  ;;  %v1061_v30 = vmul.u32 %v5511_v48, %v1045_v21  ;;  %v1126_v11 = vshll.u32 %v8634_v58, %v1123_v42 }
 0x16f   : > { %v1137_v40 = vor.u32 %v1136_v5, %v1135_v1  ;;  %v1129_v56 = vshll.u32 %v8632_v44, %v1123_v42  ;;  %v1132_v27 = vshll.u32 %v8633_v14, %v1123_v42  ;;  %v3855_v35 = vadd.s32 4294967169, %v1216_v54 }
 0x170   : > { %v1140_v26 = vor.u32 %v1139_v16, %v1138_v55  ;;  %v5614_v43 = vsel %vm5504_vm9, %v8655_v18, %v679_v41  ;;  %v779_v59 = vcvt.s32.f32 %v772_v12  ;;  %v5616_v37 = vadd.s32 %v1065_v0, %v1061_v30 }
 0x171   : > { %v1116_v48 = vand.u32 8388607, %v8552_v34  ;;  %v1128_v2 = vor.u32 %v1127_v19, %v1126_v11  ;;  %v1131_v21 = vor.u32 %v1130_v28, %v1129_v56  ;;  %v1134_v5 = vor.u32 %v1133_v31, %v1132_v27  ;;  %v5643_v11 = vpop.permute.xlu1 %207 }
 0x172   : > { %vm1144_vm15 = vcmp.lt.s32.totalorder %v5597_v39, 4  ;;  %v872_v42 = vsub.s32 32, %v5569_v50  ;;  %v877_v16 = vadd.s32 127, %v876_v36  ;;  %v1222_v1 = vadd.s32 1, %v3855_v35 }
 0x173   : > { %v1150_v54 = vsel %vm1144_vm15, %v1137_v40, 920167782  ;;  %v5624_v41 = vmul.f32 %v779_v59, %v777_v13  ;;  %v856_v12 = vadd.s32 %v5228_v7, %v5225_v63  ;;  %v3845_v0 = vadd.s32 4294967294, %v971_v10 }
 0x174   : > { %v1154_v19 = vsel %vm1144_vm15, %v1140_v26, 1326507024  ;;  %v1117_v28 = vor.u32 8388608, %v1116_v48  ;;  %vm1141_vm1 = vcmp.lt.s32.totalorder %v5597_v39, 1  ;;  %vm1143_vm2 = vcmp.lt.s32.totalorder %v5597_v39, 3 }
 0x175   : > { %vm1223_vm3 = vcmp.gt.s32.totalorder %v1222_v1, 0  ;;  %v1067_v36 = vadd.s32 536870912, %v5616_v37  ;;  %v1149_v31 = vsel %vm1141_vm1, %v1128_v2, %v1131_v21  ;;  %v1151_v59 = vsel %vm1143_vm2, %v1134_v5, %v1150_v54 }
 0x176   : > { %v1224_v13 = vsel %vm1223_vm3, %v1222_v1, 0  ;;  %v874_v63 = vshrl.u32 %v856_v12, %v872_v42  ;;  %v878_v7 = vshll.u32 %v877_v16, 23  ;;  %v1153_v55 = vsel %vm1141_vm1, %v1131_v21, %v1134_v5 }
 0x177   : > { %v1155_v10 = vsel %vm1143_vm2, %v1137_v40, %v1154_v19  ;;  %vm3846_vm4 = vcmp.lt.s32.totalorder %v3845_v0, 0  ;;  %vm1142_vm5 = vcmp.lt.s32.totalorder %v5597_v39, 2  ;;  %v1226_v56 = vand.u32 31, %v1224_v13 }
 0x178   : > { %v873_v27 = vshll.u32 %v5431_v15, %v5569_v50  ;;  %v5649_v26 = vadd.s32 %v5344_v8, %v5350_v6  ;;  %v1152_v35 = vsel %vm1142_vm5, %v1149_v31, %v1151_v59  ;;  %v8551_v40 = vand.u32 2147483647, %v5550_v47 }
 0x179   : > { %v5654_v48 = vshrl.u32 %v1067_v36, 30  ;;  %v1156_v42 = vsel %vm1142_vm5, %v1153_v55, %v1155_v10  ;;  %v5658_v16 = vshll.u32 %v1117_v28, 8  ;;  %v5660_v54 = vsub.s32 32, %v1226_v56 }
 0x17a   : > { %v5662_v1 = vor.u32 %v874_v63, %v873_v27  ;;  %v5664_v15 = vor.u32 4788187, %v878_v7  ;;  %v5666_v8 = vsel %vm3846_vm4, 0, %v3845_v0  ;;  %v5672_v6 = vsel %vm219_vm0, %v5527_v57, %v5643_v11 }
 0x17b   : > { %v1125_v50 = vshrl.u32 %v8634_v58, %v5558_v4  ;;  %v1146_v12 = vsel %vm1144_vm15, %v1134_v5, 2102212464  ;;  %v5679_v19 = vmul.u32.u64.low %v5658_v16, %v1152_v35  ;;  %v5680_v28 = vmul.u32.u64.high %v5658_v16, %v1152_v35, %v5679_v19 }
 0x17c   : > { %v5684_v0 = vmul.u32.u64.low %v5658_v16, %v1156_v42  ;;  %v5685_v36 = vmul.u32.u64.high %v5658_v16, %v1156_v42, %v5684_v0  ;;  %v1230_v31 = vshrl.u32 %v8632_v44, %v5660_v54  ;;  %v1233_v57 = vshrl.u32 %v8633_v14, %v5660_v54 }
 0x17d   : > { %v1069_v4 = vshll.u32 %v5654_v48, 30  ;;  %v1219_v5 = vand.u32 8388607, %v8551_v40  ;;  %v1236_v59 = vshrl.u32 %v8631_v9, %v5660_v54  ;;  %v1239_v63 = vshrl.u32 %v8628_v46, %v5660_v54 }
 0x17e   : > { %v1145_v7 = vsel %vm1141_vm1, %v1125_v50, %v1128_v2  ;;  %v1229_v55 = vshll.u32 %v8634_v58, %v1226_v56  ;;  %v1232_v10 = vshll.u32 %v8632_v44, %v1226_v56  ;;  %v1238_v27 = vshll.u32 %v8631_v9, %v1226_v56 }
 0x17f   : > { %v1147_v35 = vsel %vm1143_vm2, %v1131_v21, %v1146_v12  ;;  %v5705_v42 = vshrl.u32 %v1224_v13, 5  ;;  %v1235_v0 = vshll.u32 %v8633_v14, %v1226_v56  ;;  %v1242_v40 = vshrl.u32 %v8630_v29, %v5660_v54 }
 0x180   : > { %v5710_v34 = vor.u32 %v1230_v31, %v1229_v55  ;;  %v5712_v30 = vor.u32 %v1233_v57, %v1232_v10  ;;  %v1240_v2 = vor.u32 %v1239_v63, %v1238_v27  ;;  %v1241_v50 = vshll.u32 %v8628_v46, %v1226_v56 }
 0x181   : > { %vm480_vm6 = vweird.f32 %v4655_v51  ;;  %v880_v38 = vand.u32 2147483647, %v5664_v15  ;;  %v975_v21 = vsub.s32 32, %v5666_v8  ;;  %v5719_v13 = vsub.s32 %v5616_v37, %v1069_v4 }
 0x182   : > { %v1237_v12 = vor.u32 %v1236_v59, %v1235_v0  ;;  %vm699_vm7 = vcmp.lt.s32.totalorder %v4869_v17, 0  ;;  %v979_v31 = vsub.s32 4294967266, %v5666_v8  ;;  %v1220_v55 = vor.u32 8388608, %v1219_v5 }
 0x183   : > { %v1243_v57 = vor.u32 %v1242_v40, %v1241_v50  ;;  %v1318_v63 = vand.u32 2139095040, %v5672_v6  ;;  %v1148_v56 = vsel %vm1142_vm5, %v1145_v7, %v1147_v35  ;;  %v1167_v10 = vadd.s32 1, %v5680_v28 }
 0x184   : > { %vm1244_vm8 = vcmp.lt.s32.totalorder %v5705_v42, 1  ;;  %vm1247_vm10 = vcmp.lt.s32.totalorder %v5705_v42, 4  ;;  %vm1166_vm11 = vc.u32 %v5685_v36, %v5679_v19  ;;  %vm1246_vm12 = vcmp.lt.s32.totalorder %v5705_v42, 3 }
 0x185   : > { %v1252_v37 = vsel %vm1244_vm8, %v5710_v34, %v5712_v30  ;;  %v1253_v39 = vsel %vm1247_vm10, %v1240_v2, 920167782  ;;  %v8662_v40 = vand.u32 2147483647, %v4869_v17  ;;  %v1072_v4 = vsub.s32 0, %v5719_v13 }
 0x186   : > { %vm1245_vm14 = vcmp.lt.s32.totalorder %v5705_v42, 2  ;;  %v1254_v5 = vsel %vm1246_vm12, %v1237_v12, %v1253_v39  ;;  %v1256_v59 = vsel %vm1244_vm8, %v5712_v30, %v1237_v12  ;;  %v1257_v27 = vsel %vm1247_vm10, %v1243_v57, 1326507024 }
 0x187   : > { %vm5740_vm13 = vcmp.le.f32.partialorder %v8662_v40, 0.7853982  ;;  %v1255_v7 = vsel %vm1245_vm14, %v1252_v37, %v1254_v5  ;;  %v5755_v35 = vshll.u32 %v1220_v55, 8  ;;  %v1319_v0 = vshrl.u32 %v1318_v63, 23 }
 0x188   : > { %v980_v50 = vadd.s32 127, %v979_v31  ;;  %v1164_v40 = vmul.u32 %v5658_v16, %v1148_v56  ;;  %v1168_v45 = vsel %vm1166_vm11, %v1167_v10, %v5680_v28  ;;  %v1258_v39 = vsel %vm1246_vm12, %v1240_v2, %v1257_v27 }
 0x189   : > { %v1259_v47 = vsel %vm1245_vm14, %v1256_v59, %v1258_v39  ;;  %v5764_v53 = vmul.u32.u64.low %v5755_v35, %v1255_v7  ;;  %v5765_v37 = vmul.u32.u64.high %v5755_v35, %v1255_v7, %v5764_v53  ;;  %v3859_v57 = vadd.s32 4294967169, %v1319_v0 }
 0x18a   : > { %v882_v55 = vcvt.s32.f32 %v5662_v1  ;;  %v3848_v31 = vmin.u32 %v1072_v4, %v5719_v13  ;;  %v5771_v16 = vmul.u32.u64.low %v5755_v35, %v1259_v47  ;;  %v5772_v63 = vmul.u32.u64.high %v5755_v35, %v1259_v47, %v5771_v16 }
 0x18b   : > { %v490_v28 = vsel %vm480_vm6, nan, %v5580_v23  ;;  %v8665_v2 = vsel %vm5504_vm9, 0, %v5544_v60  ;;  %vm802_vm15 = vcmp.lt.s32.totalorder %v4958_v22, 0  ;;  %v5784_v10 = vadd.s32 %v1168_v45, %v1164_v40  ;;  %v4282_v40 = vld [vmem:[%s4547_s28 + $0x8] sm:$0xff] }
 0x18c   : > { %v5781_v56 = vand.u32 3, %v8665_v2  ;;  %v1325_v1 = vadd.s32 1, %v3859_v57  ;;  %4164 = vcosq.f32 %v5614_v43  ;;  %v8666_v47 = vxor.u32 2147483648, %v5624_v41 }
 0x18d   : > { %v883_v23 = vmul.f32 %v882_v55, %v880_v38  ;;  %v977_v32 = vshrl.u32 %v5649_v26, %v975_v21  ;;  %4166 = vsinq.f32 %v5614_v43  ;;  %v981_v60 = vshll.u32 %v980_v50, 23 }
 0x18e   : > { %v782_v51 = vsel %vm699_vm7, %v8666_v47, %v5624_v41  ;;  %v1249_v4 = vsel %vm1247_vm10, %v1237_v12, 2102212464  ;;  %vm1326_vm9 = vcmp.gt.s32.totalorder %v1325_v1, 0  ;;  %v8667_v45 = vsub.s32 4, %v5207_v62 }
 0x18f   : > { %v976_v41 = vshll.u32 %v5531_v52, %v5666_v8  ;;  %v1074_v38 = vclz %v3848_v31  ;;  %v1228_v26 = vshrl.u32 %v8634_v58, %v5660_v54  ;;  %v785_v43 = vsel %vm5740_vm13, %v4869_v17, %v782_v51 }
 0x190   : > { %v784_v5 = vsel %vm699_vm7, %v8667_v45, %v5207_v62  ;;  %v1170_v21 = vadd.s32 536870912, %v5784_v10  ;;  %v8557_v12 = vand.u32 2147483647, %v5672_v6  ;;  %v1327_v59 = vsel %vm1326_vm9, %v1325_v1, 0 }
 0x191   : > { %v884_v7 = vxor.u32 2147483648, %v883_v23  ;;  %v978_v27 = vor.u32 %v977_v32, %v976_v41  ;;  %v1248_v62 = vsel %vm1244_vm8, %v1228_v26, %v5710_v34  ;;  %v1250_v52 = vsel %vm1246_vm12, %v5712_v30, %v1249_v4 }
 0x192   : > { %v786_v54 = vsel %vm5740_vm13, 0, %v784_v5  ;;  %v982_v8 = vor.u32 4788187, %v981_v60  ;;  %v1270_v0 = vadd.s32 1, %v5765_v37  ;;  %v1329_v50 = vand.u32 31, %v1327_v59 }
 0x193   : > { %v5820_v39 = vmul.f32 %v4282_v40, %v490_v28  ;;  %4168 = vcosq.f32 %v785_v43  ;;  %v8669_v57 = vand.u32 2147483647, %v4958_v22  ;;  %v3849_v34 = vadd.s32 4294967294, %v1074_v38 }
 0x194   : > { %vm1269_vm2 = vc.u32 %v5772_v63, %v5764_v53  ;;  %v5830_v30 = vshrl.u32 %v1170_v21, 30  ;;  %v1251_v15 = vsel %vm1245_vm14, %v1248_v62, %v1250_v52  ;;  %v1322_v31 = vand.u32 8388607, %v8557_v12 }
 0x195   : > { %8668 = vst [vmem:[#allocation46_spill] sm:$0xff] %v5820_v39  ;;  %vm5824_vm1 = vcmp.le.f32.partialorder %v8669_v57, 0.7853982  ;;  %v1330_v16 = vsub.s32 32, %v1329_v50  ;;  %4170 = vsinq.f32 %v785_v43  ;;  %v5836_v28 = vand.u32 3, %v786_v54 }
 0x196   : > { %v885_v2 = vsel %vm802_vm15, %v884_v7, %v883_v23  ;;  %v985_v1 = vcvt.s32.f32 %v978_v27  ;;  %v983_v47 = vand.u32 2147483647, %v982_v8  ;;  %v1271_v51 = vsel %vm1269_vm2, %v1270_v0, %v5765_v37  ;;  %v5843_v42 = vpop.eup %4164 }
 0x197   : > { %v1333_v32 = vshrl.u32 %v8632_v44, %v1330_v16  ;;  %v1336_v60 = vshrl.u32 %v8633_v14, %v1330_v16  ;;  %vm3850_vm3 = vcmp.lt.s32.totalorder %v3849_v34, 0  ;;  %v1267_v4 = vmul.u32 %v5755_v35, %v1251_v15  ;;  %v4167_v41 = vpop.eup %4166 }
 0x198   : > { %v1339_v45 = vshrl.u32 %v8631_v9, %v1330_v16  ;;  %v1342_v5 = vshrl.u32 %v8628_v46, %v1330_v16  ;;  %v1172_v23 = vshll.u32 %v5830_v30, 30  ;;  %v1323_v38 = vor.u32 8388608, %v1322_v31 }
 0x199   : > { %v1332_v26 = vshll.u32 %v8634_v58, %v1329_v50  ;;  %v1335_v37 = vshll.u32 %v8632_v44, %v1329_v50  ;;  %v5851_v43 = vadd.s32 %v1271_v51, %v1267_v4  ;;  %v1328_v21 = vshrl.u32 %v1327_v59, 5 }
 0x19a   : > { %v1338_v7 = vshll.u32 %v8633_v14, %v1329_v50  ;;  %v1341_v27 = vshll.u32 %v8631_v9, %v1329_v50  ;;  %v1344_v52 = vshll.u32 %v8628_v46, %v1329_v50  ;;  %v1345_v54 = vshrl.u32 %v8630_v29, %v1330_v16 }
 0x19b   : > { %v1334_v35 = vor.u32 %v1333_v32, %v1332_v26  ;;  %v1337_v62 = vor.u32 %v1336_v60, %v1335_v37  ;;  %vm689_vm4 = vcmp.eq.s32.totalorder %v5781_v56, 0  ;;  %v690_v8 = vxor.u32 2147483648, %v4167_v41 }
 0x19c   : > { %vm692_vm5 = vcmp.eq.s32.totalorder %v5781_v56, 2  ;;  %v693_v0 = vxor.u32 2147483648, %v5843_v42  ;;  %v1340_v40 = vor.u32 %v1339_v45, %v1338_v7  ;;  %v1343_v57 = vor.u32 %v1342_v5, %v1341_v27  ;;  %v5874_v45 = vpop.permute.xlu0 %209 }
 0x19d   : > { %v886_v59 = vsub.s32 4, %v5377_v24  ;;  %v5864_v15 = vsel %vm5824_vm1, %v4958_v22, %v885_v2  ;;  %v5866_v31 = vmul.f32 %v985_v1, %v983_v47  ;;  %v1346_v50 = vor.u32 %v1345_v54, %v1344_v52  ;;  %v4169_v51 = vpop.eup %4168 }
 0x19e   : > { %v5869_v32 = vsel %vm3850_vm3, 0, %v3849_v34  ;;  %v5872_v60 = vsub.s32 %v5784_v10, %v1172_v23  ;;  %vm1347_vm6 = vcmp.lt.s32.totalorder %v1328_v21, 1  ;;  %v1363_v4 = vshll.u32 %v1323_v38, 8 }
 0x19f   : > { %v1273_v5 = vadd.s32 536870912, %v5851_v43  ;;  %v1331_v26 = vshrl.u32 %v8634_v58, %v1330_v16  ;;  %vm1350_vm7 = vcmp.lt.s32.totalorder %v1328_v21, 4  ;;  %v1355_v2 = vsel %vm1347_vm6, %v1334_v35, %v1337_v62  ;;  %v4171_v1 = vpop.eup %4170 }
 0x1a0   : > { %vm688_vm8 = vcmp.lt.s32.totalorder %v5781_v56, 2  ;;  %vm1349_vm10 = vcmp.lt.s32.totalorder %v1328_v21, 3  ;;  %v1352_v34 = vsel %vm1350_vm7, %v1340_v40, 2102212464  ;;  %v1356_v47 = vsel %vm1350_vm7, %v1343_v57, 920167782 }
 0x1a1   : > { %v1359_v10 = vsel %vm1347_vm6, %v1337_v62, %v1340_v40  ;;  %vm792_vm11 = vcmp.eq.s32.totalorder %v5836_v28, 0  ;;  %vm1348_vm12 = vcmp.lt.s32.totalorder %v1328_v21, 2  ;;  %v1357_v23 = vsel %vm1349_vm10, %v1340_v40, %v1356_v47 }
 0x1a2   : > { %v1360_v38 = vsel %vm1350_vm7, %v1346_v50, 1326507024  ;;  %v5886_v16 = vsel %vm219_vm0, %v5643_v11, %v5874_v45  ;;  %vm905_vm13 = vcmp.lt.s32.totalorder %v5122_v49, 0  ;;  %v1351_v37 = vsel %vm1347_vm6, %v1331_v26, %v1334_v35 }
 0x1a3   : > { %8672 = vst [vmem:[#allocation47_spill] sm:$0xff] %v5886_v16  ;;  %v1353_v7 = vsel %vm1349_vm10, %v1337_v62, %v1352_v34  ;;  %v1358_v27 = vsel %vm1348_vm12, %v1355_v2, %v1357_v23  ;;  %v1361_v52 = vsel %vm1349_vm10, %v1343_v57, %v1360_v38  ;;  %vm686_vm14 = vweird.f32 %v8655_v18 }
 0x1a4   : > { %v5892_v54 = vshrl.u32 %v1273_v5, 30  ;;  %v1362_v40 = vsel %vm1348_vm12, %v1359_v10, %v1361_v52  ;;  %v5895_v50 = vmul.u32.u64.low %v1363_v4, %v1358_v27  ;;  %v5896_v47 = vmul.u32.u64.high %v1363_v4, %v1358_v27, %v5895_v50 }
 0x1a5   : > { %4172 = vcosq.f32 %v5864_v15  ;;  %v5900_v11 = vmul.u32.u64.low %v1363_v4, %v1362_v40  ;;  %v5901_v12 = vmul.u32.u64.high %v1363_v4, %v1362_v40, %v5900_v11  ;;  %v1421_v35 = vand.u32 2139095040, %v5886_v16 }
 0x1a6   : > { %v691_v62 = vsel %vm689_vm4, %v5843_v42, %v690_v8  ;;  %v694_v57 = vsel %vm692_vm5, %v693_v0, %v4167_v41  ;;  %v796_v5 = vxor.u32 2147483648, %v4169_v51  ;;  %v8673_v26 = vand.u32 2147483647, %v5122_v49 }
 0x1a7   : > { %v1354_v34 = vsel %vm1348_vm12, %v1351_v37, %v1353_v7  ;;  %v793_v10 = vxor.u32 2147483648, %v4171_v1  ;;  %v887_v23 = vsel %vm802_vm15, %v886_v59, %v5377_v24  ;;  %v1082_v38 = vsub.s32 4294967266, %v5869_v32 }
 0x1a8   : > { %vm5911_vm9 = vcmp.le.f32.partialorder %v8673_v26, 0.7853982  ;;  %v1422_v42 = vshrl.u32 %v1421_v35, 23  ;;  %v987_v8 = vxor.u32 2147483648, %v5866_v31  ;;  %v1175_v41 = vsub.s32 0, %v5872_v60 }
 0x1a9   : > { %v1275_v0 = vshll.u32 %v5892_v54, 30  ;;  %v1373_v27 = vadd.s32 1, %v5896_v47  ;;  %vm795_vm2 = vcmp.eq.s32.totalorder %v5836_v28, 2  ;;  %v1370_v21 = vmul.u32 %v1363_v4, %v1354_v34 }
 0x1aa   : > { %vm1372_vm3 = vc.u32 %v5901_v12, %v5895_v50  ;;  %v3863_v37 = vadd.s32 4294967169, %v1422_v42  ;;  %v695_v24 = vsel %vm688_vm8, %v691_v62, %v694_v57  ;;  %v797_v59 = vsel %vm795_vm2, %v796_v5, %v4171_v1 }
 0x1ab   : > { %v889_v7 = vsel %vm5824_vm1, 0, %v887_v23  ;;  %v1374_v52 = vsel %vm1372_vm3, %v1373_v27, %v5896_v47  ;;  %v794_v40 = vsel %vm792_vm11, %v4169_v51, %v793_v10  ;;  %v1083_v11 = vadd.s32 127, %v1082_v38  ;;  %v5947_v47 = vpop.permute.xlu1 %211 }
 0x1ac   : > { %v1375_v35 = vadd.s32 %v1374_v52, %v1370_v21  ;;  %v1428_v26 = vadd.s32 1, %v3863_v37  ;;  %v988_v4 = vsel %vm905_vm13, %v987_v8, %v5866_v31  ;;  %v989_v34 = vsub.s32 4, %v5476_v61 }
 0x1ad   : > { %v3852_v56 = vmin.u32 %v1175_v41, %v5872_v60  ;;  %v5940_v1 = vsub.s32 %v5851_v43, %v1275_v0  ;;  %v5944_v55 = vsel %vm686_vm14, nan, %v695_v24  ;;  %vm791_vm15 = vcmp.lt.s32.totalorder %v5836_v28, 2 }
 0x1ae   : > { %v1376_v51 = vadd.s32 536870912, %v1375_v35  ;;  %vm1429_vm1 = vcmp.gt.s32.totalorder %v1428_v26, 0  ;;  %v5949_v62 = vsel %vm791_vm15, %v794_v40, %v797_v59  ;;  %v5951_v31 = vand.u32 3, %v889_v7 }
 0x1af   : > { %v8558_v57 = vand.u32 2147483647, %v5886_v16  ;;  %v1430_v5 = vsel %vm1429_vm1, %v1428_v26, 0  ;;  %v5954_v10 = vpop.eup %4172  ;;  %v5959_v18 = vsel %vm5911_vm9, %v5122_v49, %v988_v4  ;;  %v1078_v28 = vsub.s32 32, %v5869_v32 }
 0x1b0   : > { %v1084_v43 = vshll.u32 %v1083_v11, 23  ;;  %v1432_v23 = vand.u32 31, %v1430_v5  ;;  %v5965_v38 = vsel %vm905_vm13, %v989_v34, %v5476_v61  ;;  %v1177_v42 = vclz %v3852_v56 }
 0x1b1   : > { %v1278_v8 = vsub.s32 0, %v5940_v1  ;;  %v5972_v41 = vsel %vm219_vm0, %v5874_v45, %v5947_v47  ;;  %4174 = vsinq.f32 %v5864_v15  ;;  %v1062_v0 = vadd.s32 %v5518_v3, %v5525_v20 }
 0x1b2   : > { %8676 = vst [vmem:[#allocation48_spill] sm:$0xff] %v5972_v41  ;;  %v5977_v27 = vshrl.u32 %v1376_v51, 30  ;;  %v5979_v21 = vsub.s32 32, %v1432_v23  ;;  %4176 = vcosq.f32 %v5959_v18  ;;  %v1079_v37 = vshll.u32 %v5719_v13, %v5869_v32 }
 0x1b3   : > { %v1425_v45 = vand.u32 8388607, %v8558_v57  ;;  %v1080_v24 = vshrl.u32 %v1062_v0, %v1078_v28  ;;  %v1085_v59 = vor.u32 4788187, %v1084_v43  ;;  %v1524_v3 = vand.u32 2139095040, %v5972_v41 }
 0x1b4   : > { %8677 = vst [vmem:[#allocation49_spill] sm:$0xff] %v5977_v27  ;;  %v1436_v15 = vshrl.u32 %v8632_v44, %v5979_v21  ;;  %v3853_v20 = vadd.s32 4294967294, %v1177_v42  ;;  %v3856_v7 = vmin.u32 %v1278_v8, %v5940_v1  ;;  %v1439_v52 = vshrl.u32 %v8633_v14, %v5979_v21 }
 0x1b5   : > { %v1442_v40 = vshrl.u32 %v8631_v9, %v5979_v21  ;;  %v1378_v13 = vshll.u32 %v5977_v27, 30  ;;  %v1435_v32 = vshll.u32 %v8634_v58, %v1432_v23  ;;  %v1438_v11 = vshll.u32 %v8632_v44, %v1432_v23 }
 0x1b6   : > { %v1445_v26 = vshrl.u32 %v8628_v46, %v5979_v21  ;;  %v1426_v4 = vor.u32 8388608, %v1425_v45  ;;  %v6000_v34 = vshrl.u32 %v1430_v5, 5  ;;  %v1441_v56 = vshll.u32 %v8633_v14, %v1432_v23 }
 0x1b7   : > { %v1444_v51 = vshll.u32 %v8631_v9, %v1432_v23  ;;  %v1081_v28 = vor.u32 %v1080_v24, %v1079_v37  ;;  %v1437_v43 = vor.u32 %v1436_v15, %v1435_v32  ;;  %v1440_v42 = vor.u32 %v1439_v52, %v1438_v11 }
 0x1b8   : > { %v1525_v8 = vshrl.u32 %v1524_v3, 23  ;;  %vm898_vm4 = vcmp.eq.s32.totalorder %v5951_v31, 2  ;;  %v1443_v0 = vor.u32 %v1442_v40, %v1441_v56  ;;  %v1447_v61 = vshll.u32 %v8628_v46, %v1432_v23 }
 0x1b9   : > { %v1446_v57 = vor.u32 %v1445_v26, %v1444_v51  ;;  %v1448_v39 = vshrl.u32 %v8630_v29, %v5979_v21  ;;  %v1086_v45 = vand.u32 2147483647, %v1085_v59  ;;  %vm3854_vm5 = vcmp.lt.s32.totalorder %v3853_v20, 0 }
 0x1ba   : > { %v1280_v5 = vclz %v3856_v7  ;;  %v6008_v16 = vsub.s32 %v1375_v35, %v1378_v13  ;;  %vm895_vm6 = vcmp.eq.s32.totalorder %v5951_v31, 0  ;;  %vm1450_vm7 = vcmp.lt.s32.totalorder %v6000_v34, 1 }
 0x1bb   : > { %v1449_v37 = vor.u32 %v1448_v39, %v1447_v61  ;;  %vm1453_vm8 = vcmp.lt.s32.totalorder %v6000_v34, 4  ;;  %v6013_v24 = vshll.u32 %v1426_v4, 8  ;;  %v4175_v15 = vpop.eup %4174  ;;  %vm789_vm10 = vweird.f32 %v4869_v17 }
 0x1bc   : > { %vm1452_vm11 = vcmp.lt.s32.totalorder %v6000_v34, 3  ;;  %v1458_v23 = vsel %vm1450_vm7, %v1437_v43, %v1440_v42  ;;  %v1459_v35 = vsel %vm1453_vm8, %v1446_v57, 920167782  ;;  %v3867_v59 = vadd.s32 4294967169, %v1525_v8  ;;  %v6021_v3 = vpop.eup %4176 }
 0x1bd   : > { %vm1451_vm12 = vcmp.lt.s32.totalorder %v6000_v34, 2  ;;  %v1460_v39 = vsel %vm1452_vm11, %v1443_v0, %v1459_v35  ;;  %v1462_v61 = vsel %vm1450_vm7, %v1440_v42, %v1443_v0  ;;  %v1463_v7 = vsel %vm1453_vm8, %v1449_v37, 1326507024 }
 0x1be   : > { %vm894_vm13 = vcmp.lt.s32.totalorder %v5951_v31, 2  ;;  %vm1008_vm14 = vcmp.lt.s32.totalorder %v5255_v25, 0  ;;  %v1088_v52 = vcvt.s32.f32 %v1081_v28  ;;  %v1381_v40 = vsub.s32 0, %v6008_v16 }
 0x1bf   : > { %v1461_v13 = vsel %vm1451_vm12, %v1458_v23, %v1460_v39  ;;  %v1464_v32 = vsel %vm1452_vm11, %v1446_v57, %v1463_v7  ;;  %v6038_v11 = vsel %vm3854_vm5, 0, %v3853_v20  ;;  %v896_v51 = vxor.u32 2147483648, %v4175_v15 }
 0x1c0   : > { %v1465_v26 = vsel %vm1451_vm12, %v1462_v61, %v1464_v32  ;;  %v6043_v4 = vmul.u32.u64.low %v6013_v24, %v1461_v13  ;;  %v6044_v56 = vmul.u32.u64.high %v6013_v24, %v1461_v13, %v6043_v4  ;;  %v1089_v28 = vmul.f32 %v1088_v52, %v1086_v45 }
 0x1c1   : > { %v3857_v8 = vadd.s32 4294967294, %v1280_v5  ;;  %v1455_v37 = vsel %vm1453_vm8, %v1443_v0, 2102212464  ;;  %v1434_v57 = vshrl.u32 %v8634_v58, %v5979_v21  ;;  %v1531_v35 = vadd.s32 1, %v3867_v59 }
 0x1c2   : > { %v6052_v20 = vmul.u32.u64.low %v6013_v24, %v1465_v26  ;;  %v6053_v23 = vmul.u32.u64.high %v6013_v24, %v1465_v26, %v6052_v20  ;;  %v8678_v39 = vxor.u32 2147483648, %v5954_v10  ;;  %v992_v45 = vsel %vm5911_vm9, 0, %v5965_v38 }
 0x1c3   : > { %v1185_v5 = vsub.s32 4294967266, %v6038_v11  ;;  %v3860_v0 = vmin.u32 %v1381_v40, %v6008_v16  ;;  %v1092_v21 = vsub.s32 4, %v5654_v48  ;;  %v1454_v7 = vsel %vm1450_vm7, %v1434_v57, %v1437_v43  ;;  %v216_v20 = vpop.permute.xlu1 %215 }
 0x1c4   : > { %v900_v61 = vsel %vm898_vm4, %v8678_v39, %v4175_v15  ;;  %v1456_v59 = vsel %vm1452_vm11, %v1440_v42, %v1455_v37  ;;  %vm1532_vm2 = vcmp.gt.s32.totalorder %v1531_v35, 0  ;;  %v897_v15 = vsel %vm895_vm6, %v5954_v10, %v896_v51 }
 0x1c5   : > { %v8679_v2 = vand.u32 2147483647, %v5255_v25  ;;  %vm3858_vm3 = vcmp.lt.s32.totalorder %v3857_v8, 0  ;;  %v1476_v52 = vadd.s32 1, %v6044_v56  ;;  %v1533_v40 = vsel %vm1532_vm2, %v1531_v35, 0 }
 0x1c6   : > { %v6082_v43 = vsel %vm789_vm10, nan, %v5949_v62  ;;  %v1090_v42 = vxor.u32 2147483648, %v1089_v28  ;;  %vm1475_vm15 = vc.u32 %v6053_v23, %v6043_v4  ;;  %v8561_v10 = vand.u32 2147483647, %v5972_v41 }
 0x1c7   : > { %vm6074_vm9 = vcmp.le.f32.partialorder %v8679_v2, 0.7853982  ;;  %v6087_v13 = vand.u32 3, %v992_v45  ;;  %v1186_v32 = vadd.s32 127, %v1185_v5  ;;  %v1383_v26 = vclz %v3860_v0 }
 0x1c8   : > { %v1457_v51 = vsel %vm1451_vm12, %v1454_v7, %v1456_v59  ;;  %v6093_v37 = vsel %vm894_vm13, %v897_v15, %v900_v61  ;;  %v6098_v17 = vsel %vm1008_vm14, %v1092_v21, %v5654_v48  ;;  %v6100_v62 = vsel %vm3858_vm3, 0, %v3857_v8 }
 0x1c9   : > { %v1535_v57 = vand.u32 31, %v1533_v40  ;;  %4178 = vsinq.f32 %v5959_v18  ;;  %v1165_v34 = vadd.s32 %v5679_v19, %v5685_v36  ;;  %v1477_v35 = vsel %vm1475_vm15, %v1476_v52, %v6044_v56 }
 0x1ca   : > { %v1091_v31 = vsel %vm1008_vm14, %v1090_v42, %v1089_v28  ;;  %v1473_v39 = vmul.u32 %v6013_v24, %v1457_v51  ;;  %v1528_v48 = vand.u32 8388607, %v8561_v10  ;;  %v1181_v61 = vsub.s32 32, %v6038_v11 }
 0x1cb   : > { %v1536_v8 = vsub.s32 32, %v1535_v57  ;;  %v1187_v45 = vshll.u32 %v1186_v32, 23  ;;  %v1288_v18 = vsub.s32 4294967266, %v6100_v62  ;;  %v3861_v5 = vadd.s32 4294967294, %v1383_v26 }
 0x1cc   : > { %v6114_v0 = vadd.s32 %v1477_v35, %v1473_v39  ;;  %v1538_v19 = vshll.u32 %v8634_v58, %v1535_v57  ;;  %v1541_v24 = vshll.u32 %v8632_v44, %v1535_v57  ;;  %v1547_v21 = vshll.u32 %v8631_v9, %v1535_v57 }
 0x1cd   : > { %v1539_v36 = vshrl.u32 %v8632_v44, %v1536_v8  ;;  %v1542_v56 = vshrl.u32 %v8633_v14, %v1536_v8  ;;  %v1545_v28 = vshrl.u32 %v8631_v9, %v1536_v8  ;;  %v1548_v7 = vshrl.u32 %v8628_v46, %v1536_v8 }
 0x1ce   : > { %v1094_v59 = vsel %vm6074_vm9, %v5255_v25, %v1091_v31  ;;  %v1529_v15 = vor.u32 8388608, %v1528_v48  ;;  %v1534_v2 = vshrl.u32 %v1533_v40, 5  ;;  %v1544_v52 = vshll.u32 %v8633_v14, %v1535_v57 }
 0x1cf   : > { %vm3862_vm1 = vcmp.lt.s32.totalorder %v3861_v5, 0  ;;  %v1540_v42 = vor.u32 %v1539_v36, %v1538_v19  ;;  %v1543_v32 = vor.u32 %v1542_v56, %v1541_v24  ;;  %v1549_v26 = vor.u32 %v1548_v7, %v1547_v21  ;;  %v8682_v56 = vld [vmem:[#allocation25_spill] sm:$0xff] }
 0x1d0   : > { %v1182_v51 = vshll.u32 %v5872_v60, %v6038_v11  ;;  %v1546_v35 = vor.u32 %v1545_v28, %v1544_v52  ;;  %v1550_v39 = vshll.u32 %v8628_v46, %v1535_v57  ;;  %v1551_v10 = vshrl.u32 %v8630_v29, %v1536_v8  ;;  %v6151_v52 = vpop.permute.xlu0 %213 }
 0x1d1   : > { %v1183_v41 = vshrl.u32 %v1165_v34, %v1181_v61  ;;  %v6131_v27 = vor.u32 4788187, %v1187_v45  ;;  %v1289_v31 = vadd.s32 127, %v1288_v18  ;;  %v1479_v40 = vadd.s32 536870912, %v6114_v0 }
 0x1d2   : > { %v6134_v48 = vsel %vm3862_vm1, 0, %v3861_v5  ;;  %v1552_v19 = vor.u32 %v1551_v10, %v1550_v39  ;;  %vm1553_vm4 = vcmp.lt.s32.totalorder %v1534_v2, 1  ;;  %vm1556_vm5 = vcmp.lt.s32.totalorder %v1534_v2, 4 }
 0x1d3   : > { %v6136_v36 = vpop.eup %4178  ;;  %v1561_v60 = vsel %vm1553_vm4, %v1540_v42, %v1543_v32  ;;  %v1562_v11 = vsel %vm1556_vm5, %v1549_v26, 920167782  ;;  %v1569_v57 = vshll.u32 %v1529_v15, 8  ;;  %v6142_v34 = vsel %vm219_vm0, %v216_v20, %v8682_v56 }
 0x1d4   : > { %8683 = vst [vmem:[#allocation25_spill] sm:$0xff] %v6142_v34  ;;  %v1537_v61 = vshrl.u32 %v8634_v58, %v1536_v8  ;;  %vm1555_vm6 = vcmp.lt.s32.totalorder %v1534_v2, 3  ;;  %v1558_v45 = vsel %vm1556_vm5, %v1546_v35, 2102212464  ;;  %v1565_v18 = vsel %vm1553_vm4, %v1543_v32, %v1546_v35 }
 0x1d5   : > { %v6146_v10 = vshrl.u32 %v1479_v40, 30  ;;  %vm1554_vm7 = vcmp.lt.s32.totalorder %v1534_v2, 2  ;;  %v1563_v5 = vsel %vm1555_vm6, %v1546_v35, %v1562_v11  ;;  %v1566_v24 = vsel %vm1556_vm5, %v1552_v19, 1326507024 }
 0x1d6   : > { %v1391_v28 = vsub.s32 4294967266, %v6134_v48  ;;  %v1557_v21 = vsel %vm1553_vm4, %v1537_v61, %v1540_v42  ;;  %v1564_v7 = vsel %vm1554_vm7, %v1561_v60, %v1563_v5  ;;  %v1567_v15 = vsel %vm1555_vm6, %v1549_v26, %v1566_v24  ;;  %v8684_v26 = vld [vmem:[#allocation43_spill] sm:$0xff] }
 0x1d7   : > { %vm1001_vm8 = vcmp.eq.s32.totalorder %v6087_v13, 2  ;;  %v1559_v8 = vsel %vm1555_vm6, %v1543_v32, %v1558_v45  ;;  %v1568_v39 = vsel %vm1554_vm7, %v1565_v18, %v1567_v15  ;;  %v1284_v35 = vsub.s32 32, %v6100_v62 }
 0x1d8   : > { %v6155_v56 = vmul.u32.u64.low %v1569_v57, %v1564_v7  ;;  %v6156_v40 = vmul.u32.u64.high %v1569_v57, %v1564_v7, %v6155_v56  ;;  %v6160_v19 = vmul.u32.u64.low %v1569_v57, %v1568_v39  ;;  %v6161_v11 = vmul.u32.u64.high %v1569_v57, %v1568_v39, %v6160_v19 }
 0x1d9   : > { %v1833_v42 = vand.u32 2139095040, %v6142_v34  ;;  %vm998_vm10 = vcmp.eq.s32.totalorder %v6087_v13, 0  ;;  %4180 = vcosq.f32 %v1094_v59  ;;  %vm1111_vm11 = vcmp.lt.s32.totalorder %v8684_v26, 0 }
 0x1da   : > { %v1268_v32 = vadd.s32 %v5764_v53, %v5772_v63  ;;  %v1481_v60 = vshll.u32 %v6146_v10, 30  ;;  %v6172_v61 = vsel %vm219_vm0, %v6151_v52, %v216_v20  ;;  %v1184_v45 = vor.u32 %v1183_v41, %v1182_v51 }
 0x1db   : > { %8685 = vst [vmem:[#allocation43_spill] sm:$0xff] %v6172_v61  ;;  %v1290_v18 = vshll.u32 %v1289_v31, 23  ;;  %v1560_v5 = vsel %vm1554_vm7, %v1557_v21, %v1559_v8  ;;  %v1834_v24 = vshrl.u32 %v1833_v42, 23  ;;  %vm892_vm12 = vweird.f32 %v4958_v22  ;;  %v4283_v22 = vld [vmem:[%s4547_s28 + $0x18] sm:$0xff] }
 0x1dc   : > { %v999_v7 = vxor.u32 2147483648, %v6136_v36  ;;  %v1195_v15 = vsub.s32 4, %v5830_v30  ;;  %v1392_v39 = vadd.s32 127, %v1391_v28  ;;  %v1579_v53 = vadd.s32 1, %v6156_v40 }
 0x1dd   : > { %4182 = vsinq.f32 %v1094_v59  ;;  %v1189_v63 = vand.u32 2147483647, %v6131_v27  ;;  %v1286_v19 = vshrl.u32 %v1268_v32, %v1284_v35  ;;  %v1387_v20 = vsub.s32 32, %v6134_v48 }
 0x1de   : > { %vm997_vm13 = vcmp.lt.s32.totalorder %v6087_v13, 2  ;;  %v8686_v41 = vand.u32 2147483647, %v8684_v26  ;;  %v6189_v51 = vsub.s32 %v6114_v0, %v1481_v60  ;;  %v1576_v31 = vmul.u32 %v1569_v57, %v1560_v5  ;;  %v8694_v13 = vld [vmem:[#allocation44_spill] sm:$0xff] }
 0x1df   : > { %vm1578_vm2 = vc.u32 %v6161_v11, %v6155_v56  ;;  %v3879_v59 = vadd.s32 4294967169, %v1834_v24  ;;  %v1191_v27 = vcvt.s32.f32 %v1184_v45  ;;  %v1285_v28 = vshll.u32 %v5940_v1, %v6100_v62 }
 0x1e0   : > { %vm6184_vm14 = vcmp.le.f32.partialorder %v8686_v41, 0.7853982  ;;  %v1291_v21 = vor.u32 4788187, %v1290_v18  ;;  %v1580_v8 = vsel %vm1578_vm2, %v1579_v53, %v6156_v40  ;;  %v1371_v35 = vadd.s32 %v5895_v50, %v5901_v12 }
 0x1e1   : > { %v1393_v42 = vshll.u32 %v1392_v39, 23  ;;  %v1581_v32 = vadd.s32 %v1580_v8, %v1576_v31  ;;  %v1840_v41 = vadd.s32 1, %v3879_v59  ;;  %v8689_v0 = vxor.u32 2147483648, %v6021_v3  ;;  %v4284_v8 = vld [vmem:[%s4547_s28 + $0x20] sm:$0xff] }
 0x1e2   : > { %v1095_v60 = vsel %vm6074_vm9, 0, %v6098_v17  ;;  %v1192_v1 = vmul.f32 %v1191_v27, %v1189_v63  ;;  %v1287_v62 = vor.u32 %v1286_v19, %v1285_v28  ;;  %vm995_vm3 = vweird.f32 %v5122_v49 }
 0x1e3   : > { %v1003_v57 = vsel %vm1001_vm8, %v8689_v0, %v6136_v36  ;;  %v1389_v40 = vshrl.u32 %v1371_v35, %v1387_v20  ;;  %v1484_v12 = vsub.s32 0, %v6189_v51  ;;  %v1582_v50 = vadd.s32 536870912, %v1581_v32  ;;  %v6214_v17 = vpop.eup %4180 }
 0x1e4   : > { %vm1841_vm15 = vcmp.gt.s32.totalorder %v1840_v41, 0  ;;  %v1000_v45 = vsel %vm998_vm10, %v6021_v3, %v999_v7  ;;  %v1196_v36 = vsel %vm1111_vm11, %v1195_v15, %v5830_v30  ;;  %v1292_v18 = vand.u32 2147483647, %v1291_v21 }
 0x1e5   : > { %v1842_v38 = vsel %vm1841_vm15, %v1840_v41, 0  ;;  %v1388_v5 = vshll.u32 %v6008_v16, %v6134_v48  ;;  %v1394_v24 = vor.u32 4788187, %v1393_v42  ;;  %v6218_v39 = vshrl.u32 %v1582_v50, 30 }
 0x1e6   : > { %v1844_v53 = vand.u32 31, %v1842_v38  ;;  %v902_v3 = vsel %vm892_vm12, nan, %v6093_v37  ;;  %v6223_v7 = vand.u32 3, %v1095_v60  ;;  %v1193_v63 = vxor.u32 2147483648, %v1192_v1 }
 0x1e7   : > { %v6229_v30 = vsel %vm219_vm0, %v5947_v47, %v6151_v52  ;;  %v1294_v15 = vcvt.s32.f32 %v1287_v62  ;;  %v1390_v16 = vor.u32 %v1389_v40, %v1388_v5  ;;  %v3864_v48 = vmin.u32 %v1484_v12, %v6189_v51  ;;  %v6233_v20 = vpop.eup %4182 }
 0x1e8   : > { %8690 = vst [vmem:[#allocation50_spill] sm:$0xff] %v6229_v30  ;;  %v1584_v19 = vshll.u32 %v6218_v39, 30  ;;  %v6237_v37 = vmul.f32 %v4283_v22, %v5944_v55  ;;  %v1004_v31 = vsel %vm997_vm13, %v1000_v45, %v1003_v57  ;;  %v1105_v59 = vxor.u32 2147483648, %v6214_v17  ;;  %v4285_v55 = vld [vmem:[%s4547_s28 + $0x28] sm:$0xff] }
 0x1e9   : > { %v1198_v47 = vsel %vm6184_vm14, 0, %v1196_v36  ;;  %v1295_v52 = vmul.f32 %v1294_v15, %v1292_v18  ;;  %v1395_v27 = vand.u32 2147483647, %v1394_v24  ;;  %v6244_v28 = vsub.s32 32, %v1844_v53 }
 0x1ea   : > { %8691 = vst [vmem:[#allocation51_spill] sm:$0xff] %v6237_v37  ;;  %v1627_v21 = vand.u32 2139095040, %v6229_v30  ;;  %v6249_v35 = vmul.f32 %v4284_v8, %v6082_v43  ;;  %v6252_v42 = vmul.f32 %v4285_v55, %v902_v3  ;;  %vm1104_vm0 = vcmp.eq.s32.totalorder %v6223_v7, 2 }
 0x1eb   : > { %vm1214_vm9 = vcmp.lt.s32.totalorder %v8694_v13, 0  ;;  %v1194_v41 = vsel %vm1111_vm11, %v1193_v63, %v1192_v1  ;;  %v1397_v0 = vcvt.s32.f32 %v1390_v16  ;;  %v1486_v57 = vclz %v3864_v48 }
 0x1ec   : > { %8692 = vst [vmem:[#allocation52_spill] sm:$0xff] %v6249_v35  ;;  %8693 = vst [vmem:[#allocation53_spill] sm:$0xff] %v6252_v42  ;;  %v6258_v60 = vsub.s32 %v1581_v32, %v1584_v19  ;;  %v6262_v62 = vsel %vm995_vm3, nan, %v1004_v31  ;;  %v1102_v43 = vxor.u32 2147483648, %v6233_v20  ;;  %v6266_v40 = vsel %vm1104_vm0, %v1105_v59, %v6233_v20 }
 0x1ed   : > { %v6268_v12 = vand.u32 3, %v1198_v47  ;;  %v8695_v50 = vand.u32 2147483647, %v8694_v13  ;;  %v1296_v1 = vxor.u32 2147483648, %v1295_v52  ;;  %vm1317_vm4 = vcmp.lt.s32.totalorder %v5672_v6, 0 }
 0x1ee   : > { %v1398_v32 = vmul.f32 %v1397_v0, %v1395_v27  ;;  %v1857_v49 = vshrl.u32 %v8628_v46, %v6244_v28  ;;  %v1628_v36 = vshrl.u32 %v1627_v21, 23  ;;  %v1197_v18 = vsel %vm6184_vm14, %v8684_v26, %v1194_v41 }
 0x1ef   : > { %vm6272_vm1 = vcmp.le.f32.partialorder %v8695_v50, 0.7853982  ;;  %v1298_v5 = vsub.s32 4, %v5892_v54  ;;  %v8566_v24 = vand.u32 2147483647, %v6142_v34  ;;  %v1860_v3 = vshrl.u32 %v8630_v29, %v6244_v28 }
 0x1f0   : > { %v3865_v63 = vadd.s32 4294967294, %v1486_v57  ;;  %v1587_v15 = vsub.s32 0, %v6258_v60  ;;  %v6287_v16 = vshrl.u32 %v1842_v38, 5  ;;  %v1856_v48 = vshll.u32 %v8631_v9, %v1844_v53 }
 0x1f1   : > { %v1848_v19 = vshrl.u32 %v8632_v44, %v6244_v28  ;;  %v1851_v2 = vshrl.u32 %v8633_v14, %v6244_v28  ;;  %v1854_v20 = vshrl.u32 %v8631_v9, %v6244_v28  ;;  %v1859_v22 = vshll.u32 %v8628_v46, %v1844_v53 }
 0x1f2   : > { %vm1101_vm5 = vcmp.eq.s32.totalorder %v6223_v7, 0  ;;  %v1297_v31 = vsel %vm1214_vm9, %v1296_v1, %v1295_v52  ;;  %v1399_v38 = vxor.u32 2147483648, %v1398_v32  ;;  %v1858_v59 = vor.u32 %v1857_v49, %v1856_v48 }
 0x1f3   : > { %v3871_v47 = vadd.s32 4294967169, %v1628_v36  ;;  %v1847_v27 = vshll.u32 %v8634_v58, %v1844_v53  ;;  %v1850_v21 = vshll.u32 %v8632_v44, %v1844_v53  ;;  %v1853_v8 = vshll.u32 %v8633_v14, %v1844_v53 }
 0x1f4   : > { %v1861_v55 = vor.u32 %v1860_v3, %v1859_v22  ;;  %4184 = vcosq.f32 %v1197_v18  ;;  %v8698_v41 = vand.u32 2147483647, %v5672_v6  ;;  %vm3866_vm7 = vcmp.lt.s32.totalorder %v3865_v63, 0 }
 0x1f5   : > { %v3868_v52 = vmin.u32 %v1587_v15, %v6258_v60  ;;  %v1837_v57 = vand.u32 8388607, %v8566_v24  ;;  %v1849_v50 = vor.u32 %v1848_v19, %v1847_v27  ;;  %v1852_v1 = vor.u32 %v1851_v2, %v1850_v21 }
 0x1f6   : > { %vm6305_vm6 = vcmp.le.f32.partialorder %v8698_v41, 0.7853982  ;;  %v1855_v49 = vor.u32 %v1854_v20, %v1853_v8  ;;  %vm1865_vm8 = vcmp.lt.s32.totalorder %v6287_v16, 4  ;;  %4186 = vsinq.f32 %v1197_v18 }
 0x1f7   : > { %v6316_v53 = vsel %vm1214_vm9, %v1298_v5, %v5892_v54  ;;  %v1300_v36 = vsel %vm6272_vm1, %v8694_v13, %v1297_v31  ;;  %v1871_v3 = vsel %vm1865_vm8, %v1858_v59, 920167782  ;;  %v1400_v15 = vsel %vm1317_vm4, %v1399_v38, %v1398_v32 }
 0x1f8   : > { %v6325_v48 = vsel %vm3866_vm7, 0, %v3865_v63  ;;  %v1875_v18 = vsel %vm1865_vm8, %v1861_v55, 1326507024  ;;  %v1634_v19 = vadd.s32 1, %v3871_v47  ;;  %v1589_v2 = vclz %v3868_v52 }
 0x1f9   : > { %vm1862_vm10 = vcmp.lt.s32.totalorder %v6287_v16, 1  ;;  %vm1864_vm11 = vcmp.lt.s32.totalorder %v6287_v16, 3  ;;  %v8567_v54 = vand.u32 2147483647, %v6229_v30  ;;  %v1838_v5 = vor.u32 8388608, %v1837_v57 }
 0x1fa   : > { %v1870_v20 = vsel %vm1862_vm10, %v1849_v50, %v1852_v1  ;;  %v1872_v32 = vsel %vm1864_vm11, %v1855_v49, %v1871_v3  ;;  %vm1635_vm12 = vcmp.gt.s32.totalorder %v1634_v19, 0  ;;  %v1494_v63 = vsub.s32 4294967266, %v6325_v48 }
 0x1fb   : > { %v1874_v22 = vsel %vm1862_vm10, %v1852_v1, %v1855_v49  ;;  %v1876_v31 = vsel %vm1864_vm11, %v1858_v59, %v1875_v18  ;;  %v1636_v38 = vsel %vm1635_vm12, %v1634_v19, 0  ;;  %v6344_v47 = vsel %vm1101_vm5, %v6214_v17, %v1102_v43 }
 0x1fc   : > { %4188 = vcosq.f32 %v1300_v36  ;;  %vm1863_vm13 = vcmp.lt.s32.totalorder %v6287_v16, 2  ;;  %v1474_v21 = vadd.s32 %v6043_v4, %v6053_v23  ;;  %v3869_v8 = vadd.s32 4294967294, %v1589_v2 }
 0x1fd   : > { %4190 = vsinq.f32 %v1300_v36  ;;  %v1873_v59 = vsel %vm1863_vm13, %v1870_v20, %v1872_v32  ;;  %v6357_v17 = vsel %vm6305_vm6, %v5672_v6, %v1400_v15  ;;  %v1877_v43 = vsel %vm1863_vm13, %v1874_v22, %v1876_v31 }
 0x1fe   : > { %v6361_v55 = vshll.u32 %v1838_v5, 8  ;;  %v1638_v41 = vand.u32 31, %v1636_v38  ;;  %v6363_v52 = vpop.eup %4184  ;;  %v1490_v57 = vsub.s32 32, %v6325_v48  ;;  %v6368_v23 = vadd.s32 127, %v1494_v63 }
 0x1ff   : > { %v1631_v36 = vand.u32 8388607, %v8567_v54  ;;  %v1846_v3 = vshrl.u32 %v8634_v58, %v6244_v28  ;;  %vm3870_vm14 = vcmp.lt.s32.totalorder %v3869_v8, 0  ;;  %v1867_v5 = vsel %vm1865_vm8, %v1855_v49, 2102212464 }
 0x200   : > { %v6375_v15 = vmul.u32.u64.low %v6361_v55, %v1873_v59  ;;  %v6376_v18 = vmul.u32.u64.high %v6361_v55, %v1873_v59, %v6375_v15  ;;  %v1639_v19 = vsub.s32 32, %v1638_v41  ;;  %v6379_v2 = vpop.eup %4186  ;;  %v1641_v28 = vshll.u32 %v8634_v58, %v1638_v41 }
 0x201   : > { %v6384_v20 = vmul.u32.u64.low %v6361_v55, %v1877_v43  ;;  %v6385_v32 = vmul.u32.u64.high %v6361_v55, %v1877_v43, %v6384_v20  ;;  %v1866_v63 = vsel %vm1862_vm10, %v1846_v3, %v1849_v50  ;;  %v1644_v59 = vshll.u32 %v8632_v44, %v1638_v41 }
 0x202   : > { %v1642_v22 = vshrl.u32 %v8632_v44, %v1639_v19  ;;  %v1645_v31 = vshrl.u32 %v8633_v14, %v1639_v19  ;;  %v1648_v24 = vshrl.u32 %v8631_v9, %v1639_v19  ;;  %v1650_v54 = vshll.u32 %v8631_v9, %v1638_v41 }
 0x203   : > { %v1651_v49 = vshrl.u32 %v8628_v46, %v1639_v19  ;;  %v6396_v27 = vsel %vm3870_vm14, 0, %v3869_v8  ;;  %v1868_v43 = vsel %vm1864_vm11, %v1852_v1, %v1867_v5  ;;  %v1637_v50 = vshrl.u32 %v1636_v38, 5 }
 0x204   : > { %v1647_v3 = vshll.u32 %v8633_v14, %v1638_v41  ;;  %v1632_v20 = vor.u32 8388608, %v1631_v36  ;;  %v1643_v4 = vor.u32 %v1642_v22, %v1641_v28  ;;  %v1646_v34 = vor.u32 %v1645_v31, %v1644_v59 }
 0x205   : > { %v1652_v42 = vor.u32 %v1651_v49, %v1650_v54  ;;  %v1492_v37 = vshrl.u32 %v1474_v21, %v1490_v57  ;;  %v1653_v33 = vshll.u32 %v8628_v46, %v1638_v41  ;;  %v1654_v44 = vshrl.u32 %v8630_v29, %v1639_v19 }
 0x206   : > { %v6401_v35 = vpop.eup %4188  ;;  %v1649_v30 = vor.u32 %v1648_v24, %v1647_v3  ;;  %v1496_v9 = vshll.u32 %v6368_v23, 23  ;;  %v1597_v1 = vsub.s32 4294967266, %v6396_v27  ;;  %v1869_v38 = vsel %vm1863_vm13, %v1866_v63, %v1868_v43 }
 0x207   : > { %v6405_v8 = vpop.eup %4190  ;;  %v1730_v36 = vand.u32 2139095040, %v6172_v61  ;;  %v1888_v54 = vadd.s32 1, %v6376_v18  ;;  %v1655_v5 = vor.u32 %v1654_v44, %v1653_v33  ;;  %vm1656_vm2 = vcmp.lt.s32.totalorder %v1637_v50, 1 }
 0x208   : > { %vm1659_vm3 = vcmp.lt.s32.totalorder %v1637_v50, 4  ;;  %vm1100_vm15 = vcmp.lt.s32.totalorder %v6223_v7, 2  ;;  %vm1887_vm0 = vc.u32 %v6385_v32, %v6375_v15  ;;  %v1664_v24 = vsel %vm1656_vm2, %v1643_v4, %v1646_v34 }
 0x209   : > { %v1665_v21 = vsel %vm1659_vm3, %v1652_v42, 920167782  ;;  %v1672_v41 = vshll.u32 %v1632_v20, 8  ;;  %v1640_v57 = vshrl.u32 %v8634_v58, %v1639_v19  ;;  %vm1658_vm9 = vcmp.lt.s32.totalorder %v1637_v50, 3 }
 0x20a   : > { %v1661_v16 = vsel %vm1659_vm3, %v1649_v30, 2102212464  ;;  %v1668_v23 = vsel %vm1656_vm2, %v1646_v34, %v1649_v30  ;;  %vm1657_vm5 = vcmp.lt.s32.totalorder %v1637_v50, 2  ;;  %v1666_v63 = vsel %vm1658_vm9, %v1649_v30, %v1665_v21 }
 0x20b   : > { %v1669_v33 = vsel %vm1659_vm3, %v1655_v5, 1326507024  ;;  %v1731_v44 = vshrl.u32 %v1730_v36, 23  ;;  %v1598_v28 = vadd.s32 127, %v1597_v1  ;;  %v1660_v22 = vsel %vm1656_vm2, %v1640_v57, %v1643_v4  ;;  %v8701_v5 = vld [vmem:[#allocation49_spill] sm:$0xff] }
 0x20c   : > { %v1667_v31 = vsel %vm1657_vm5, %v1664_v24, %v1666_v63  ;;  %v1670_v59 = vsel %vm1658_vm9, %v1652_v42, %v1669_v33  ;;  %v1662_v49 = vsel %vm1658_vm9, %v1646_v34, %v1661_v16  ;;  %vm1098_vm7 = vweird.f32 %v5255_v25  ;;  %v4286_v63 = vld [vmem:[%s4547_s28 + $0x30] sm:$0xff] }
 0x20d   : > { %v1671_v43 = vsel %vm1657_vm5, %v1668_v23, %v1670_v59  ;;  %v6422_v3 = vmul.u32.u64.low %v1672_v41, %v1667_v31  ;;  %v6423_v20 = vmul.u32.u64.high %v1672_v41, %v1667_v31, %v6422_v3  ;;  %v1889_v30 = vsel %vm1887_vm0, %v1888_v54, %v6376_v18 }
 0x20e   : > { %v6431_v19 = vmul.u32.u64.low %v1672_v41, %v1671_v43  ;;  %v6432_v4 = vmul.u32.u64.high %v1672_v41, %v1671_v43, %v6431_v19  ;;  %v3875_v1 = vadd.s32 4294967169, %v1731_v44  ;;  %4192 = vcosq.f32 %v6357_v17 }
 0x20f   : > { %v1497_v34 = vor.u32 4788187, %v1496_v9  ;;  %v1593_v42 = vsub.s32 32, %v6396_v27  ;;  %v1885_v36 = vmul.u32 %v6361_v55, %v1869_v38  ;;  %v1401_v24 = vsub.s32 4, %v8701_v5 }
 0x210   : > { %4194 = vsinq.f32 %v6357_v17  ;;  %v8702_v21 = vshll.u32 %v6189_v51, %v6325_v48  ;;  %v1663_v18 = vsel %vm1657_vm5, %v1660_v22, %v1662_v49  ;;  %v1577_v54 = vadd.s32 %v6155_v56, %v6161_v11 }
 0x211   : > { %v1599_v16 = vshll.u32 %v1598_v28, 23  ;;  %v6445_v23 = vadd.s32 %v1889_v30, %v1885_v36  ;;  %v1682_v9 = vadd.s32 1, %v6423_v20  ;;  %v6450_v55 = vmul.f32 %v4286_v63, %v6262_v62 }
 0x212   : > { %v1493_v57 = vor.u32 %v1492_v37, %v8702_v21  ;;  %v1107_v51 = vsel %vm1100_vm15, %v6344_v47, %v6266_v40  ;;  %vm1204_vm8 = vcmp.eq.s32.totalorder %v6268_v12, 0  ;;  %v1737_v37 = vadd.s32 1, %v3875_v1 }
 0x213   : > { %v1498_v48 = vand.u32 2147483647, %v1497_v34  ;;  %v1595_v17 = vshrl.u32 %v1577_v54, %v1593_v42  ;;  %v1679_v56 = vmul.u32 %v1672_v41, %v1663_v18  ;;  %vm1681_vm10 = vc.u32 %v6432_v4, %v6422_v3  ;;  %v8705_v34 = vld [vmem:[#allocation47_spill] sm:$0xff] }
 0x214   : > { %v8703_v11 = vsel %vm6272_vm1, 0, %v6316_v53  ;;  %v1402_v50 = vsel %vm1317_vm4, %v1401_v24, %v8701_v5  ;;  %v1500_v7 = vcvt.s32.f32 %v1493_v57  ;;  %v1683_v40 = vsel %vm1681_vm10, %v1682_v9, %v6423_v20 }
 0x215   : > { %v1305_v62 = vand.u32 3, %v8703_v11  ;;  %v1594_v47 = vshll.u32 %v6258_v60, %v6396_v27  ;;  %v1600_v38 = vor.u32 4788187, %v1599_v16  ;;  %v1891_v41 = vadd.s32 536870912, %v6445_v23 }
 0x216   : > { %v6470_v33 = vadd.s32 %v1683_v40, %v1679_v56  ;;  %v1205_v45 = vxor.u32 2147483648, %v6379_v2  ;;  %vm1207_vm1 = vcmp.eq.s32.totalorder %v6268_v12, 2  ;;  %v1208_v53 = vxor.u32 2147483648, %v6363_v52 }
 0x217   : > { %vm1738_vm11 = vcmp.gt.s32.totalorder %v1737_v37, 0  ;;  %v1108_v44 = vsel %vm1098_vm7, nan, %v1107_v51  ;;  %v1311_v28 = vxor.u32 2147483648, %v6401_v35  ;;  %v1501_v22 = vmul.f32 %v1500_v7, %v1498_v48 }
 0x218   : > { %v1596_v31 = vor.u32 %v1595_v17, %v1594_v47  ;;  %vm1307_vm4 = vcmp.eq.s32.totalorder %v1305_v62, 0  ;;  %v1308_v60 = vxor.u32 2147483648, %v6405_v8  ;;  %v1404_v27 = vsel %vm6305_vm6, 0, %v1402_v50  ;;  %v4193_v49 = vpop.eup %4192  ;;  %v8710_v47 = vld [vmem:[#allocation48_spill] sm:$0xff] }
 0x219   : > { %v1504_v59 = vsub.s32 4, %v6146_v10  ;;  %v1601_v43 = vand.u32 2147483647, %v1600_v38  ;;  %v6482_v20 = vshrl.u32 %v1891_v41, 30  ;;  %v1685_v30 = vadd.s32 536870912, %v6470_v33 }
 0x21a   : > { %v1739_v25 = vsel %vm1738_vm11, %v1737_v37, 0  ;;  %v4195_v19 = vpop.eup %4194  ;;  %vm1201_vm12 = vweird.f32 %v8684_v26  ;;  %v1206_v1 = vsel %vm1204_vm8, %v6363_v52, %v1205_v45  ;;  %v1209_v0 = vsel %vm1207_vm1, %v1208_v53, %v6379_v2  ;;  %v8714_v45 = vld [vmem:[#allocation30_spill] sm:$0xff] }
 0x21b   : > { %8704 = vst [vmem:[#allocation44_spill] sm:$0xff] %v6482_v20  ;;  %vm1304_vm6 = vweird.f32 %v8694_v13  ;;  %vm1310_vm13 = vcmp.eq.s32.totalorder %v1305_v62, 2  ;;  %vm1420_vm14 = vcmp.lt.s32.totalorder %v8705_v34, 0  ;;  %v1408_v36 = vand.u32 3, %v1404_v27 }
 0x21c   : > { %v1312_v42 = vsel %vm1310_vm13, %v1311_v28, %v6405_v8  ;;  %v1502_v5 = vxor.u32 2147483648, %v1501_v22  ;;  %v1603_v24 = vcvt.s32.f32 %v1596_v31  ;;  %v1309_v21 = vsel %vm1307_vm4, %v6401_v35, %v1308_v60  ;;  %v4287_v8 = vld [vmem:[%s4547_s28 + $0x38] sm:$0xff] }
 0x21d   : > { %v1414_v57 = vxor.u32 2147483648, %v4193_v49  ;;  %v1505_v52 = vsel %vm1420_vm14, %v1504_v59, %v6146_v10  ;;  %v1741_v2 = vand.u32 31, %v1739_v25  ;;  %v1411_v18 = vxor.u32 2147483648, %v4195_v19 }
 0x21e   : > { %v1604_v54 = vmul.f32 %v1603_v24, %v1601_v43  ;;  %v1893_v16 = vshll.u32 %v6482_v20, 30  ;;  %v6501_v9 = vshrl.u32 %v1685_v30, 30  ;;  %vm1203_vm2 = vcmp.lt.s32.totalorder %v6268_v12, 2 }
 0x21f   : > { %v6505_v63 = vmul.f32 %v4287_v8, %v1108_v44  ;;  %vm1306_vm3 = vcmp.lt.s32.totalorder %v1305_v62, 2  ;;  %v8706_v35 = vand.u32 2147483647, %v8705_v34  ;;  %v1210_v10 = vsel %vm1203_vm2, %v1206_v1, %v1209_v0 }
 0x220   : > { %vm1410_vm0 = vcmp.eq.s32.totalorder %v1408_v36, 0  ;;  %vm1413_vm9 = vcmp.eq.s32.totalorder %v1408_v36, 2  ;;  %v1503_v37 = vsel %vm1420_vm14, %v1502_v5, %v1501_v22  ;;  %v1313_v48 = vsel %vm1306_vm3, %v1309_v21, %v1312_v42 }
 0x221   : > { %vm6509_vm15 = vcmp.le.f32.partialorder %v8706_v35, 0.7853982  ;;  %v1415_v17 = vsel %vm1413_vm9, %v1414_v57, %v4195_v19  ;;  %v6517_v56 = vsub.s32 32, %v1741_v2  ;;  %v1412_v11 = vsel %vm1410_vm0, %v4193_v49, %v1411_v18 }
 0x222   : > { %v1507_v12 = vsel %vm6509_vm15, 0, %v1505_v52  ;;  %v1605_v62 = vxor.u32 2147483648, %v1604_v54  ;;  %v6520_v50 = vsub.s32 %v6445_v23, %v1893_v16  ;;  %v1687_v7 = vshll.u32 %v6501_v9, 30 }
 0x223   : > { %v1506_v40 = vsel %vm6509_vm15, %v8705_v34, %v1503_v37  ;;  %v8711_v38 = vand.u32 2147483647, %v8710_v47  ;;  %vm1523_vm7 = vcmp.lt.s32.totalorder %v8710_v47, 0  ;;  %v2063_v53 = vadd.s32 1, %v8714_v45 }
 0x224   : > { %8709 = vst [vmem:[#allocation49_spill] sm:$0xff] %v6520_v50  ;;  %v6536_v23 = vsel %vm1201_vm12, nan, %v1210_v10  ;;  %v6540_v44 = vsel %vm1304_vm6, nan, %v1313_v48  ;;  %vm1409_vm8 = vcmp.lt.s32.totalorder %v1408_v36, 2  ;;  %v6542_v28 = vand.u32 3, %v1507_v12  ;;  %v8717_v48 = vld [vmem:[#allocation11_spill] sm:$0xff] }
 0x225   : > { %vm6528_vm5 = vcmp.le.f32.partialorder %v8711_v38, 0.7853982  ;;  %v6544_v22 = vsel %vm1409_vm8, %v1412_v11, %v1415_v17  ;;  %v1607_v31 = vsub.s32 4, %v6218_v39  ;;  %v8576_v60 = vand.u32 2147483647, %v6172_v61 }
 0x226   : > { %v1754_v27 = vshrl.u32 %v8628_v46, %v6517_v56  ;;  %4196 = vcosq.f32 %v1506_v40  ;;  %v1606_v26 = vsel %vm1523_vm7, %v1605_v62, %v1604_v54  ;;  %v1896_v13 = vsub.s32 0, %v6520_v50 }
 0x227   : > { %v6554_v59 = vsub.s32 %v6470_v33, %v1687_v7  ;;  %v6556_v49 = vshrl.u32 %v1739_v25, 5  ;;  %v8715_v43 = vmov 2102212464   ;;  %v1757_v19 = vshrl.u32 %v8630_v29, %v6517_v56 }
 0x228   : > { %v1753_v30 = vshll.u32 %v8715_v43, %v1741_v2  ;;  %vm2064_vm10 = vcmp.gt.s32.totalorder %v2063_v53, 0  ;;  %v8716_v1 = vmov 2475754826   ;;  %v1748_v42 = vshrl.u32 %v8633_v14, %v6517_v56 }
 0x229   : > { %v1745_v0 = vshrl.u32 %v8716_v1, %v6517_v56  ;;  %v1751_v36 = vshrl.u32 %v8715_v43, %v6517_v56  ;;  %v2065_v5 = vsel %vm2064_vm10, %v2063_v53, 0  ;;  %v1734_v33 = vand.u32 8388607, %v8576_v60 }
 0x22a   : > { %v1744_v25 = vshll.u32 %v8634_v58, %v1741_v2  ;;  %v1755_v24 = vor.u32 %v1754_v27, %v1753_v30  ;;  %v1756_v21 = vshll.u32 %v8628_v46, %v1741_v2  ;;  %v1690_v57 = vsub.s32 0, %v6554_v59 }
 0x22b   : > { %v1747_v52 = vshll.u32 %v8716_v1, %v1741_v2  ;;  %v1750_v18 = vshll.u32 %v8633_v14, %v1741_v2  ;;  %v2067_v54 = vand.u32 31, %v2065_v5  ;;  %4198 = vsinq.f32 %v1506_v40 }
 0x22c   : > { %v6577_v16 = vsel %vm1523_vm7, %v1607_v31, %v6218_v39  ;;  %v6582_v8 = vsel %vm6528_vm5, %v8710_v47, %v1606_v26  ;;  %v1758_v35 = vor.u32 %v1757_v19, %v1756_v21  ;;  %v6584_v51 = vor.u32 %v1745_v0, %v1744_v25 }
 0x22d   : > { %v6586_v10 = vor.u32 %v1748_v42, %v1747_v52  ;;  %v6588_v37 = vor.u32 %v1751_v36, %v1750_v18  ;;  %vm1762_vm1 = vcmp.lt.s32.totalorder %v6556_v49, 4  ;;  %v6592_v2 = vmin.u32 %v1896_v13, %v6520_v50 }
 0x22e   : > { %v1768_v39 = vsel %vm1762_vm1, %v1755_v24, 920167782  ;;  %v8577_v17 = vand.u32 2147483647, %v8717_v48  ;;  %v2068_v12 = vsub.s32 32, %v2067_v54  ;;  %v3872_v11 = vmin.u32 %v1690_v57, %v6554_v59 }
 0x22f   : > { %v1735_v62 = vor.u32 8388608, %v1734_v33  ;;  %vm1759_vm11 = vcmp.lt.s32.totalorder %v6556_v49, 1  ;;  %vm1761_vm4 = vcmp.lt.s32.totalorder %v6556_v49, 3  ;;  %v1772_v7 = vsel %vm1762_vm1, %v1758_v35, 1326507024 }
 0x230   : > { %v2070_v40 = vshll.u32 %v8634_v58, %v2067_v54  ;;  %v2071_v38 = vshrl.u32 %v8716_v1, %v2068_v12  ;;  %v2073_v45 = vshll.u32 %v8716_v1, %v2067_v54  ;;  %v6605_v53 = vpop.eup %4196  ;;  %v1767_v31 = vsel %vm1759_vm11, %v6584_v51, %v6586_v10 }
 0x231   : > { %v1769_v27 = vsel %vm1761_vm4, %v6588_v37, %v1768_v39  ;;  %v2066_v26 = vshrl.u32 %v2065_v5, 5  ;;  %v2076_v13 = vshll.u32 %v8633_v14, %v2067_v54  ;;  %vm1760_vm12 = vcmp.lt.s32.totalorder %v6556_v49, 2 }
 0x232   : > { %v2060_v30 = vand.u32 8388607, %v8577_v17  ;;  %v2074_v19 = vshrl.u32 %v8633_v14, %v2068_v12  ;;  %v2077_v0 = vshrl.u32 %v8715_v43, %v2068_v12  ;;  %v1692_v42 = vclz %v3872_v11 }
 0x233   : > { %v1771_v36 = vsel %vm1759_vm11, %v6586_v10, %v6588_v37  ;;  %v1773_v5 = vsel %vm1761_vm4, %v1755_v24, %v1772_v7  ;;  %v2079_v33 = vshll.u32 %v8715_v43, %v2067_v54  ;;  %v1770_v25 = vsel %vm1760_vm12, %v1767_v31, %v1769_v27 }
 0x234   : > { %v2072_v21 = vor.u32 %v2071_v38, %v2070_v40  ;;  %v2075_v57 = vor.u32 %v2074_v19, %v2073_v45  ;;  %v2080_v52 = vshrl.u32 %v8628_v46, %v2068_v12  ;;  %v2078_v18 = vor.u32 %v2077_v0, %v2076_v13 }
 0x235   : > { %v2082_v35 = vshll.u32 %v8628_v46, %v2067_v54  ;;  %vm2085_vm6 = vcmp.lt.s32.totalorder %v2066_v26, 1  ;;  %vm2088_vm13 = vcmp.lt.s32.totalorder %v2066_v26, 4  ;;  %v4199_v39 = vpop.eup %4198  ;;  %v2069_v11 = vshrl.u32 %v8634_v58, %v2068_v12 }
 0x236   : > { %v2081_v60 = vor.u32 %v2080_v52, %v2079_v33  ;;  %v2083_v24 = vshrl.u32 %v8630_v29, %v2068_v12  ;;  %vm2087_vm14 = vcmp.lt.s32.totalorder %v2066_v26, 3  ;;  %vm1516_vm2 = vcmp.eq.s32.totalorder %v6542_v28, 2 }
 0x237   : > { %v1774_v7 = vsel %vm1760_vm12, %v1771_v36, %v1773_v5  ;;  %v6636_v40 = vshll.u32 %v1735_v62, 8  ;;  %v2061_v38 = vor.u32 8388608, %v2060_v30  ;;  %vm2086_vm3 = vcmp.lt.s32.totalorder %v2066_v26, 2 }
 0x238   : > { %vm1513_vm15 = vcmp.eq.s32.totalorder %v6542_v28, 0  ;;  %v2084_v54 = vor.u32 %v2083_v24, %v2082_v35  ;;  %v2090_v45 = vsel %vm2088_vm13, %v2078_v18, 2102212464  ;;  %v2093_v31 = vsel %vm2085_vm6, %v2072_v21, %v2075_v57 }
 0x239   : > { %v2094_v27 = vsel %vm2088_vm13, %v2081_v60, 920167782  ;;  %4200 = vcosq.f32 %v6582_v8  ;;  %v6644_v12 = vmul.u32.u64.low %v6636_v40, %v1770_v25  ;;  %v6645_v13 = vmul.u32.u64.high %v6636_v40, %v1770_v25, %v6644_v12 }
 0x23a   : > { %v2095_v62 = vsel %vm2087_vm14, %v2078_v18, %v2094_v27  ;;  %vm1407_vm0 = vweird.f32 %v5672_v6  ;;  %v3873_v30 = vadd.s32 4294967294, %v1692_v42  ;;  %v2089_v36 = vsel %vm2085_vm6, %v2069_v11, %v2072_v21 }
 0x23b   : > { %v6651_v19 = vmul.u32.u64.low %v6636_v40, %v1774_v7  ;;  %v6652_v0 = vmul.u32.u64.high %v6636_v40, %v1774_v7, %v6651_v19  ;;  %v2091_v5 = vsel %vm2087_vm14, %v2075_v57, %v2090_v45  ;;  %v2096_v33 = vsel %vm2086_vm3, %v2093_v31, %v2095_v62  ;;  %v8718_v31 = vld [vmem:[#allocation28_spill] sm:$0xff] }
 0x23c   : > { %v2097_v52 = vsel %vm2085_vm6, %v2075_v57, %v2078_v18  ;;  %v2098_v25 = vsel %vm2088_vm13, %v2084_v54, 1326507024  ;;  %v1517_v35 = vxor.u32 2147483648, %v6605_v53  ;;  %v1898_v24 = vclz %v6592_v2 }
 0x23d   : > { %v2099_v42 = vsel %vm2087_vm14, %v2081_v60, %v2098_v25  ;;  %v2101_v27 = vshll.u32 %v2061_v38, 8  ;;  %v1514_v17 = vxor.u32 2147483648, %v4199_v39  ;;  %4202 = vsinq.f32 %v6582_v8  ;;  %v4290_v25 = vld [vmem:[%s4547_s28 + $0x50] sm:$0xff] }
 0x23e   : > { %v1743_v21 = vshrl.u32 %v8634_v58, %v6517_v56  ;;  %v1764_v11 = vsel %vm1762_vm1, %v6588_v37, 2102212464  ;;  %vm1510_vm9 = vweird.f32 %v8705_v34  ;;  %v2092_v57 = vsel %vm2086_vm3, %v2089_v36, %v2091_v5  ;;  %v4288_v36 = vld [vmem:[%s4547_s28 + $0x40] sm:$0xff] }
 0x23f   : > { %v2100_v18 = vsel %vm2086_vm3, %v2097_v52, %v2099_v42  ;;  %v6671_v2 = vmul.u32.u64.low %v2101_v27, %v2096_v33  ;;  %v6672_v7 = vmul.u32.u64.high %v2101_v27, %v2096_v33, %v6671_v2  ;;  %v1610_v60 = vsel %vm6528_vm5, 0, %v6577_v16  ;;  %v4289_v52 = vld [vmem:[%s4547_s28 + $0x48] sm:$0xff] }
 0x240   : > { %vm3874_vm7 = vcmp.lt.s32.totalorder %v3873_v30, 0  ;;  %v6678_v56 = vmul.u32.u64.low %v2101_v27, %v2100_v18  ;;  %v6679_v8 = vmul.u32.u64.high %v2101_v27, %v2100_v18, %v6678_v56  ;;  %v1518_v37 = vsel %vm1516_vm2, %v1517_v35, %v4199_v39 }
 0x241   : > { %v3881_v38 = vadd.s32 4294967294, %v1898_v24  ;;  %v1763_v26 = vsel %vm1759_vm11, %v1743_v21, %v6584_v51  ;;  %v1765_v54 = vsel %vm1761_vm4, %v6586_v10, %v1764_v11  ;;  %v1515_v41 = vsel %vm1513_vm15, %v6605_v53, %v1514_v17 }
 0x242   : > { %v1785_v16 = vadd.s32 1, %v6645_v13  ;;  %v2108_v45 = vmul.u32 %v2101_v27, %v2092_v57  ;;  %v1959_v62 = vadd.s32 1, %v8718_v31  ;;  %vm1512_vm5 = vcmp.lt.s32.totalorder %v6542_v28, 2 }
 0x243   : > { %v6695_v39 = vsel %vm3874_vm7, 0, %v3873_v30  ;;  %vm1784_vm8 = vc.u32 %v6652_v0, %v6644_v12  ;;  %v2111_v51 = vadd.s32 1, %v6672_v7  ;;  %v6700_v10 = vpop.eup %4200  ;;  %v1417_v17 = vsel %vm1407_vm0, nan, %v6544_v22 }
 0x244   : > { %v6705_v53 = vand.u32 3, %v1610_v60  ;;  %v1766_v28 = vsel %vm1760_vm12, %v1763_v26, %v1765_v54  ;;  %vm2110_vm10 = vc.u32 %v6679_v8, %v6671_v2  ;;  %v1519_v30 = vsel %vm1512_vm5, %v1515_v41, %v1518_v37  ;;  %v8720_v60 = vld [vmem:[#allocation9_spill] sm:$0xff]  ;;  %v4291_v37 = vld [vmem:[%s4547_s28 + $0x58] sm:$0xff] }
 0x245   : > { %vm3882_vm1 = vcmp.lt.s32.totalorder %v3881_v38, 0  ;;  %v2112_v19 = vsel %vm2110_vm10, %v2111_v51, %v6672_v7  ;;  %vm1960_vm11 = vcmp.gt.s32.totalorder %v1959_v62, 0  ;;  %v6714_v5 = vmul.f32 %v4288_v36, %v6536_v23 }
 0x246   : > { %v1700_v6 = vsub.s32 4294967266, %v6695_v39  ;;  %v1786_v22 = vsel %vm1784_vm8, %v1785_v16, %v6645_v13  ;;  %v2113_v33 = vadd.s32 %v2112_v19, %v2108_v45  ;;  %v6720_v49 = vmul.f32 %v4289_v52, %v6540_v44 }
 0x247   : > { %v6723_v35 = vmul.f32 %v4290_v25, %v1417_v17  ;;  %v1782_v24 = vmul.u32 %v6636_v40, %v1766_v28  ;;  %v1961_v42 = vsel %vm1960_vm11, %v1959_v62, 0  ;;  %v6726_v27 = vpop.eup %4202  ;;  %v1520_v23 = vsel %vm1510_vm9, nan, %v1519_v30 }
 0x248   : > { %vm1619_vm4 = vcmp.eq.s32.totalorder %v6705_v53, 2  ;;  %v6732_v13 = vsel %vm3882_vm1, 0, %v3881_v38  ;;  %v2114_v21 = vadd.s32 536870912, %v2113_v33  ;;  %v1620_v44 = vxor.u32 2147483648, %v6700_v10 }
 0x249   : > { %8719 = vst [vmem:[#allocation47_spill] sm:$0xff] %v6732_v13  ;;  %v1696_v11 = vsub.s32 32, %v6695_v39  ;;  %v6736_v57 = vadd.s32 %v1786_v22, %v1782_v24  ;;  %v1963_v18 = vand.u32 31, %v1961_v42  ;;  %v6740_v40 = vadd.s32 %v6375_v15, %v6385_v32 }
 0x24a   : > { %v1701_v7 = vadd.s32 127, %v1700_v6  ;;  %v6742_v34 = vshrl.u32 %v2114_v21, 30  ;;  %v8579_v56 = vand.u32 2147483647, %v8720_v60  ;;  %v6746_v38 = vmul.f32 %v4291_v37, %v1520_v23 }
 0x24b   : > { %v1902_v26 = vsub.s32 32, %v6732_v13  ;;  %v1680_v54 = vadd.s32 %v6422_v3, %v6432_v4  ;;  %v1964_v41 = vsub.s32 32, %v1963_v18  ;;  %v1617_v16 = vxor.u32 2147483648, %v6726_v27 }
 0x24c   : > { %v1906_v32 = vsub.s32 4294967266, %v6732_v13  ;;  %v2116_v45 = vshll.u32 %v6742_v34, 30  ;;  %v6759_v31 = vsel %vm1619_vm4, %v1620_v44, %v6726_v27  ;;  %v1697_v62 = vshll.u32 %v6554_v59, %v6695_v39 }
 0x24d   : > { %v1698_v51 = vshrl.u32 %v1680_v54, %v1696_v11  ;;  %v1788_v3 = vadd.s32 536870912, %v6736_v57  ;;  %v1702_v4 = vshll.u32 %v1701_v7, 23  ;;  %v1956_v28 = vand.u32 8388607, %v8579_v56 }
 0x24e   : > { %v6764_v17 = vsub.s32 %v2113_v33, %v2116_v45  ;;  %v1966_v30 = vshll.u32 %v8634_v58, %v1963_v18  ;;  %v1967_v19 = vshrl.u32 %v8716_v1, %v1964_v41  ;;  %v1969_v36 = vshll.u32 %v8716_v1, %v1963_v18 }
 0x24f   : > { %v1970_v6 = vshrl.u32 %v8633_v14, %v1964_v41  ;;  %v1975_v22 = vshll.u32 %v8715_v43, %v1963_v18  ;;  %vm2055_vm12 = vcmp.lt.s32.totalorder %v8717_v48, 0  ;;  %v1962_v39 = vshrl.u32 %v1961_v42, 5 }
 0x250   : > { %v2119_v59 = vsub.s32 0, %v6764_v17  ;;  %v1972_v33 = vshll.u32 %v8633_v14, %v1963_v18  ;;  %v1973_v52 = vshrl.u32 %v8715_v43, %v1964_v41  ;;  %v6777_v25 = vor.u32 %v1698_v51, %v1697_v62 }
 0x251   : > { %v6779_v24 = vshrl.u32 %v1788_v3, 30  ;;  %v1976_v23 = vshrl.u32 %v8628_v46, %v1964_v41  ;;  %v1978_v21 = vshll.u32 %v8628_v46, %v1963_v18  ;;  %v6783_v44 = vor.u32 4788187, %v1702_v4 }
 0x252   : > { %v3888_v11 = vmin.u32 %v2119_v59, %v6764_v17  ;;  %v1957_v7 = vor.u32 8388608, %v1956_v28  ;;  %v1979_v37 = vshrl.u32 %v8630_v29, %v1964_v41  ;;  %v1965_v42 = vshrl.u32 %v8634_v58, %v1964_v41 }
 0x253   : > { %8721 = vst [vmem:[#allocation48_spill] sm:$0xff] %v6779_v24  ;;  %v1968_v54 = vor.u32 %v1967_v19, %v1966_v30  ;;  %v1971_v45 = vor.u32 %v1970_v6, %v1969_v36  ;;  %v1977_v15 = vor.u32 %v1976_v23, %v1975_v22  ;;  %vm1616_vm6 = vcmp.eq.s32.totalorder %v6705_v53, 0 }
 0x254   : > { %v2121_v62 = vclz %v3888_v11  ;;  %v1974_v51 = vor.u32 %v1973_v52, %v1972_v33  ;;  %vm1981_vm13 = vcmp.lt.s32.totalorder %v1962_v39, 1  ;;  %vm1984_vm14 = vcmp.lt.s32.totalorder %v1962_v39, 4  ;;  %v8725_v11 = vld [vmem:[#allocation24_spill] sm:$0xff] }
 0x255   : > { %v1790_v18 = vshll.u32 %v6779_v24, 30  ;;  %v8722_v3 = vand.u32 2147483647, %v8717_v48  ;;  %v2139_v28 = vsub.s32 4, %v6742_v34  ;;  %v1980_v41 = vor.u32 %v1979_v37, %v1978_v21 }
 0x256   : > { %vm1983_vm3 = vcmp.lt.s32.totalorder %v1962_v39, 3  ;;  %v2109_v30 = vadd.s32 %v6671_v2, %v6679_v8  ;;  %v3889_v19 = vadd.s32 4294967294, %v2121_v62  ;;  %vm1982_vm15 = vcmp.lt.s32.totalorder %v1962_v39, 2 }
 0x257   : > { %vm6792_vm2 = vcmp.le.f32.partialorder %v8722_v3, 0.7853982  ;;  %v1986_v36 = vsel %vm1984_vm14, %v1974_v51, 2102212464  ;;  %v1985_v6 = vsel %vm1981_vm13, %v1965_v42, %v1968_v54  ;;  %v1989_v22 = vsel %vm1981_vm13, %v1968_v54, %v1971_v45 }
 0x258   : > { %v1990_v59 = vsel %vm1984_vm14, %v1977_v15, 920167782  ;;  %v1997_v33 = vshll.u32 %v1957_v7, 8  ;;  %vm3890_vm0 = vcmp.lt.s32.totalorder %v3889_v19, 0  ;;  %v1987_v52 = vsel %vm1983_vm3, %v1971_v45, %v1986_v36  ;;  %v8726_v7 = vld [vmem:[#allocation50_spill] sm:$0xff] }
 0x259   : > { %v1991_v23 = vsel %vm1983_vm3, %v1974_v51, %v1990_v59  ;;  %v1993_v21 = vsel %vm1981_vm13, %v1971_v45, %v1974_v51  ;;  %vm268_vm9 = vcmp.lt.s32.totalorder %v8725_v11, 1  ;;  %v2124_v2 = vsel %vm3890_vm0, 0, %v3889_v19 }
 0x25a   : > { %v2140_v8 = vsel %vm2055_vm12, %v2139_v28, %v6742_v34  ;;  %v1992_v37 = vsel %vm1982_vm15, %v1989_v22, %v1991_v23  ;;  %v1994_v42 = vsel %vm1984_vm14, %v1980_v41, 1326507024  ;;  %vm1615_vm7 = vcmp.lt.s32.totalorder %v6705_v53, 2 }
 0x25b   : > { %vm1626_vm5 = vcmp.lt.s32.totalorder %v8726_v7, 0  ;;  %v2125_v54 = vsub.s32 32, %v2124_v2  ;;  %v2126_v62 = vshll.u32 %v6764_v17, %v2124_v2  ;;  %v2129_v3 = vsub.s32 4294967266, %v2124_v2 }
 0x25c   : > { %v1995_v45 = vsel %vm1983_vm3, %v1977_v15, %v1994_v42  ;;  %v1988_v51 = vsel %vm1982_vm15, %v1985_v6, %v1987_v52  ;;  %v6818_v36 = vmul.u32.u64.low %v1997_v33, %v1992_v37  ;;  %v6819_v34 = vmul.u32.u64.high %v1997_v33, %v1992_v37, %v6818_v36  ;;  %v8727_v6 = vld [vmem:[#allocation27_spill] sm:$0xff] }
 0x25d   : > { %v1996_v19 = vsel %vm1982_vm15, %v1993_v21, %v1995_v45  ;;  %v2127_v28 = vshrl.u32 %v2109_v30, %v2125_v54  ;;  %v2130_v41 = vadd.s32 127, %v2129_v3  ;;  %v1618_v17 = vsel %vm1616_vm6, %v6700_v10, %v1617_v16 }
 0x25e   : > { %v6822_v22 = vmul.u32.u64.low %v1997_v33, %v1996_v19  ;;  %v6823_v59 = vmul.u32.u64.high %v1997_v33, %v1996_v19, %v6822_v22  ;;  %v1706_v15 = vcvt.s32.f32 %v6777_v25  ;;  %v1710_v39 = vsub.s32 4, %v6501_v9 }
 0x25f   : > { %v2167_v52 = vadd.s32 1, %v8727_v6  ;;  %v2128_v23 = vor.u32 %v2127_v28, %v2126_v62  ;;  %v2131_v21 = vshll.u32 %v2130_v41, 23  ;;  %v2142_v30 = vsel %vm6792_vm2, 0, %v2140_v8 }
 0x260   : > { %v2004_v2 = vmul.u32 %v1997_v33, %v1988_v51  ;;  %v1704_v37 = vand.u32 2147483647, %v6783_v44  ;;  %v6837_v27 = vsub.s32 %v6736_v57, %v1790_v18  ;;  %v2007_v42 = vadd.s32 1, %v6819_v34  ;;  %v8728_v33 = vld [vmem:[#allocation8_spill] sm:$0xff] }
 0x261   : > { %vm2168_vm8 = vcmp.gt.s32.totalorder %v2167_v52, 0  ;;  %v2132_v10 = vor.u32 4788187, %v2131_v21  ;;  %v2135_v16 = vcvt.s32.f32 %v2128_v23  ;;  %v6841_v25 = vadd.s32 128, %v8725_v11  ;;  %v8731_v23 = vld [vmem:[#allocation10_spill] sm:$0xff] }
 0x262   : > { %vm2006_vm10 = vc.u32 %v6823_v59, %v6818_v36  ;;  %v2146_v54 = vadd.s32 3, %v2142_v30  ;;  %v8578_v62 = vand.u32 2147483647, %v8728_v33  ;;  %v2169_v44 = vsel %vm2168_vm8, %v2167_v52, 0 }
 0x263   : > { %v2008_v8 = vsel %vm2006_vm10, %v2007_v42, %v6819_v34  ;;  %v6850_v57 = vshrl.u32 %v6740_v40, %v1902_v26  ;;  %v6854_v18 = vadd.s32 127, %v1906_v32  ;;  %v2133_v3 = vand.u32 2147483647, %v2132_v10  ;;  %v6868_v40 = vpop.permute.xlu1 %238  ;;  %v6870_v26 = vpop.permute.xlu0 %236 }
 0x264   : > { %v2009_v45 = vadd.s32 %v2008_v8, %v2004_v2  ;;  %v6859_v51 = vsel %vm1615_vm7, %v1618_v17, %v6759_v31  ;;  %v6861_v19 = vmul.f32 %v1706_v15, %v1704_v37  ;;  %v6866_v34 = vsel %vm1626_vm5, %v1710_v39, %v6501_v9 }
 0x265   : > { %8729 = vst [vmem:[#allocation30_spill] sm:$0xff] %v6850_v57  ;;  %8730 = vst [vmem:[#allocation11_spill] sm:$0xff] %v6854_v18  ;;  %v2171_v32 = vand.u32 31, %v2169_v44  ;;  %v2136_v41 = vmul.f32 %v2135_v16, %v2133_v3  ;;  %v6877_v53 = vsel %vm268_vm9, %v6870_v26, %v6868_v40  ;;  %v6879_v22 = vand.u32 3, %v2146_v54 }
 0x266   : > { %v2010_v31 = vadd.s32 536870912, %v2009_v45  ;;  %v3645_v9 = vand.u32 1, %v6841_v25  ;;  %v2164_v17 = vand.u32 8388607, %v8578_v62  ;;  %v2170_v30 = vshrl.u32 %v2169_v44, 5 }
 0x267   : > { %v2172_v15 = vsub.s32 32, %v2171_v32  ;;  %v2137_v39 = vxor.u32 2147483648, %v2136_v41  ;;  %v2174_v52 = vshll.u32 %v8634_v58, %v2171_v32  ;;  %v2177_v37 = vshll.u32 %v8716_v1, %v2171_v32  ;;  %v6908_v24 = vpop.permute.xlu1 %242 }
 0x268   : > { %v6884_v6 = vshrl.u32 %v2010_v31, 30  ;;  %v2180_v25 = vshll.u32 %v8633_v14, %v2171_v32  ;;  %v2165_v44 = vor.u32 8388608, %v2164_v17  ;;  %v2183_v3 = vshll.u32 %v8715_v43, %v2171_v32  ;;  %v8732_v31 = vld [vmem:[#allocation29_spill] sm:$0xff] }
 0x269   : > { %v2175_v2 = vshrl.u32 %v8716_v1, %v2172_v15  ;;  %v2178_v42 = vshrl.u32 %v8633_v14, %v2172_v15  ;;  %v2138_v10 = vsel %vm2055_vm12, %v2137_v39, %v2136_v41  ;;  %v2181_v54 = vshrl.u32 %v8715_v43, %v2172_v15 }
 0x26a   : > { %v2012_v16 = vshll.u32 %v6884_v6, 30  ;;  %v2141_v8 = vsel %vm6792_vm2, %v8717_v48, %v2138_v10  ;;  %v2271_v62 = vadd.s32 1, %v8732_v31  ;;  %v2173_v41 = vshrl.u32 %v8634_v58, %v2172_v15 }
 0x26b   : > { %4204 = vcosq.f32 %v2141_v8  ;;  %v2176_v39 = vor.u32 %v2175_v2, %v2174_v52  ;;  %v2179_v56 = vor.u32 %v2178_v42, %v2177_v37  ;;  %v2184_v21 = vshrl.u32 %v8628_v46, %v2172_v15 }
 0x26c   : > { %v6901_v28 = vsub.s32 %v2009_v45, %v2012_v16  ;;  %4206 = vsinq.f32 %v2141_v8  ;;  %v2186_v20 = vshll.u32 %v8628_v46, %v2171_v32  ;;  %v2182_v10 = vor.u32 %v2181_v54, %v2180_v25 }
 0x26d   : > { %v2187_v17 = vshrl.u32 %v8630_v29, %v2172_v15  ;;  %vm2189_vm1 = vcmp.lt.s32.totalorder %v2170_v30, 1  ;;  %vm2149_vm11 = vcmp.eq.s32.totalorder %v6879_v22, 0  ;;  %v2185_v45 = vor.u32 %v2184_v21, %v2183_v3 }
 0x26e   : > { %v2015_v4 = vsub.s32 0, %v6901_v28  ;;  %vm2190_vm4 = vcmp.lt.s32.totalorder %v2170_v30, 2  ;;  %vm2192_vm12 = vcmp.lt.s32.totalorder %v2170_v30, 4  ;;  %v6911_v52 = vshll.u32 %v2165_v44, 8 }
 0x26f   : > { %vm2148_vm6 = vcmp.lt.s32.totalorder %v6879_v22, 2  ;;  %v2188_v32 = vor.u32 %v2187_v17, %v2186_v20  ;;  %vm2191_vm13 = vcmp.lt.s32.totalorder %v2170_v30, 3  ;;  %v2194_v37 = vsel %vm2192_vm12, %v2182_v10, 2102212464  ;;  %v6940_v17 = vpop.permute.xlu1 %246 }
 0x270   : > { %v3884_v2 = vmin.u32 %v2015_v4, %v6901_v28  ;;  %vm2145_vm14 = vweird.f32 %v8717_v48  ;;  %vm1951_vm2 = vcmp.lt.s32.totalorder %v8720_v60, 0  ;;  %v2193_v15 = vsel %vm2189_vm1, %v2173_v41, %v2176_v39 }
 0x271   : > { %v2195_v21 = vsel %vm2191_vm13, %v2179_v56, %v2194_v37  ;;  %v2197_v42 = vsel %vm2189_vm1, %v2176_v39, %v2179_v56  ;;  %v2198_v16 = vsel %vm2192_vm12, %v2185_v45, 920167782  ;;  %vm2152_vm3 = vcmp.eq.s32.totalorder %v6879_v22, 2 }
 0x272   : > { %v2005_v20 = vadd.s32 %v6818_v36, %v6823_v59  ;;  %v2017_v25 = vclz %v3884_v2  ;;  %v2201_v54 = vsel %vm2189_vm1, %v2179_v56, %v2182_v10  ;;  %v2035_v8 = vsub.s32 4, %v6884_v6 }
 0x273   : > { %v2199_v44 = vsel %vm2191_vm13, %v2182_v10, %v2198_v16  ;;  %v2202_v3 = vsel %vm2192_vm12, %v2188_v32, 1326507024  ;;  %v8733_v31 = vand.u32 2147483647, %v8731_v23  ;;  %vm6933_vm15 = vcmp.eq.s32.totalorder %v3645_v9, 0 }
 0x274   : > { %v3885_v4 = vadd.s32 4294967294, %v2017_v25  ;;  %v2196_v36 = vsel %vm2190_vm4, %v2193_v15, %v2195_v21  ;;  %v2200_v59 = vsel %vm2190_vm4, %v2197_v42, %v2199_v44  ;;  %v2203_v56 = vsel %vm2191_vm13, %v2185_v45, %v2202_v3 }
 0x275   : > { %v6931_v41 = vand.u32 8388607, %v8733_v31  ;;  %v2204_v10 = vsel %vm2190_vm4, %v2201_v54, %v2203_v56  ;;  %v6944_v2 = vmul.u32.u64.low %v6911_v52, %v2200_v59  ;;  %v6945_v32 = vmul.u32.u64.high %v6911_v52, %v2200_v59, %v6944_v2  ;;  %v4205_v9 = vpop.eup %4204 }
 0x276   : > { %vm2272_vm0 = vcmp.gt.s32.totalorder %v2271_v62, 0  ;;  %vm3886_vm7 = vcmp.lt.s32.totalorder %v3885_v4, 0  ;;  %v6949_v37 = vmul.u32.u64.low %v6911_v52, %v2204_v10  ;;  %v6950_v16 = vmul.u32.u64.high %v6911_v52, %v2204_v10, %v6949_v37  ;;  %v4207_v21 = vpop.eup %4206 }
 0x277   : > { %v2273_v15 = vsel %vm2272_vm0, %v2271_v62, 0  ;;  %v2153_v42 = vxor.u32 2147483648, %v4205_v9  ;;  %v2020_v45 = vsel %vm3886_vm7, 0, %v3885_v4  ;;  %v2212_v25 = vmul.u32 %v6911_v52, %v2196_v36 }
 0x278   : > { %v2275_v30 = vand.u32 31, %v2273_v15  ;;  %v2150_v54 = vxor.u32 2147483648, %v4207_v21  ;;  %v2021_v44 = vsub.s32 32, %v2020_v45  ;;  %v2022_v3 = vshll.u32 %v6901_v28, %v2020_v45  ;;  %v6965_v28 = vpop.permute.xlu1 %250 }
 0x279   : > { %v2025_v31 = vsub.s32 4294967266, %v2020_v45  ;;  %v2154_v59 = vsel %vm2152_vm3, %v2153_v42, %v4207_v21  ;;  %v2215_v56 = vadd.s32 1, %v6945_v32  ;;  %v6963_v52 = vsel %vm1951_vm2, %v2035_v8, %v6884_v6 }
 0x27a   : > { %v2276_v57 = vsub.s32 32, %v2275_v30  ;;  %v2278_v10 = vshll.u32 %v8634_v58, %v2275_v30  ;;  %v2151_v62 = vsel %vm2149_vm11, %v4205_v9, %v2150_v54  ;;  %v2023_v4 = vshrl.u32 %v2005_v20, %v2021_v44 }
 0x27b   : > { %v2026_v37 = vadd.s32 127, %v2025_v31  ;;  %v2155_v36 = vsel %vm2148_vm6, %v2151_v62, %v2154_v59  ;;  %vm2214_vm8 = vc.u32 %v6950_v16, %v6944_v2  ;;  %v6971_v21 = vshrl.u32 %v2273_v15, 5 }
 0x27c   : > { %v2279_v42 = vshrl.u32 %v8716_v1, %v2276_v57  ;;  %v2156_v20 = vsel %vm2145_vm14, nan, %v2155_v36  ;;  %v8736_v9 = vand.u32 2147483647, %v8720_v60  ;;  %v2024_v8 = vor.u32 %v2023_v4, %v2022_v3 }
 0x27d   : > { %v2027_v22 = vshll.u32 %v2026_v37, 23  ;;  %v2216_v45 = vsel %vm2214_vm8, %v2215_v56, %v6945_v32  ;;  %v3614_v54 = vmul.f32 %v2156_v20, %v6877_v53  ;;  %v2281_v31 = vshll.u32 %v8716_v1, %v2275_v30  ;;  %v6999_v37 = vpop.permute.xlu1 %254 }
 0x27e   : > { %vm6978_vm10 = vcmp.le.f32.partialorder %v8736_v9, 0.7853982  ;;  %v2217_v15 = vadd.s32 %v2216_v45, %v2212_v25  ;;  %v2280_v44 = vor.u32 %v2279_v42, %v2278_v10  ;;  %v2031_v48 = vcvt.s32.f32 %v2024_v8  ;;  %v8739_v9 = vld [vmem:[#allocation46_spill] sm:$0xff] }
 0x27f   : > { %v2028_v59 = vor.u32 4788187, %v2027_v22  ;;  %v2282_v62 = vshrl.u32 %v8633_v14, %v2276_v57  ;;  %v2284_v36 = vshll.u32 %v8633_v14, %v2275_v30  ;;  %v3677_v13 = vsel %vm6933_vm15, %v8739_v9, %v3614_v54 }
 0x280   : > { %v2218_v3 = vadd.s32 536870912, %v2217_v15  ;;  %v2285_v4 = vshrl.u32 %v8715_v43, %v2276_v57  ;;  %v2287_v32 = vshll.u32 %v8715_v43, %v2275_v30  ;;  %3693 = vst [vmem:[%s6994_s29 + $0x8] sm:$0xff] %v3677_v13  ;;  %v2288_v56 = vshrl.u32 %v8628_v46, %v2276_v57 }
 0x281   : > { %v2029_v53 = vand.u32 2147483647, %v2028_v59  ;;  %v2283_v25 = vor.u32 %v2282_v62, %v2281_v31  ;;  %v2290_v10 = vshll.u32 %v8628_v46, %v2275_v30  ;;  %v2269_v42 = vor.u32 8388608, %v6931_v41 }
 0x282   : > { %v2219_v39 = vshrl.u32 %v2218_v3, 30  ;;  %v2291_v20 = vshrl.u32 %v8630_v29, %v2276_v57  ;;  %vm2293_vm1 = vcmp.lt.s32.totalorder %v6971_v21, 1  ;;  %v8740_v8 = vand.u32 2147483647, %v8726_v7 }
 0x283   : > { %v2032_v13 = vmul.f32 %v2031_v48, %v2029_v53  ;;  %v2277_v45 = vshrl.u32 %v8634_v58, %v2276_v57  ;;  %v2286_v54 = vor.u32 %v2285_v4, %v2284_v36  ;;  %v2289_v30 = vor.u32 %v2288_v56, %v2287_v32 }
 0x284   : > { %vm7006_vm11 = vcmp.le.f32.partialorder %v8740_v8, 0.7853982  ;;  %v2220_v31 = vshll.u32 %v2219_v39, 30  ;;  %vm2294_vm4 = vcmp.lt.s32.totalorder %v6971_v21, 2  ;;  %vm2295_vm12 = vcmp.lt.s32.totalorder %v6971_v21, 3 }
 0x285   : > { %vm2296_vm6 = vcmp.lt.s32.totalorder %v6971_v21, 4  ;;  %v2033_v41 = vxor.u32 2147483648, %v2032_v13  ;;  %v2292_v59 = vor.u32 %v2291_v20, %v2290_v10  ;;  %v2301_v9 = vsel %vm2293_vm1, %v2280_v44, %v2283_v25  ;;  %v7037_v20 = vpop.permute.xlu1 %258 }
 0x286   : > { %v2298_v62 = vsel %vm2296_vm6, %v2286_v54, 2102212464  ;;  %v1708_v48 = vxor.u32 2147483648, %v6861_v19  ;;  %v8743_v57 = vsub.s32 0, %v6837_v27  ;;  %v7024_v3 = vsub.s32 %v2217_v15, %v2220_v31 }
 0x287   : > { %v2302_v4 = vsel %vm2296_vm6, %v2289_v30, 920167782  ;;  %v2034_v32 = vsel %vm1951_vm2, %v2033_v41, %v2032_v13  ;;  %v2038_v53 = vsel %vm6978_vm10, 0, %v6963_v52  ;;  %v2297_v56 = vsel %vm2293_vm1, %v2277_v45, %v2280_v44 }
 0x288   : > { %v7022_v36 = vmin.u32 %v8743_v57, %v6837_v27  ;;  %v2303_v10 = vsel %vm2295_vm12, %v2286_v54, %v2302_v4  ;;  %v2037_v15 = vsel %vm6978_vm10, %v8720_v60, %v2034_v32  ;;  %v2223_v8 = vsub.s32 0, %v7024_v3 }
 0x289   : > { %v2299_v13 = vsel %vm2295_vm12, %v2283_v25, %v2298_v62  ;;  %v2304_v52 = vsel %vm2294_vm4, %v2301_v9, %v2303_v10  ;;  %4208 = vcosq.f32 %v2037_v15  ;;  %v2305_v44 = vsel %vm2293_vm1, %v2283_v25, %v2286_v54 }
 0x28a   : > { %v2306_v45 = vsel %vm2296_vm6, %v2292_v59, 1326507024  ;;  %v2309_v31 = vshll.u32 %v2269_v42, 8  ;;  %4210 = vsinq.f32 %v2037_v15  ;;  %v3892_v6 = vmin.u32 %v2223_v8, %v7024_v3  ;;  %v7076_v8 = vpop.permute.xlu1 %262 }
 0x28b   : > { %v2243_v41 = vsub.s32 4, %v2219_v39  ;;  %v2307_v57 = vsel %vm2295_vm12, %v2289_v30, %v2306_v45  ;;  %v2042_v4 = vadd.s32 3, %v2038_v53  ;;  %v2300_v59 = vsel %vm2294_vm4, %v2297_v56, %v2299_v13  ;;  %8744 = vst [vmem:[#allocation28_spill] sm:$0xff] %v7076_v8 }
 0x28c   : > { %v2308_v62 = vsel %vm2294_vm4, %v2305_v44, %v2307_v57  ;;  %v7056_v9 = vmul.u32.u64.low %v2309_v31, %v2304_v52  ;;  %v7057_v32 = vmul.u32.u64.high %v2309_v31, %v2304_v52, %v7056_v9  ;;  %v2225_v54 = vclz %v3892_v6  ;;  %v8748_v6 = vld [vmem:[#allocation32_spill] sm:$0xff] }
 0x28d   : > { %v7069_v30 = vsel %vm1626_vm5, %v1708_v48, %v6861_v19  ;;  %vm2159_vm13 = vcmp.lt.s32.totalorder %v8728_v33, 0  ;;  %v7072_v53 = vmul.u32.u64.low %v2309_v31, %v2308_v62  ;;  %v7073_v10 = vmul.u32.u64.high %v2309_v31, %v2308_v62, %v7072_v53 }
 0x28e   : > { %v1795_v15 = vclz %v7022_v36  ;;  %v3644_v52 = vand.u32 1, %v8725_v11  ;;  %v3893_v44 = vadd.s32 4294967294, %v2225_v54  ;;  %v2244_v21 = vsel %vm2159_vm13, %v2243_v41, %v2219_v39 }
 0x28f   : > { %vm2041_vm14 = vweird.f32 %v8720_v60  ;;  %v2043_v56 = vand.u32 3, %v2042_v4  ;;  %v2316_v19 = vmul.u32 %v2309_v31, %v2300_v59  ;;  %v2319_v48 = vadd.s32 1, %v7057_v32  ;;  %v8749_v31 = vld [vmem:[#allocation13_spill] sm:$0xff] }
 0x290   : > { %v8745_v13 = vand.u32 2147483647, %v8728_v33  ;;  %v2213_v36 = vadd.s32 %v6944_v2, %v6950_v16  ;;  %vm3894_vm2 = vcmp.lt.s32.totalorder %v3893_v44, 0  ;;  %v2375_v57 = vadd.s32 1, %v8748_v6  ;;  %v8754_v60 = vld [vmem:[#allocation45_spill] sm:$0xff] }
 0x291   : > { %v2228_v62 = vsel %vm3894_vm2, 0, %v3893_v44  ;;  %vm2318_vm3 = vc.u32 %v7073_v10, %v7056_v9  ;;  %vm2044_vm15 = vcmp.lt.s32.totalorder %v2043_v56, 2  ;;  %vm2045_vm0 = vcmp.eq.s32.totalorder %v2043_v56, 0  ;;  %v7099_v44 = vpop.permute.xlu1 %266 }
 0x292   : > { %vm7085_vm5 = vcmp.le.f32.partialorder %v8745_v13, 0.7853982  ;;  %v2229_v4 = vsub.s32 32, %v2228_v62  ;;  %v2230_v54 = vshll.u32 %v7024_v3, %v2228_v62  ;;  %v2233_v59 = vsub.s32 4294967266, %v2228_v62  ;;  %8750 = vst [vmem:[#allocation9_spill] sm:$0xff] %v7099_v44 }
 0x293   : > { %v2246_v39 = vsel %vm7085_vm5, 0, %v2244_v21  ;;  %v2320_v53 = vsel %vm2318_vm3, %v2319_v48, %v7057_v32  ;;  %v4209_v13 = vpop.eup %4208  ;;  %vm2048_vm7 = vcmp.eq.s32.totalorder %v2043_v56, 2  ;;  %vm2376_vm8 = vcmp.gt.s32.totalorder %v2375_v57, 0 }
 0x294   : > { %v2321_v2 = vadd.s32 %v2320_v53, %v2316_v19  ;;  %v4211_v16 = vpop.eup %4210  ;;  %v2049_v21 = vxor.u32 2147483648, %v4209_v13  ;;  %v2231_v6 = vshrl.u32 %v2213_v36, %v2229_v4  ;;  %v2234_v25 = vadd.s32 127, %v2233_v59 }
 0x295   : > { %v2046_v42 = vxor.u32 2147483648, %v4211_v16  ;;  %v2250_v41 = vadd.s32 3, %v2246_v39  ;;  %v2377_v18 = vsel %vm2376_vm8, %v2375_v57, 0  ;;  %v8751_v32 = vand.u32 2147483647, %v8749_v31 }
 0x296   : > { %v2322_v8 = vadd.s32 536870912, %v2321_v2  ;;  %v2050_v3 = vsel %vm2048_vm7, %v2049_v21, %v4211_v16  ;;  %v2232_v62 = vor.u32 %v2231_v6, %v2230_v54  ;;  %v2235_v50 = vshll.u32 %v2234_v25, 23 }
 0x297   : > { %v2372_v48 = vand.u32 8388607, %v8751_v32  ;;  %v284_v19 = vsel %vm268_vm9, %v7099_v44, %v6870_v26  ;;  %v2047_v53 = vsel %vm2045_vm0, %v4209_v13, %v2046_v42  ;;  %v2379_v4 = vand.u32 31, %v2377_v18 }
 0x298   : > { %v7108_v36 = vshrl.u32 %v2322_v8, 30  ;;  %v7110_v59 = vadd.s32 4294967294, %v1795_v15  ;;  %v2051_v57 = vsel %vm2044_vm15, %v2047_v53, %v2050_v3  ;;  %v2236_v39 = vor.u32 4788187, %v2235_v50 }
 0x299   : > { %v2239_v54 = vcvt.s32.f32 %v2232_v62  ;;  %vm7113_vm10 = vcmp.eq.s32.totalorder %v3644_v52, 0  ;;  %v2052_v16 = vsel %vm2041_vm14, nan, %v2051_v57  ;;  %v2380_v42 = vsub.s32 32, %v2379_v4 }
 0x29a   : > { %v2324_v26 = vshll.u32 %v7108_v36, 30  ;;  %v3613_v8 = vmul.f32 %v2052_v16, %v284_v19  ;;  %v2237_v13 = vand.u32 2147483647, %v2236_v39  ;;  %v7120_v21 = vand.u32 3, %v2250_v41 }
 0x29b   : > { %v2373_v15 = vor.u32 8388608, %v2372_v48  ;;  %v7125_v50 = vadd.s32 256, %v8725_v11  ;;  %v2382_v52 = vshll.u32 %v8634_v58, %v2379_v4  ;;  %v2385_v6 = vshll.u32 %v8716_v1, %v2379_v4 }
 0x29c   : > { %v7122_v56 = vsub.s32 %v2321_v2, %v2324_v26  ;;  %v3676_v3 = vsel %vm7113_vm10, %v8754_v60, %v3613_v8  ;;  %v2240_v62 = vmul.f32 %v2239_v54, %v2237_v13  ;;  %v2383_v32 = vshrl.u32 %v8716_v1, %v2380_v42 }
 0x29d   : > { %v2386_v41 = vshrl.u32 %v8633_v14, %v2380_v42  ;;  %3692 = vst [vmem:[%s6994_s29] sm:$0xff] %v3676_v3  ;;  %v2317_v2 = vadd.s32 %v7056_v9, %v7073_v10  ;;  %v2378_v19 = vshrl.u32 %v2377_v18, 5  ;;  %v2388_v53 = vshll.u32 %v8633_v14, %v2379_v4 }
 0x29e   : > { %v2327_v48 = vsub.s32 0, %v7122_v56  ;;  %v2241_v57 = vxor.u32 2147483648, %v2240_v62  ;;  %v2389_v39 = vshrl.u32 %v8715_v43, %v2380_v42  ;;  %v2391_v25 = vshll.u32 %v8715_v43, %v2379_v4 }
 0x29f   : > { %v7141_v16 = vshll.u32 %v2373_v15, 8  ;;  %v2381_v26 = vshrl.u32 %v8634_v58, %v2380_v42  ;;  %v2392_v8 = vshrl.u32 %v8628_v46, %v2380_v42  ;;  %v2394_v9 = vshll.u32 %v8628_v46, %v2379_v4 }
 0x2a0   : > { %v3896_v54 = vmin.u32 %v2327_v48, %v7122_v56  ;;  %v2242_v18 = vsel %vm2159_vm13, %v2241_v57, %v2240_v62  ;;  %v2384_v10 = vor.u32 %v2383_v32, %v2382_v52  ;;  %v2387_v13 = vor.u32 %v2386_v41, %v2385_v6 }
 0x2a1   : > { %v2395_v60 = vshrl.u32 %v8630_v29, %v2380_v42  ;;  %v2245_v15 = vsel %vm7085_vm5, %v8728_v33, %v2242_v18  ;;  %v2390_v44 = vor.u32 %v2389_v39, %v2388_v53  ;;  %vm2397_vm1 = vcmp.lt.s32.totalorder %v2378_v19, 1 }
 0x2a2   : > { %v2329_v3 = vclz %v3896_v54  ;;  %4212 = vcosq.f32 %v2245_v15  ;;  %vm2263_vm4 = vcmp.lt.s32.totalorder %v8731_v23, 0  ;;  %v2393_v48 = vor.u32 %v2392_v8, %v2391_v25 }
 0x2a3   : > { %v2396_v61 = vor.u32 %v2395_v60, %v2394_v9  ;;  %vm2398_vm12 = vcmp.lt.s32.totalorder %v2378_v19, 2  ;;  %4214 = vsinq.f32 %v2245_v15  ;;  %vm2399_vm6 = vcmp.lt.s32.totalorder %v2378_v19, 3 }
 0x2a4   : > { %v3897_v4 = vadd.s32 4294967294, %v2329_v3  ;;  %vm2400_vm13 = vcmp.lt.s32.totalorder %v2378_v19, 4  ;;  %v2401_v52 = vsel %vm2397_vm1, %v2381_v26, %v2384_v10  ;;  %v2405_v6 = vsel %vm2397_vm1, %v2384_v10, %v2387_v13 }
 0x2a5   : > { %v2402_v42 = vsel %vm2400_vm13, %v2390_v44, 2102212464  ;;  %v2406_v45 = vsel %vm2400_vm13, %v2393_v48, 920167782  ;;  %v8755_v62 = vand.u32 2147483647, %v8731_v23  ;;  %v2409_v57 = vsel %vm2397_vm1, %v2387_v13, %v2390_v44 }
 0x2a6   : > { %vm3898_vm5 = vcmp.lt.s32.totalorder %v3897_v4, 0  ;;  %v2403_v41 = vsel %vm2399_vm6, %v2387_v13, %v2402_v42  ;;  %v2407_v53 = vsel %vm2399_vm6, %v2390_v44, %v2406_v45  ;;  %v2347_v25 = vsub.s32 4, %v7108_v36 }
 0x2a7   : > { %vm7158_vm14 = vcmp.le.f32.partialorder %v8755_v62, 0.7853982  ;;  %v2332_v39 = vsel %vm3898_vm5, 0, %v3897_v4  ;;  %v2408_v54 = vsel %vm2398_vm12, %v2405_v6, %v2407_v53  ;;  %v2410_v26 = vsel %vm2400_vm13, %v2396_v61, 1326507024  ;;  %v7190_v53 = vpop.permute.xlu0 %240 }
 0x2a8   : > { %vm2249_vm2 = vweird.f32 %v8728_v33  ;;  %v2333_v8 = vsub.s32 32, %v2332_v39  ;;  %v2334_v9 = vshll.u32 %v7122_v56, %v2332_v39  ;;  %v2337_v18 = vsub.s32 4294967266, %v2332_v39  ;;  %v8758_v56 = vld [vmem:[#allocation12_spill] sm:$0xff] }
 0x2a9   : > { %v2411_v10 = vsel %vm2399_vm6, %v2393_v48, %v2410_v26  ;;  %v2404_v60 = vsel %vm2398_vm12, %v2401_v52, %v2403_v41  ;;  %v7173_v44 = vmul.u32.u64.low %v7141_v16, %v2408_v54  ;;  %v7174_v13 = vmul.u32.u64.high %v7141_v16, %v2408_v54, %v7173_v44  ;;  %v8759_v52 = vld [vmem:[#allocation31_spill] sm:$0xff] }
 0x2aa   : > { %v2412_v15 = vsel %vm2398_vm12, %v2409_v57, %v2411_v10  ;;  %v2335_v3 = vshrl.u32 %v2317_v2, %v2333_v8  ;;  %v2338_v4 = vadd.s32 127, %v2337_v18  ;;  %vm2252_vm3 = vcmp.lt.s32.totalorder %v7120_v21, 2 }
 0x2ab   : > { %v7178_v61 = vmul.u32.u64.low %v7141_v16, %v2412_v15  ;;  %v7179_v42 = vmul.u32.u64.high %v7141_v16, %v2412_v15, %v7178_v61  ;;  %vm2253_vm15 = vcmp.eq.s32.totalorder %v7120_v21, 0  ;;  %v2469_v48 = vand.u32 2147483647, %v8758_v56 }
 0x2ac   : > { %v2479_v19 = vadd.s32 1, %v8759_v52  ;;  %vm2256_vm0 = vcmp.eq.s32.totalorder %v7120_v21, 2  ;;  %v2336_v6 = vor.u32 %v2335_v3, %v2334_v9  ;;  %v2339_v45 = vshll.u32 %v2338_v4, 23  ;;  %v4213_v62 = vpop.eup %4212 }
 0x2ad   : > { %v2348_v2 = vsel %vm2263_vm4, %v2347_v25, %v7108_v36  ;;  %v3646_v41 = vand.u32 1, %v7125_v50  ;;  %v2420_v57 = vmul.u32 %v7141_v16, %v2404_v60  ;;  %v2423_v39 = vadd.s32 1, %v7174_v13  ;;  %v4215_v54 = vpop.eup %4214 }
 0x2ae   : > { %vm2480_vm7 = vcmp.gt.s32.totalorder %v2479_v19, 0  ;;  %v2257_v26 = vxor.u32 2147483648, %v4213_v62  ;;  %v2340_v8 = vor.u32 4788187, %v2339_v45  ;;  %v2343_v18 = vcvt.s32.f32 %v2336_v6 }
 0x2af   : > { %v2476_v9 = vand.u32 8388607, %v2469_v48  ;;  %v2254_v10 = vxor.u32 2147483648, %v4215_v54  ;;  %v2350_v36 = vsel %vm7158_vm14, 0, %v2348_v2  ;;  %vm2422_vm8 = vc.u32 %v7179_v42, %v7173_v44 }
 0x2b0   : > { %v2481_v50 = vsel %vm2480_vm7, %v2479_v19, 0  ;;  %v2258_v16 = vsel %vm2256_vm0, %v2257_v26, %v4215_v54  ;;  %v2341_v25 = vand.u32 2147483647, %v2340_v8  ;;  %v282_v60 = vsel %vm268_vm9, %v6868_v40, %v7190_v53 }
 0x2b1   : > { %v2424_v15 = vsel %vm2422_vm8, %v2423_v39, %v7174_v13  ;;  %v2255_v3 = vsel %vm2253_vm15, %v4213_v62, %v2254_v10  ;;  %vm7209_vm10 = vcmp.eq.s32.totalorder %v3646_v41, 0  ;;  %v2483_v52 = vand.u32 31, %v2481_v50  ;;  %v8762_v10 = vld [vmem:[#allocation26_spill] sm:$0xff] }
 0x2b2   : > { %v2425_v61 = vadd.s32 %v2424_v15, %v2420_v57  ;;  %v2259_v19 = vsel %vm2252_vm3, %v2255_v3, %v2258_v16  ;;  %v2344_v6 = vmul.f32 %v2343_v18, %v2341_v25  ;;  %v2354_v45 = vadd.s32 3, %v2350_v36 }
 0x2b3   : > { %v2477_v2 = vor.u32 8388608, %v2476_v9  ;;  %v2260_v40 = vsel %vm2249_vm2, nan, %v2259_v19  ;;  %v2482_v13 = vshrl.u32 %v2481_v50, 5  ;;  %v2484_v39 = vsub.s32 32, %v2483_v52 }
 0x2b4   : > { %v2426_v54 = vadd.s32 536870912, %v2425_v61  ;;  %v2345_v62 = vxor.u32 2147483648, %v2344_v6  ;;  %v3615_v41 = vmul.f32 %v2260_v40, %v282_v60  ;;  %v2486_v26 = vshll.u32 %v8634_v58, %v2483_v52 }
 0x2b5   : > { %v2489_v57 = vshll.u32 %v8716_v1, %v2483_v52  ;;  %v2487_v21 = vshrl.u32 %v8716_v1, %v2484_v39  ;;  %v2490_v18 = vshrl.u32 %v8633_v14, %v2484_v39  ;;  %v2492_v9 = vshll.u32 %v8633_v14, %v2483_v52 }
 0x2b6   : > { %v7219_v8 = vshrl.u32 %v2426_v54, 30  ;;  %v2346_v33 = vsel %vm2263_vm4, %v2345_v62, %v2344_v6  ;;  %v3678_v36 = vsel %vm7209_vm10, %v8762_v10, %v3615_v41  ;;  %v2493_v50 = vshrl.u32 %v8715_v43, %v2484_v39 }
 0x2b7   : > { %v2495_v16 = vshll.u32 %v8715_v43, %v2483_v52  ;;  %v2349_v25 = vsel %vm7158_vm14, %v8731_v23, %v2346_v33  ;;  %3694 = vst [vmem:[%s6994_s29 + $0x10] sm:$0xff] %v3678_v36  ;;  %v2485_v15 = vshrl.u32 %v8634_v58, %v2484_v39  ;;  %vm2501_vm1 = vcmp.lt.s32.totalorder %v2482_v13, 1 }
 0x2b8   : > { %v2428_v60 = vshll.u32 %v7219_v8, 30  ;;  %4216 = vcosq.f32 %v2349_v25  ;;  %v2488_v3 = vor.u32 %v2487_v21, %v2486_v26  ;;  %v2491_v19 = vor.u32 %v2490_v18, %v2489_v57 }
 0x2b9   : > { %v2496_v4 = vshrl.u32 %v8628_v46, %v2484_v39  ;;  %4218 = vsinq.f32 %v2349_v25  ;;  %v2494_v40 = vor.u32 %v2493_v50, %v2492_v9  ;;  %v2498_v54 = vshll.u32 %v8628_v46, %v2483_v52 }
 0x2ba   : > { %v7238_v6 = vsub.s32 %v2425_v61, %v2428_v60  ;;  %v3631_v32 = vadd.s32 384, %v8725_v11  ;;  %v2499_v41 = vshrl.u32 %v8630_v29, %v2484_v39  ;;  %vm2503_vm4 = vcmp.lt.s32.totalorder %v2482_v13, 3 }
 0x2bb   : > { %v2497_v62 = vor.u32 %v2496_v4, %v2495_v16  ;;  %vm2502_vm12 = vcmp.lt.s32.totalorder %v2482_v13, 2  ;;  %vm2504_vm6 = vcmp.lt.s32.totalorder %v2482_v13, 4  ;;  %v2517_v26 = vshll.u32 %v2477_v2, 8 }
 0x2bc   : > { %v2431_v33 = vsub.s32 0, %v7238_v6  ;;  %v2500_v57 = vor.u32 %v2499_v41, %v2498_v54  ;;  %v2506_v21 = vsel %vm2504_vm6, %v2494_v40, 2102212464  ;;  %v2509_v18 = vsel %vm2501_vm1, %v2488_v3, %v2491_v19  ;;  %v8772_v54 = vld [vmem:[#allocation33_spill] sm:$0xff] }
 0x2bd   : > { %v2510_v61 = vsel %vm2504_vm6, %v2497_v62, 920167782  ;;  %vm2353_vm13 = vweird.f32 %v8731_v23  ;;  %v2355_v9 = vand.u32 3, %v2354_v45  ;;  %v2505_v10 = vsel %vm2501_vm1, %v2485_v15, %v2488_v3 }
 0x2be   : > { %v3900_v52 = vmin.u32 %v2431_v33, %v7238_v6  ;;  %v2511_v39 = vsel %vm2503_vm4, %v2494_v40, %v2510_v61  ;;  %v2507_v36 = vsel %vm2503_vm4, %v2491_v19, %v2506_v21  ;;  %v2513_v2 = vsel %vm2501_vm1, %v2491_v19, %v2494_v40 }
 0x2bf   : > { %v2512_v50 = vsel %vm2502_vm12, %v2509_v18, %v2511_v39  ;;  %v2514_v16 = vsel %vm2504_vm6, %v2500_v57, 1326507024  ;;  %v3647_v25 = vand.u32 1, %v3631_v32  ;;  %vm2367_vm14 = vcmp.lt.s32.totalorder %v8749_v31, 0 }
 0x2c0   : > { %v2433_v60 = vclz %v3900_v52  ;;  %v2451_v4 = vsub.s32 4, %v7219_v8  ;;  %v8763_v45 = vand.u32 2147483647, %v8749_v31  ;;  %v2515_v15 = vsel %vm2503_vm4, %v2497_v62, %v2514_v16 }
 0x2c1   : > { %v7261_v3 = vmul.u32.u64.low %v2517_v26, %v2512_v50  ;;  %v7262_v41 = vmul.u32.u64.high %v2517_v26, %v2512_v50, %v7261_v3  ;;  %vm2356_vm2 = vcmp.lt.s32.totalorder %v2355_v9, 2  ;;  %v2508_v40 = vsel %vm2502_vm12, %v2505_v10, %v2507_v36 }
 0x2c2   : > { %vm7256_vm5 = vcmp.le.f32.partialorder %v8763_v45, 0.7853982  ;;  %v3901_v19 = vadd.s32 4294967294, %v2433_v60  ;;  %v2516_v32 = vsel %vm2502_vm12, %v2513_v2, %v2515_v15  ;;  %v4217_v33 = vpop.eup %4216  ;;  %vm2357_vm3 = vcmp.eq.s32.totalorder %v2355_v9, 0 }
 0x2c3   : > { %vm2360_vm15 = vcmp.eq.s32.totalorder %v2355_v9, 2  ;;  %v7267_v57 = vmul.u32.u64.low %v2517_v26, %v2516_v32  ;;  %v7268_v21 = vmul.u32.u64.high %v2517_v26, %v2516_v32, %v7267_v57  ;;  %v4219_v18 = vpop.eup %4218  ;;  %vm1613_vm0 = vweird.f32 %v8710_v47  ;;  %v8769_v9 = vld [vmem:[#allocation34_spill] sm:$0xff] }
 0x2c4   : > { %v2361_v62 = vxor.u32 2147483648, %v4217_v33  ;;  %v2421_v61 = vadd.s32 %v7173_v44, %v7179_v42  ;;  %vm3902_vm7 = vcmp.lt.s32.totalorder %v3901_v19, 0  ;;  %v2452_v52 = vsel %vm2367_vm14, %v2451_v4, %v7219_v8 }
 0x2c5   : > { %v2358_v13 = vxor.u32 2147483648, %v4219_v18  ;;  %v2436_v10 = vsel %vm3902_vm7, 0, %v3901_v19  ;;  %v2524_v39 = vmul.u32 %v2517_v26, %v2508_v40  ;;  %v2527_v36 = vadd.s32 1, %v7262_v41  ;;  %v8768_v40 = vld [vmem:[#allocation15_spill] sm:$0xff] }
 0x2c6   : > { %v2362_v50 = vsel %vm2360_vm15, %v2361_v62, %v4219_v18  ;;  %v2437_v2 = vsub.s32 32, %v2436_v10  ;;  %v2438_v16 = vshll.u32 %v7238_v6, %v2436_v10  ;;  %v2441_v60 = vsub.s32 4294967266, %v2436_v10 }
 0x2c7   : > { %v2359_v45 = vsel %vm2357_vm3, %v4217_v33, %v2358_v13  ;;  %v281_v44 = vsel %vm268_vm9, %v7190_v53, %v6908_v24  ;;  %v2454_v42 = vsel %vm7256_vm5, 0, %v2452_v52  ;;  %vm2526_vm8 = vc.u32 %v7268_v21, %v7261_v3 }
 0x2c8   : > { %v2363_v8 = vsel %vm2356_vm2, %v2359_v45, %v2362_v50  ;;  %v2439_v26 = vshrl.u32 %v2421_v61, %v2437_v2  ;;  %v2442_v4 = vadd.s32 127, %v2441_v60  ;;  %v2528_v6 = vsel %vm2526_vm8, %v2527_v36, %v7262_v41  ;;  %v8770_v61 = vld [vmem:[#allocation51_spill] sm:$0xff] }
 0x2c9   : > { %v2364_v15 = vsel %vm2353_vm13, nan, %v2363_v8  ;;  %vm7291_vm10 = vcmp.eq.s32.totalorder %v3647_v25, 0  ;;  %v2529_v53 = vadd.s32 %v2528_v6, %v2524_v39  ;;  %v2573_v32 = vand.u32 2147483647, %v8768_v40 }
 0x2ca   : > { %v3616_v33 = vmul.f32 %v2364_v15, %v281_v44  ;;  %v2440_v57 = vor.u32 %v2439_v26, %v2438_v16  ;;  %v2443_v18 = vshll.u32 %v2442_v4, 23  ;;  %v2583_v62 = vadd.s32 1, %v8769_v9 }
 0x2cb   : > { %v7301_v41 = vsel %vm7006_vm11, %v8726_v7, %v7069_v30  ;;  %vm3878_vm1 = vcmp.lt.s32.totalorder %v7110_v59, 0  ;;  %v2458_v23 = vadd.s32 3, %v2454_v42  ;;  %v2530_v25 = vadd.s32 536870912, %v2529_v53 }
 0x2cc   : > { %v3679_v52 = vsel %vm7291_vm10, %v8770_v61, %v3616_v33  ;;  %v2444_v13 = vor.u32 4788187, %v2443_v18  ;;  %v2447_v10 = vcvt.s32.f32 %v2440_v57  ;;  %vm2584_vm4 = vcmp.gt.s32.totalorder %v2583_v62, 0 }
 0x2cd   : > { %v7310_v39 = vsel %vm1613_vm0, nan, %v6859_v51  ;;  %3695 = vst [vmem:[%s6994_s29 + $0x18] sm:$0xff] %v3679_v52  ;;  %v7313_v36 = vshrl.u32 %v2530_v25, 30  ;;  %v2580_v30 = vand.u32 8388607, %v2573_v32  ;;  %v2585_v50 = vsel %vm2584_vm4, %v2583_v62, 0 }
 0x2ce   : > { %v8771_v2 = vsel %vm7006_vm11, 0, %v6866_v34  ;;  %v7325_v60 = vadd.s32 %v6644_v12, %v6652_v0  ;;  %v2445_v47 = vand.u32 2147483647, %v2444_v13  ;;  %v2587_v51 = vand.u32 31, %v2585_v50 }
 0x2cf   : > { %v7321_v16 = vand.u32 3, %v8771_v2  ;;  %4220 = vcosq.f32 %v7301_v41  ;;  %v7331_v45 = vsel %vm3878_vm1, 0, %v7110_v59  ;;  %v2532_v44 = vshll.u32 %v7313_v36, 30 }
 0x2d0   : > { %v7335_v22 = vadd.s32 512, %v8725_v11  ;;  %v2448_v34 = vmul.f32 %v2447_v10, %v2445_v47  ;;  %v7337_v42 = vand.u32 3, %v2458_v23  ;;  %v7341_v12 = vadd.s32 %v7261_v3, %v7268_v21 }
 0x2d1   : > { %v2588_v0 = vsub.s32 32, %v2587_v51  ;;  %v7343_v8 = vsub.s32 %v2529_v53, %v2532_v44  ;;  %v2581_v26 = vor.u32 8388608, %v2580_v30  ;;  %v2590_v4 = vshll.u32 %v8634_v58, %v2587_v51 }
 0x2d2   : > { %v2593_v59 = vshll.u32 %v8716_v1, %v2587_v51  ;;  %v2449_v6 = vxor.u32 2147483648, %v2448_v34  ;;  %v2596_v19 = vshll.u32 %v8633_v14, %v2587_v51  ;;  %v2599_v33 = vshll.u32 %v8715_v43, %v2587_v51 }
 0x2d3   : > { %v2591_v15 = vshrl.u32 %v8716_v1, %v2588_v0  ;;  %v2535_v57 = vsub.s32 0, %v7343_v8  ;;  %v2586_v18 = vshrl.u32 %v2585_v50, 5  ;;  %v2594_v3 = vshrl.u32 %v8633_v14, %v2588_v0 }
 0x2d4   : > { %v2597_v21 = vshrl.u32 %v8715_v43, %v2588_v0  ;;  %v2450_v53 = vsel %vm2367_vm14, %v2449_v6, %v2448_v34  ;;  %v2589_v9 = vshrl.u32 %v8634_v58, %v2588_v0  ;;  %v2600_v62 = vshrl.u32 %v8628_v46, %v2588_v0 }
 0x2d5   : > { %v2602_v23 = vshll.u32 %v8628_v46, %v2587_v51  ;;  %v2453_v25 = vsel %vm7256_vm5, %v8749_v31, %v2450_v53  ;;  %v3904_v61 = vmin.u32 %v2535_v57, %v7343_v8  ;;  %v2592_v52 = vor.u32 %v2591_v15, %v2590_v4 }
 0x2d6   : > { %v2595_v13 = vor.u32 %v2594_v3, %v2593_v59  ;;  %4222 = vcosq.f32 %v2453_v25  ;;  %v2598_v10 = vor.u32 %v2597_v21, %v2596_v19  ;;  %v2601_v30 = vor.u32 %v2600_v62, %v2599_v33 }
 0x2d7   : > { %v2603_v50 = vshrl.u32 %v8630_v29, %v2588_v0  ;;  %4224 = vsinq.f32 %v2453_v25  ;;  %v2537_v2 = vclz %v3904_v61  ;;  %v2555_v47 = vsub.s32 4, %v7313_v36 }
 0x2d8   : > { %v7364_v44 = vshll.u32 %v2581_v26, 8  ;;  %vm2605_vm11 = vcmp.lt.s32.totalorder %v2586_v18, 1  ;;  %vm2606_vm12 = vcmp.lt.s32.totalorder %v2586_v18, 2  ;;  %v2687_v34 = vadd.s32 1, %v8772_v54 }
 0x2d9   : > { %v2604_v51 = vor.u32 %v2603_v50, %v2602_v23  ;;  %v7367_v6 = vpop.eup %4220  ;;  %vm2461_vm6 = vcmp.eq.s32.totalorder %v7337_v42, 0  ;;  %vm2471_vm13 = vcmp.lt.s32.totalorder %v8758_v56, 0  ;;  %v3905_v4 = vadd.s32 4294967294, %v2537_v2 }
 0x2da   : > { %vm2607_vm14 = vcmp.lt.s32.totalorder %v2586_v18, 3  ;;  %vm2608_vm5 = vcmp.lt.s32.totalorder %v2586_v18, 4  ;;  %v2609_v0 = vsel %vm2605_vm11, %v2589_v9, %v2592_v52  ;;  %vm2460_vm2 = vcmp.lt.s32.totalorder %v7337_v42, 2 }
 0x2db   : > { %v2610_v59 = vsel %vm2608_vm5, %v2598_v10, 2102212464  ;;  %v2613_v26 = vsel %vm2605_vm11, %v2592_v52, %v2595_v13  ;;  %v2614_v15 = vsel %vm2608_vm5, %v2601_v30, 920167782  ;;  %v2617_v19 = vsel %vm2605_vm11, %v2595_v13, %v2598_v10 }
 0x2dc   : > { %vm2457_vm3 = vweird.f32 %v8749_v31  ;;  %vm3906_vm15 = vcmp.lt.s32.totalorder %v3905_v4, 0  ;;  %v2611_v33 = vsel %vm2607_vm14, %v2595_v13, %v2610_v59  ;;  %v2615_v57 = vsel %vm2607_vm14, %v2598_v10, %v2614_v15  ;;  %v7385_v13 = vpop.permute.xlu0 %244  ;;  %v8775_v59 = vld [vmem:[#allocation14_spill] sm:$0xff] }
 0x2dd   : > { %v2618_v3 = vsel %vm2608_vm5, %v2604_v51, 1326507024  ;;  %vm7377_vm0 = vcmp.le.f32.partialorder %v2469_v48, 0.7853982  ;;  %v2540_v53 = vsel %vm3906_vm15, 0, %v3905_v4  ;;  %v2612_v9 = vsel %vm2606_vm12, %v2609_v0, %v2611_v33 }
 0x2de   : > { %v2616_v62 = vsel %vm2606_vm12, %v2613_v26, %v2615_v57  ;;  %v2619_v23 = vsel %vm2607_vm14, %v2601_v30, %v2618_v3  ;;  %v2541_v25 = vsub.s32 32, %v2540_v53  ;;  %v2542_v61 = vshll.u32 %v7343_v8, %v2540_v53 }
 0x2df   : > { %v2545_v52 = vsub.s32 4294967266, %v2540_v53  ;;  %v2620_v10 = vsel %vm2606_vm12, %v2617_v19, %v2619_v23  ;;  %v7393_v2 = vmul.u32.u64.low %v7364_v44, %v2616_v62  ;;  %v7394_v51 = vmul.u32.u64.high %v7364_v44, %v2616_v62, %v7393_v2 }
 0x2e0   : > { %v7389_v48 = vmul.u32.u64.low %v7364_v44, %v2620_v10  ;;  %v7390_v50 = vmul.u32.u64.high %v7364_v44, %v2620_v10, %v7389_v48  ;;  %vm2464_vm7 = vcmp.eq.s32.totalorder %v7337_v42, 2  ;;  %v2543_v30 = vshrl.u32 %v7341_v12, %v2541_v25  ;;  %v4223_v4 = vpop.eup %4222 }
 0x2e1   : > { %v2546_v54 = vadd.s32 127, %v2545_v52  ;;  %v3648_v8 = vand.u32 1, %v7335_v22  ;;  %v280_v18 = vsel %vm268_vm9, %v6908_v24, %v7385_v13  ;;  %v2628_v0 = vmul.u32 %v7364_v44, %v2612_v9  ;;  %v4225_v15 = vpop.eup %4224 }
 0x2e2   : > { %v2677_v26 = vand.u32 2147483647, %v8775_v59  ;;  %vm2688_vm8 = vcmp.gt.s32.totalorder %v2687_v34, 0  ;;  %v2465_v19 = vxor.u32 2147483648, %v4223_v4  ;;  %v2544_v33 = vor.u32 %v2543_v30, %v2542_v61 }
 0x2e3   : > { %v2547_v57 = vshll.u32 %v2546_v54, 23  ;;  %v2689_v3 = vsel %vm2688_vm8, %v2687_v34, 0  ;;  %v2462_v12 = vxor.u32 2147483648, %v4225_v15  ;;  %v2556_v22 = vsel %vm2471_vm13, %v2555_v47, %v7313_v36 }
 0x2e4   : > { %vm2630_vm10 = vc.u32 %v7390_v50, %v7393_v2  ;;  %v2631_v24 = vadd.s32 1, %v7394_v51  ;;  %v2466_v44 = vsel %vm2464_vm7, %v2465_v19, %v4225_v15  ;;  %v2551_v9 = vcvt.s32.f32 %v2544_v33 }
 0x2e5   : > { %v2548_v53 = vor.u32 4788187, %v2547_v57  ;;  %vm7414_vm1 = vcmp.eq.s32.totalorder %v3648_v8, 0  ;;  %v2463_v34 = vsel %vm2461_vm6, %v4223_v4, %v2462_v12  ;;  %v2684_v36 = vand.u32 8388607, %v2677_v26 }
 0x2e6   : > { %v2632_v23 = vsel %vm2630_vm10, %v2631_v24, %v7394_v51  ;;  %v2691_v47 = vand.u32 31, %v2689_v3  ;;  %v2467_v25 = vsel %vm2460_vm2, %v2463_v34, %v2466_v44  ;;  %v2558_v52 = vsel %vm7377_vm0, 0, %v2556_v22 }
 0x2e7   : > { %v2549_v61 = vand.u32 2147483647, %v2548_v53  ;;  %v2633_v10 = vadd.s32 %v2632_v23, %v2628_v0  ;;  %v2468_v48 = vsel %vm2457_vm3, nan, %v2467_v25  ;;  %v7429_v30 = vshrl.u32 %v2689_v3, 5  ;;  %v8778_v3 = vld [vmem:[#allocation52_spill] sm:$0xff] }
 0x2e8   : > { %v2692_v54 = vsub.s32 32, %v2691_v47  ;;  %v2694_v51 = vshll.u32 %v8634_v58, %v2691_v47  ;;  %v3617_v4 = vmul.f32 %v2468_v48, %v280_v18  ;;  %v2697_v42 = vshll.u32 %v8716_v1, %v2691_v47 }
 0x2e9   : > { %v2552_v8 = vmul.f32 %v2551_v9, %v2549_v61  ;;  %v2634_v15 = vadd.s32 536870912, %v2633_v10  ;;  %v2700_v0 = vshll.u32 %v8633_v14, %v2691_v47  ;;  %v2703_v24 = vshll.u32 %v8715_v43, %v2691_v47 }
 0x2ea   : > { %v2695_v19 = vshrl.u32 %v8716_v1, %v2692_v54  ;;  %v2698_v33 = vshrl.u32 %v8633_v14, %v2692_v54  ;;  %v2701_v31 = vshrl.u32 %v8715_v43, %v2692_v54  ;;  %v3680_v12 = vsel %vm7414_vm1, %v8778_v3, %v3617_v4 }
 0x2eb   : > { %v2553_v57 = vxor.u32 2147483648, %v2552_v8  ;;  %v2635_v22 = vshrl.u32 %v2634_v15, 30  ;;  %v2562_v18 = vadd.s32 3, %v2558_v52  ;;  %3696 = vst [vmem:[%s6994_s29 + $0x20] sm:$0xff] %v3680_v12  ;;  %v2685_v44 = vor.u32 8388608, %v2684_v36 }
 0x2ec   : > { %v2704_v53 = vshrl.u32 %v8628_v46, %v2692_v54  ;;  %vm2709_vm4 = vcmp.lt.s32.totalorder %v7429_v30, 1  ;;  %v2696_v23 = vor.u32 %v2695_v19, %v2694_v51  ;;  %v2706_v25 = vshll.u32 %v8628_v46, %v2691_v47 }
 0x2ed   : > { %v2554_v9 = vsel %vm2471_vm13, %v2553_v57, %v2552_v8  ;;  %v2636_v34 = vshll.u32 %v2635_v22, 30  ;;  %v2699_v61 = vor.u32 %v2698_v33, %v2697_v42  ;;  %v2707_v52 = vshrl.u32 %v8630_v29, %v2692_v54 }
 0x2ee   : > { %v2557_v62 = vsel %vm7377_vm0, %v8758_v56, %v2554_v9  ;;  %v2705_v48 = vor.u32 %v2704_v53, %v2703_v24  ;;  %v2693_v4 = vshrl.u32 %v8634_v58, %v2692_v54  ;;  %v2702_v15 = vor.u32 %v2701_v31, %v2700_v0 }
 0x2ef   : > { %4226 = vcosq.f32 %v2557_v62  ;;  %v7451_v36 = vsub.s32 %v2633_v10, %v2636_v34  ;;  %v2708_v8 = vor.u32 %v2707_v52, %v2706_v25  ;;  %vm2711_vm11 = vcmp.lt.s32.totalorder %v7429_v30, 3 }
 0x2f0   : > { %4228 = vsinq.f32 %v2557_v62  ;;  %vm2712_vm12 = vcmp.lt.s32.totalorder %v7429_v30, 4  ;;  %v3633_v47 = vadd.s32 640, %v8725_v11  ;;  %vm2710_vm6 = vcmp.lt.s32.totalorder %v7429_v30, 2 }
 0x2f1   : > { %v2639_v21 = vsub.s32 0, %v7451_v36  ;;  %v2714_v51 = vsel %vm2712_vm12, %v2702_v15, 2102212464  ;;  %v2563_v10 = vand.u32 3, %v2562_v18  ;;  %v2717_v54 = vsel %vm2709_vm4, %v2696_v23, %v2699_v61 }
 0x2f2   : > { %v2718_v42 = vsel %vm2712_vm12, %v2705_v48, 920167782  ;;  %v2725_v19 = vshll.u32 %v2685_v44, 8  ;;  %v2713_v0 = vsel %vm2709_vm4, %v2693_v4, %v2696_v23  ;;  %v2715_v31 = vsel %vm2711_vm11, %v2699_v61, %v2714_v51 }
 0x2f3   : > { %v3908_v33 = vmin.u32 %v2639_v21, %v7451_v36  ;;  %v2719_v57 = vsel %vm2711_vm11, %v2702_v15, %v2718_v42  ;;  %vm2561_vm13 = vweird.f32 %v8758_v56  ;;  %v2721_v12 = vsel %vm2709_vm4, %v2699_v61, %v2702_v15  ;;  %v8779_v42 = vld [vmem:[#allocation36_spill] sm:$0xff]  ;;  %v8784_v56 = vld [vmem:[#allocation53_spill] sm:$0xff] }
 0x2f4   : > { %v2720_v3 = vsel %vm2710_vm6, %v2717_v54, %v2719_v57  ;;  %v2722_v24 = vsel %vm2712_vm12, %v2708_v8, 1326507024  ;;  %v3649_v18 = vand.u32 1, %v3633_v47  ;;  %v279_v44 = vsel %vm268_vm9, %v7385_v13, %v6940_v17 }
 0x2f5   : > { %v2641_v53 = vclz %v3908_v33  ;;  %v2659_v9 = vsub.s32 4, %v2635_v22  ;;  %v2716_v34 = vsel %vm2710_vm6, %v2713_v0, %v2715_v31  ;;  %v2723_v23 = vsel %vm2711_vm11, %v2705_v48, %v2722_v24 }
 0x2f6   : > { %v7487_v25 = vmul.u32.u64.low %v2725_v19, %v2720_v3  ;;  %v7488_v62 = vmul.u32.u64.high %v2725_v19, %v2720_v3, %v7487_v25  ;;  %vm2564_vm14 = vcmp.lt.s32.totalorder %v2563_v10, 2  ;;  %vm2575_vm5 = vcmp.lt.s32.totalorder %v8768_v40, 0 }
 0x2f7   : > { %v3909_v61 = vadd.s32 4294967294, %v2641_v53  ;;  %v2724_v52 = vsel %vm2710_vm6, %v2721_v12, %v2723_v23  ;;  %vm2565_vm2 = vcmp.eq.s32.totalorder %v2563_v10, 0  ;;  %vm2568_vm3 = vcmp.eq.s32.totalorder %v2563_v10, 2 }
 0x2f8   : > { %v7494_v13 = vmul.u32.u64.low %v2725_v19, %v2724_v52  ;;  %v7495_v4 = vmul.u32.u64.high %v2725_v19, %v2724_v52, %v7494_v13  ;;  %v2629_v48 = vadd.s32 %v7393_v2, %v7390_v50  ;;  %v2660_v8 = vsel %vm2575_vm5, %v2659_v9, %v2635_v22 }
 0x2f9   : > { %v4227_v15 = vpop.eup %4226  ;;  %vm3910_vm15 = vcmp.lt.s32.totalorder %v3909_v61, 0  ;;  %v2732_v47 = vmul.u32 %v2725_v19, %v2716_v34  ;;  %v2735_v30 = vadd.s32 1, %v7488_v62  ;;  %v2791_v33 = vadd.s32 1, %v8779_v42 }
 0x2fa   : > { %v4229_v21 = vpop.eup %4228  ;;  %v2569_v51 = vxor.u32 2147483648, %v4227_v15  ;;  %v2644_v54 = vsel %vm3910_vm15, 0, %v3909_v61  ;;  %vm7505_vm0 = vcmp.eq.s32.totalorder %v3649_v18, 0  ;;  %vm7511_vm7 = vcmp.le.f32.partialorder %v2573_v32, 0.7853982 }
 0x2fb   : > { %v2566_v0 = vxor.u32 2147483648, %v4229_v21  ;;  %v2645_v31 = vsub.s32 32, %v2644_v54  ;;  %v2646_v57 = vshll.u32 %v7451_v36, %v2644_v54  ;;  %v2649_v3 = vsub.s32 4294967266, %v2644_v54 }
 0x2fc   : > { %v2570_v12 = vsel %vm2568_vm3, %v2569_v51, %v4229_v21  ;;  %vm2734_vm8 = vc.u32 %v7495_v4, %v7487_v25  ;;  %v2662_v53 = vsel %vm7511_vm7, 0, %v2660_v8  ;;  %vm2792_vm10 = vcmp.gt.s32.totalorder %v2791_v33, 0 }
 0x2fd   : > { %v2567_v22 = vsel %vm2565_vm2, %v4227_v15, %v2566_v0  ;;  %v2647_v19 = vshrl.u32 %v2629_v48, %v2645_v31  ;;  %v2650_v36 = vadd.s32 127, %v2649_v3  ;;  %v2736_v24 = vsel %vm2734_vm8, %v2735_v30, %v7488_v62  ;;  %v8785_v30 = vld [vmem:[#allocation17_spill] sm:$0xff] }
 0x2fe   : > { %v2571_v18 = vsel %vm2564_vm14, %v2567_v22, %v2570_v12  ;;  %v2737_v9 = vadd.s32 %v2736_v24, %v2732_v47  ;;  %v2793_v61 = vsel %vm2792_vm10, %v2791_v33, 0  ;;  %4230 = vsinq.f32 %v7301_v41 }
 0x2ff   : > { %v2572_v32 = vsel %vm2561_vm13, nan, %v2571_v18  ;;  %v2648_v34 = vor.u32 %v2647_v19, %v2646_v57  ;;  %v2651_v23 = vshll.u32 %v2650_v36, 23  ;;  %v1799_v52 = vsub.s32 32, %v7331_v45 }
 0x300   : > { %v3618_v13 = vmul.f32 %v2572_v32, %v279_v44  ;;  %v2738_v62 = vadd.s32 536870912, %v2737_v9  ;;  %v2795_v8 = vand.u32 31, %v2793_v61  ;;  %v1803_v47 = vsub.s32 4294967266, %v7331_v45 }
 0x301   : > { %v2652_v15 = vor.u32 4788187, %v2651_v23  ;;  %v2655_v48 = vcvt.s32.f32 %v2648_v34  ;;  %v2666_v51 = vadd.s32 3, %v2662_v53  ;;  %v2781_v44 = vand.u32 2147483647, %v8785_v30 }
 0x302   : > { %v3681_v21 = vsel %vm7505_vm0, %v8784_v56, %v3618_v13  ;;  %v7532_v54 = vshrl.u32 %v2738_v62, 30  ;;  %v7536_v42 = vshrl.u32 %v2793_v61, 5  ;;  %v2796_v33 = vsub.s32 32, %v2795_v8 }
 0x303   : > { %3697 = vst [vmem:[%s6994_s29 + $0x28] sm:$0xff] %v3681_v21  ;;  %v2653_v41 = vand.u32 2147483647, %v2652_v15  ;;  %v7540_v31 = vadd.s32 768, %v8725_v11  ;;  %v2798_v57 = vshll.u32 %v8634_v58, %v2795_v8  ;;  %v2801_v3 = vshll.u32 %v8716_v1, %v2795_v8 }
 0x304   : > { %v2740_v0 = vshll.u32 %v7532_v54, 30  ;;  %v2799_v50 = vshrl.u32 %v8716_v1, %v2796_v33  ;;  %v2802_v22 = vshrl.u32 %v8633_v14, %v2796_v33  ;;  %v2807_v19 = vshll.u32 %v8715_v43, %v2795_v8 }
 0x305   : > { %v2656_v12 = vmul.f32 %v2655_v48, %v2653_v41  ;;  %v2804_v24 = vshll.u32 %v8633_v14, %v2795_v8  ;;  %v2805_v18 = vshrl.u32 %v8715_v43, %v2796_v33  ;;  %v2808_v53 = vshrl.u32 %v8628_v46, %v2796_v33 }
 0x306   : > { %v7547_v36 = vsub.s32 %v2737_v9, %v2740_v0  ;;  %v7552_v34 = vand.u32 3, %v2666_v51  ;;  %v2788_v23 = vand.u32 8388607, %v2781_v44  ;;  %vm2813_vm1 = vcmp.lt.s32.totalorder %v7536_v42, 1 }
 0x307   : > { %v2657_v32 = vxor.u32 2147483648, %v2656_v12  ;;  %v2797_v13 = vshrl.u32 %v8634_v58, %v2796_v33  ;;  %v2800_v9 = vor.u32 %v2799_v50, %v2798_v57  ;;  %v2803_v62 = vor.u32 %v2802_v22, %v2801_v3 }
 0x308   : > { %v2743_v61 = vsub.s32 0, %v7547_v36  ;;  %v2809_v48 = vor.u32 %v2808_v53, %v2807_v19  ;;  %v2810_v56 = vshll.u32 %v8628_v46, %v2795_v8  ;;  %v2811_v21 = vshrl.u32 %v8630_v29, %v2796_v33  ;;  %v7563_v51 = vpop.eup %4230 }
 0x309   : > { %v2658_v15 = vsel %vm2575_vm5, %v2657_v32, %v2656_v12  ;;  %v2806_v10 = vor.u32 %v2805_v18, %v2804_v24  ;;  %vm2816_vm4 = vcmp.lt.s32.totalorder %v7536_v42, 4  ;;  %vm2679_vm11 = vcmp.lt.s32.totalorder %v8775_v59, 0 }
 0x30a   : > { %v2661_v41 = vsel %vm7511_vm7, %v8768_v40, %v2658_v15  ;;  %v3912_v0 = vmin.u32 %v2743_v61, %v7547_v36  ;;  %v2789_v57 = vor.u32 8388608, %v2788_v23  ;;  %v2812_v3 = vor.u32 %v2811_v21, %v2810_v56 }
 0x30b   : > { %4232 = vcosq.f32 %v2661_v41  ;;  %vm2815_vm12 = vcmp.lt.s32.totalorder %v7536_v42, 3  ;;  %vm2814_vm6 = vcmp.lt.s32.totalorder %v7536_v42, 2  ;;  %v2818_v2 = vsel %vm2816_vm4, %v2806_v10, 2102212464 }
 0x30c   : > { %4234 = vsinq.f32 %v2661_v41  ;;  %v2745_v8 = vclz %v3912_v0  ;;  %v7576_v33 = vadd.s32 896, %v8725_v11  ;;  %v3650_v12 = vand.u32 1, %v7540_v31 }
 0x30d   : > { %v2821_v50 = vsel %vm2813_vm1, %v2800_v9, %v2803_v62  ;;  %v2822_v22 = vsel %vm2816_vm4, %v2809_v48, 920167782  ;;  %vm2669_vm13 = vcmp.eq.s32.totalorder %v7552_v34, 0  ;;  %vm7586_vm14 = vcmp.le.f32.partialorder %v2677_v26, 0.7853982 }
 0x30e   : > { %v3913_v24 = vadd.s32 4294967294, %v2745_v8  ;;  %v2817_v18 = vsel %vm2813_vm1, %v2797_v13, %v2800_v9  ;;  %v2823_v31 = vsel %vm2815_vm12, %v2806_v10, %v2822_v22  ;;  %v2825_v53 = vsel %vm2813_vm1, %v2803_v62, %v2806_v10  ;;  %v8788_v8 = vld [vmem:[#allocation16_spill] sm:$0xff] }
 0x30f   : > { %vm2668_vm5 = vcmp.lt.s32.totalorder %v7552_v34, 2  ;;  %v2819_v32 = vsel %vm2815_vm12, %v2803_v62, %v2818_v2  ;;  %v2824_v26 = vsel %vm2814_vm6, %v2821_v50, %v2823_v31  ;;  %v2826_v23 = vsel %vm2816_vm4, %v2812_v3, 1326507024  ;;  %v8789_v2 = vld [vmem:[#allocation35_spill] sm:$0xff] }
 0x310   : > { %v2829_v61 = vshll.u32 %v2789_v57, 8  ;;  %vm2665_vm2 = vweird.f32 %v8768_v40  ;;  %v2733_v13 = vadd.s32 %v7487_v25, %v7495_v4  ;;  %vm3914_vm3 = vcmp.lt.s32.totalorder %v3913_v24, 0 }
 0x311   : > { %v2763_v10 = vsub.s32 4, %v7532_v54  ;;  %v2827_v9 = vsel %vm2815_vm12, %v2809_v48, %v2826_v23  ;;  %v2748_v15 = vsel %vm3914_vm3, 0, %v3913_v24  ;;  %v2820_v25 = vsel %vm2814_vm6, %v2817_v18, %v2819_v32 }
 0x312   : > { %v2828_v62 = vsel %vm2814_vm6, %v2825_v53, %v2827_v9  ;;  %v7611_v56 = vmul.u32.u64.low %v2829_v61, %v2824_v26  ;;  %v7612_v21 = vmul.u32.u64.high %v2829_v61, %v2824_v26, %v7611_v56  ;;  %v2749_v41 = vsub.s32 32, %v2748_v15 }
 0x313   : > { %v2750_v0 = vshll.u32 %v7547_v36, %v2748_v15  ;;  %v2753_v57 = vsub.s32 4294967266, %v2748_v15  ;;  %v7618_v4 = vmul.u32.u64.low %v2829_v61, %v2828_v62  ;;  %v7619_v3 = vmul.u32.u64.high %v2829_v61, %v2828_v62, %v7618_v4  ;;  %v7632_v15 = vpop.permute.xlu0 %248 }
 0x314   : > { %v2885_v48 = vand.u32 2147483647, %v8788_v8  ;;  %v2895_v50 = vadd.s32 1, %v8789_v2  ;;  %vm2672_vm15 = vcmp.eq.s32.totalorder %v7552_v34, 2  ;;  %v2751_v22 = vshrl.u32 %v2733_v13, %v2749_v41 }
 0x315   : > { %v2754_v24 = vadd.s32 127, %v2753_v57  ;;  %v2764_v31 = vsel %vm2679_vm11, %v2763_v10, %v7532_v54  ;;  %v4233_v36 = vpop.eup %4232  ;;  %vm7627_vm0 = vcmp.eq.s32.totalorder %v3650_v12, 0  ;;  %v2836_v42 = vmul.u32 %v2829_v61, %v2820_v25 }
 0x316   : > { %v2839_v18 = vadd.s32 1, %v7612_v21  ;;  %vm2896_vm7 = vcmp.gt.s32.totalorder %v2895_v50, 0  ;;  %v4235_v32 = vpop.eup %4234  ;;  %v2673_v26 = vxor.u32 2147483648, %v4233_v36  ;;  %v2752_v23 = vor.u32 %v2751_v22, %v2750_v0 }
 0x317   : > { %v2755_v9 = vshll.u32 %v2754_v24, 23  ;;  %v2897_v13 = vsel %vm2896_vm7, %v2895_v50, 0  ;;  %v2670_v62 = vxor.u32 2147483648, %v4235_v32  ;;  %v2766_v54 = vsel %vm7586_vm14, 0, %v2764_v31 }
 0x318   : > { %vm2838_vm8 = vc.u32 %v7619_v3, %v7611_v56  ;;  %v2892_v12 = vand.u32 8388607, %v2885_v48  ;;  %v2674_v61 = vsel %vm2672_vm15, %v2673_v26, %v4235_v32  ;;  %v2759_v41 = vcvt.s32.f32 %v2752_v23 }
 0x319   : > { %v2756_v10 = vor.u32 4788187, %v2755_v9  ;;  %v2840_v0 = vsel %vm2838_vm8, %v2839_v18, %v7612_v21  ;;  %v2671_v57 = vsel %vm2669_vm13, %v4233_v36, %v2670_v62  ;;  %v278_v25 = vsel %vm268_vm9, %v6940_v17, %v7632_v15 }
 0x31a   : > { %v2841_v4 = vadd.s32 %v2840_v0, %v2836_v42  ;;  %v2899_v2 = vand.u32 31, %v2897_v13  ;;  %v2675_v50 = vsel %vm2668_vm5, %v2671_v57, %v2674_v61  ;;  %v2770_v24 = vadd.s32 3, %v2766_v54 }
 0x31b   : > { %v2757_v22 = vand.u32 2147483647, %v2756_v10  ;;  %v2898_v31 = vshrl.u32 %v2897_v13, 5  ;;  %v2676_v32 = vsel %vm2665_vm2, nan, %v2675_v50  ;;  %v2893_v9 = vor.u32 8388608, %v2892_v12 }
 0x31c   : > { %v2842_v21 = vadd.s32 536870912, %v2841_v4  ;;  %v2900_v18 = vsub.s32 32, %v2899_v2  ;;  %v2902_v36 = vshll.u32 %v8634_v58, %v2899_v2  ;;  %v3619_v23 = vmul.f32 %v2676_v32, %v278_v25 }
 0x31d   : > { %v2760_v26 = vmul.f32 %v2759_v41, %v2757_v22  ;;  %v2905_v17 = vshll.u32 %v8716_v1, %v2899_v2  ;;  %v2908_v13 = vshll.u32 %v8633_v14, %v2899_v2  ;;  %v2911_v10 = vshll.u32 %v8715_v43, %v2899_v2 }
 0x31e   : > { %v2843_v42 = vshrl.u32 %v2842_v21, 30  ;;  %v2903_v34 = vshrl.u32 %v8716_v1, %v2900_v18  ;;  %v2906_v62 = vshrl.u32 %v8633_v14, %v2900_v18  ;;  %v3682_v40 = vsel %vm7627_vm0, %v6450_v55, %v3619_v23 }
 0x31f   : > { %v2761_v54 = vxor.u32 2147483648, %v2760_v26  ;;  %v2909_v61 = vshrl.u32 %v8715_v43, %v2900_v18  ;;  %3698 = vst [vmem:[%s6994_s29 + $0x30] sm:$0xff] %v3682_v40  ;;  %v2901_v41 = vshrl.u32 %v8634_v58, %v2900_v18  ;;  %vm2917_vm10 = vcmp.lt.s32.totalorder %v2898_v31, 1 }
 0x320   : > { %v2844_v12 = vshll.u32 %v2843_v42, 30  ;;  %v2904_v0 = vor.u32 %v2903_v34, %v2902_v36  ;;  %v2907_v25 = vor.u32 %v2906_v62, %v2905_v17  ;;  %v2912_v50 = vshrl.u32 %v8628_v46, %v2900_v18 }
 0x321   : > { %v2762_v57 = vsel %vm2679_vm11, %v2761_v54, %v2760_v26  ;;  %v2914_v22 = vshll.u32 %v8628_v46, %v2899_v2  ;;  %v2910_v32 = vor.u32 %v2909_v61, %v2908_v13  ;;  %v2915_v21 = vshrl.u32 %v8630_v29, %v2900_v18 }
 0x322   : > { %v2765_v55 = vsel %vm7586_vm14, %v8775_v59, %v2762_v57  ;;  %v7672_v53 = vsub.s32 %v2841_v4, %v2844_v12  ;;  %v2913_v36 = vor.u32 %v2912_v50, %v2911_v10  ;;  %vm2919_vm1 = vcmp.lt.s32.totalorder %v2898_v31, 3 }
 0x323   : > { %4236 = vcosq.f32 %v2765_v55  ;;  %vm2920_vm4 = vcmp.lt.s32.totalorder %v2898_v31, 4  ;;  %v2916_v23 = vor.u32 %v2915_v21, %v2914_v22  ;;  %vm2918_vm11 = vcmp.lt.s32.totalorder %v2898_v31, 2 }
 0x324   : > { %4238 = vsinq.f32 %v2765_v55  ;;  %v2847_v26 = vsub.s32 0, %v7672_v53  ;;  %v2922_v2 = vsel %vm2920_vm4, %v2910_v32, 2102212464  ;;  %v2925_v17 = vsel %vm2917_vm10, %v2904_v0, %v2907_v25 }
 0x325   : > { %v2926_v19 = vsel %vm2920_vm4, %v2913_v36, 920167782  ;;  %v2933_v4 = vshll.u32 %v2893_v9, 8  ;;  %v2771_v34 = vand.u32 3, %v2770_v24  ;;  %v2921_v18 = vsel %vm2917_vm10, %v2901_v41, %v2904_v0 }
 0x326   : > { %v3916_v62 = vmin.u32 %v2847_v26, %v7672_v53  ;;  %v2927_v13 = vsel %vm2919_vm1, %v2910_v32, %v2926_v19  ;;  %v2923_v54 = vsel %vm2919_vm1, %v2907_v25, %v2922_v2  ;;  %v2929_v61 = vsel %vm2917_vm10, %v2907_v25, %v2910_v32 }
 0x327   : > { %v2928_v40 = vsel %vm2918_vm11, %v2925_v17, %v2927_v13  ;;  %v2930_v10 = vsel %vm2920_vm4, %v2916_v23, 1326507024  ;;  %v1723_v12 = vxor.u32 2147483648, %v7367_v6  ;;  %vm2769_vm12 = vweird.f32 %v8775_v59  ;;  %v8792_v17 = vld [vmem:[#allocation39_spill] sm:$0xff] }
 0x328   : > { %v2849_v9 = vclz %v3916_v62  ;;  %v2867_v24 = vsub.s32 4, %v2843_v42  ;;  %v3651_v57 = vand.u32 1, %v7576_v33  ;;  %v2931_v41 = vsel %vm2919_vm1, %v2913_v36, %v2930_v10 }
 0x329   : > { %v7690_v0 = vmul.u32.u64.low %v2933_v4, %v2928_v40  ;;  %v7691_v50 = vmul.u32.u64.high %v2933_v4, %v2928_v40, %v7690_v0  ;;  %v277_v25 = vsel %vm268_vm9, %v7632_v15, %v6965_v28  ;;  %v2924_v55 = vsel %vm2918_vm11, %v2921_v18, %v2923_v54 }
 0x32a   : > { %v3917_v22 = vadd.s32 4294967294, %v2849_v9  ;;  %v2932_v32 = vsel %vm2918_vm11, %v2929_v61, %v2931_v41  ;;  %vm2773_vm6 = vcmp.eq.s32.totalorder %v2771_v34, 0  ;;  %vm2783_vm13 = vcmp.lt.s32.totalorder %v8785_v30, 0 }
 0x32b   : > { %v7701_v33 = vmul.u32.u64.low %v2933_v4, %v2932_v32  ;;  %v7702_v21 = vmul.u32.u64.high %v2933_v4, %v2932_v32, %v7701_v33  ;;  %vm2776_vm14 = vcmp.eq.s32.totalorder %v2771_v34, 2  ;;  %v2837_v36 = vadd.s32 %v7611_v56, %v7619_v3 }
 0x32c   : > { %vm3918_vm5 = vcmp.lt.s32.totalorder %v3917_v22, 0  ;;  %v2868_v26 = vsel %vm2783_vm13, %v2867_v24, %v2843_v42  ;;  %v2940_v2 = vmul.u32 %v2933_v4, %v2924_v55  ;;  %v2943_v31 = vadd.s32 1, %v7691_v50 }
 0x32d   : > { %v4237_v15 = vpop.eup %4236  ;;  %v2852_v23 = vsel %vm3918_vm5, 0, %v3917_v22  ;;  %v2999_v19 = vadd.s32 1, %v8792_v17  ;;  %vm2772_vm2 = vcmp.lt.s32.totalorder %v2771_v34, 2  ;;  %vm7713_vm3 = vcmp.le.f32.partialorder %v2781_v44, 0.7853982  ;;  %v8795_v17 = vld [vmem:[#allocation19_spill] sm:$0xff] }
 0x32e   : > { %v4239_v62 = vpop.eup %4238  ;;  %v2777_v18 = vxor.u32 2147483648, %v4237_v15  ;;  %v2853_v13 = vsub.s32 32, %v2852_v23  ;;  %v2854_v54 = vshll.u32 %v7672_v53, %v2852_v23  ;;  %v2857_v40 = vsub.s32 4294967266, %v2852_v23 }
 0x32f   : > { %v2774_v61 = vxor.u32 2147483648, %v4239_v62  ;;  %vm2942_vm15 = vc.u32 %v7702_v21, %v7690_v0  ;;  %v2870_v9 = vsel %vm7713_vm3, 0, %v2868_v26  ;;  %vm3000_vm0 = vcmp.gt.s32.totalorder %v2999_v19, 0 }
 0x330   : > { %v2778_v3 = vsel %vm2776_vm14, %v2777_v18, %v4239_v62  ;;  %v2855_v42 = vshrl.u32 %v2837_v36, %v2853_v13  ;;  %v2858_v4 = vadd.s32 127, %v2857_v40  ;;  %v2944_v10 = vsel %vm2942_vm15, %v2943_v31, %v7691_v50 }
 0x331   : > { %v2775_v53 = vsel %vm2773_vm6, %v4237_v15, %v2774_v61  ;;  %v2945_v24 = vadd.s32 %v2944_v10, %v2940_v2  ;;  %v3001_v55 = vsel %vm3000_vm0, %v2999_v19, 0  ;;  %v1801_v32 = vshrl.u32 %v7325_v60, %v1799_v52 }
 0x332   : > { %v2779_v44 = vsel %vm2772_vm2, %v2775_v53, %v2778_v3  ;;  %v2856_v41 = vor.u32 %v2855_v42, %v2854_v54  ;;  %v2859_v22 = vshll.u32 %v2858_v4, 23  ;;  %vm3667_vm7 = vcmp.eq.s32.totalorder %v3651_v57, 0 }
 0x333   : > { %v2780_v33 = vsel %vm2769_vm12, nan, %v2779_v44  ;;  %v2946_v34 = vadd.s32 536870912, %v2945_v24  ;;  %v3003_v26 = vand.u32 31, %v3001_v55  ;;  %v7731_v23 = vadd.s32 127, %v1803_v47 }
 0x334   : > { %v3620_v50 = vmul.f32 %v2780_v33, %v277_v25  ;;  %v2860_v36 = vor.u32 4788187, %v2859_v22  ;;  %v2863_v15 = vcvt.s32.f32 %v2856_v41  ;;  %v2874_v2 = vadd.s32 3, %v2870_v9 }
 0x335   : > { %v7733_v31 = vshrl.u32 %v2946_v34, 30  ;;  %v2989_v19 = vand.u32 2147483647, %v8795_v17  ;;  %v7737_v52 = vshrl.u32 %v3001_v55, 5  ;;  %v3004_v57 = vsub.s32 32, %v3003_v26 }
 0x336   : > { %v3683_v60 = vsel %vm3667_vm7, %v6505_v63, %v3620_v50  ;;  %v2861_v59 = vand.u32 2147483647, %v2860_v36  ;;  %v8796_v25 = vshll.u32 %v6837_v27, %v7331_v45  ;;  %v3006_v18 = vshll.u32 %v8634_v58, %v3003_v26 }
 0x337   : > { %3699 = vst [vmem:[%s6994_s29 + $0x38] sm:$0xff] %v3683_v60  ;;  %v2948_v47 = vshll.u32 %v7733_v31, 30  ;;  %v3009_v13 = vshll.u32 %v8716_v1, %v3003_v26  ;;  %v3007_v40 = vshrl.u32 %v8716_v1, %v3004_v57  ;;  %v3010_v63 = vshrl.u32 %v8633_v14, %v3004_v57 }
 0x338   : > { %v7742_v62 = vor.u32 %v1801_v32, %v8796_v25  ;;  %v2864_v54 = vmul.f32 %v2863_v15, %v2861_v59  ;;  %v3012_v61 = vshll.u32 %v8633_v14, %v3003_v26  ;;  %v7751_v3 = vand.u32 3, %v2874_v2 }
 0x339   : > { %v7753_v42 = vsub.s32 %v2945_v24, %v2948_v47  ;;  %v3013_v27 = vshrl.u32 %v8715_v43, %v3004_v57  ;;  %v3015_v45 = vshll.u32 %v8715_v43, %v3003_v26  ;;  %v2996_v10 = vand.u32 8388607, %v2989_v19 }
 0x33a   : > { %v2865_v4 = vxor.u32 2147483648, %v2864_v54  ;;  %v3005_v53 = vshrl.u32 %v8634_v58, %v3004_v57  ;;  %vm3021_vm8 = vcmp.lt.s32.totalorder %v7737_v52, 1  ;;  %v3008_v44 = vor.u32 %v3007_v40, %v3006_v18 }
 0x33b   : > { %v2951_v9 = vsub.s32 0, %v7753_v42  ;;  %v3011_v41 = vor.u32 %v3010_v63, %v3009_v13  ;;  %v3016_v22 = vshrl.u32 %v8628_v46, %v3004_v57  ;;  %v3014_v55 = vor.u32 %v3013_v27, %v3012_v61 }
 0x33c   : > { %v2866_v24 = vsel %vm2783_vm13, %v2865_v4, %v2864_v54  ;;  %v3018_v32 = vshll.u32 %v8628_v46, %v3003_v26  ;;  %v3019_v33 = vshrl.u32 %v8630_v29, %v3004_v57  ;;  %vm3024_vm10 = vcmp.lt.s32.totalorder %v7737_v52, 4 }
 0x33d   : > { %v2869_v34 = vsel %vm7713_vm3, %v8785_v30, %v2866_v24  ;;  %v3920_v50 = vmin.u32 %v2951_v9, %v7753_v42  ;;  %v3017_v36 = vor.u32 %v3016_v22, %v3015_v45  ;;  %v2997_v15 = vor.u32 8388608, %v2996_v10 }
 0x33e   : > { %4240 = vcosq.f32 %v2869_v34  ;;  %v3020_v2 = vor.u32 %v3019_v33, %v3018_v32  ;;  %vm3023_vm1 = vcmp.lt.s32.totalorder %v7737_v52, 3  ;;  %vm3022_vm4 = vcmp.lt.s32.totalorder %v7737_v52, 2 }
 0x33f   : > { %4242 = vsinq.f32 %v2869_v34  ;;  %v2953_v60 = vclz %v3920_v50  ;;  %v3026_v26 = vsel %vm3024_vm10, %v3014_v55, 2102212464  ;;  %v3636_v56 = vadd.s32 1024, %v8725_v11 }
 0x340   : > { %v7778_v59 = vadd.s32 1152, %v8725_v11  ;;  %v3029_v57 = vsel %vm3021_vm8, %v3008_v44, %v3011_v41  ;;  %v3030_v25 = vsel %vm3024_vm10, %v3017_v36, 920167782  ;;  %v3025_v18 = vsel %vm3021_vm8, %v3005_v53, %v3008_v44 }
 0x341   : > { %v3921_v47 = vadd.s32 4294967294, %v2953_v60  ;;  %v3031_v13 = vsel %vm3023_vm1, %v3014_v55, %v3030_v25  ;;  %v3033_v54 = vsel %vm3021_vm8, %v3011_v41, %v3014_v55  ;;  %vm2876_vm11 = vcmp.lt.s32.totalorder %v7751_v3, 2 }
 0x342   : > { %v3027_v40 = vsel %vm3023_vm1, %v3011_v41, %v3026_v26  ;;  %v3032_v63 = vsel %vm3022_vm4, %v3029_v57, %v3031_v13  ;;  %v3034_v61 = vsel %vm3024_vm10, %v3020_v2, 1326507024  ;;  %v3037_v27 = vshll.u32 %v2997_v15, 8  ;;  %v8797_v15 = vld [vmem:[#allocation38_spill] sm:$0xff] }
 0x343   : > { %vm2873_vm12 = vweird.f32 %v8785_v30  ;;  %vm2877_vm6 = vcmp.eq.s32.totalorder %v7751_v3, 0  ;;  %v2941_v45 = vadd.s32 %v7690_v0, %v7702_v21  ;;  %vm3922_vm13 = vcmp.lt.s32.totalorder %v3921_v47, 0  ;;  %v8798_v57 = vld [vmem:[#allocation18_spill] sm:$0xff] }
 0x344   : > { %v3035_v4 = vsel %vm3023_vm1, %v3017_v36, %v3034_v61  ;;  %vm2887_vm14 = vcmp.lt.s32.totalorder %v8788_v8, 0  ;;  %v2956_v10 = vsel %vm3922_vm13, 0, %v3921_v47  ;;  %v3028_v0 = vsel %vm3022_vm4, %v3025_v18, %v3027_v40  ;;  %v7818_v36 = vpop.permute.xlu0 %252 }
 0x345   : > { %v3036_v53 = vsel %vm3022_vm4, %v3033_v54, %v3035_v4  ;;  %v7806_v9 = vmul.u32.u64.low %v3037_v27, %v3032_v63  ;;  %v7807_v44 = vmul.u32.u64.high %v3037_v27, %v3032_v63, %v7806_v9  ;;  %v2957_v41 = vsub.s32 32, %v2956_v10 }
 0x346   : > { %v2958_v22 = vshll.u32 %v7753_v42, %v2956_v10  ;;  %v2961_v24 = vsub.s32 4294967266, %v2956_v10  ;;  %vm2880_vm5 = vcmp.eq.s32.totalorder %v7751_v3, 2  ;;  %v3652_v21 = vand.u32 1, %v3636_v56 }
 0x347   : > { %v7814_v55 = vmul.u32.u64.low %v3037_v27, %v3036_v53  ;;  %v7815_v32 = vmul.u32.u64.high %v3037_v27, %v3036_v53, %v7814_v55  ;;  %v2959_v33 = vshrl.u32 %v2941_v45, %v2957_v41  ;;  %v3653_v50 = vand.u32 1, %v7778_v59 }
 0x348   : > { %v2962_v34 = vadd.s32 127, %v2961_v24  ;;  %v3103_v2 = vadd.s32 1, %v8797_v15  ;;  %v4241_v60 = vpop.eup %4240  ;;  %v2971_v42 = vsub.s32 4, %v7733_v31  ;;  %v3044_v26 = vmul.u32 %v3037_v27, %v3028_v0 }
 0x349   : > { %v3047_v52 = vadd.s32 1, %v7807_v44  ;;  %v3093_v25 = vand.u32 2147483647, %v8798_v57  ;;  %v4243_v56 = vpop.eup %4242  ;;  %v2881_v47 = vxor.u32 2147483648, %v4241_v60  ;;  %vm7826_vm2 = vcmp.le.f32.partialorder %v2885_v48, 0.7853982 }
 0x34a   : > { %v2960_v13 = vor.u32 %v2959_v33, %v2958_v22  ;;  %v2963_v54 = vshll.u32 %v2962_v34, 23  ;;  %vm3104_vm3 = vcmp.gt.s32.totalorder %v3103_v2, 0  ;;  %v2878_v40 = vxor.u32 2147483648, %v4243_v56 }
 0x34b   : > { %v276_v63 = vsel %vm268_vm9, %v6965_v28, %v7818_v36  ;;  %vm3046_vm15 = vc.u32 %v7815_v32, %v7806_v9  ;;  %v3105_v61 = vsel %vm3104_vm3, %v3103_v2, 0  ;;  %v2882_v27 = vsel %vm2880_vm5, %v2881_v47, %v4243_v56 }
 0x34c   : > { %v2964_v48 = vor.u32 4788187, %v2963_v54  ;;  %v2967_v45 = vcvt.s32.f32 %v2960_v13  ;;  %v3048_v4 = vsel %vm3046_vm15, %v3047_v52, %v7807_v44  ;;  %v2879_v10 = vsel %vm2877_vm6, %v4241_v60, %v2878_v40 }
 0x34d   : > { %vm7841_vm0 = vcmp.eq.s32.totalorder %v3652_v21, 0  ;;  %v3049_v41 = vadd.s32 %v3048_v4, %v3044_v26  ;;  %v3107_v28 = vand.u32 31, %v3105_v61  ;;  %v2883_v22 = vsel %vm2876_vm11, %v2879_v10, %v2882_v27 }
 0x34e   : > { %v2965_v24 = vand.u32 2147483647, %v2964_v48  ;;  %v2972_v0 = vsel %vm2887_vm14, %v2971_v42, %v7733_v31  ;;  %v3100_v44 = vand.u32 8388607, %v3093_v25  ;;  %v2884_v55 = vsel %vm2873_vm12, nan, %v2883_v22 }
 0x34f   : > { %v3050_v21 = vadd.s32 536870912, %v3049_v41  ;;  %v3106_v33 = vshrl.u32 %v3105_v61, 5  ;;  %v3108_v34 = vsub.s32 32, %v3107_v28  ;;  %v3621_v2 = vmul.f32 %v2884_v55, %v276_v63 }
 0x350   : > { %v2968_v15 = vmul.f32 %v2967_v45, %v2965_v24  ;;  %v3110_v3 = vshll.u32 %v8634_v58, %v3107_v28  ;;  %v3113_v60 = vshll.u32 %v8716_v1, %v3107_v28  ;;  %v3116_v52 = vshll.u32 %v8633_v14, %v3107_v28 }
 0x351   : > { %v7856_v26 = vshrl.u32 %v3050_v21, 30  ;;  %v3111_v31 = vshrl.u32 %v8716_v1, %v3108_v34  ;;  %v3114_v42 = vshrl.u32 %v8633_v14, %v3108_v34  ;;  %v3684_v56 = vsel %vm7841_vm0, %v6714_v5, %v3621_v2 }
 0x352   : > { %v2969_v30 = vxor.u32 2147483648, %v2968_v15  ;;  %v3117_v47 = vshrl.u32 %v8715_v43, %v3108_v34  ;;  %v3119_v13 = vshll.u32 %v8715_v43, %v3107_v28  ;;  %v2974_v54 = vsel %vm7826_vm2, 0, %v2972_v0  ;;  %3700 = vst [vmem:[%s6994_s29 + $0x40] sm:$0xff] %v3684_v56 }
 0x353   : > { %v3052_v40 = vshll.u32 %v7856_v26, 30  ;;  %v3101_v63 = vor.u32 8388608, %v3100_v44  ;;  %v3109_v61 = vshrl.u32 %v8634_v58, %v3108_v34  ;;  %v3112_v48 = vor.u32 %v3111_v31, %v3110_v3 }
 0x354   : > { %v2970_v27 = vsel %vm2887_vm14, %v2969_v30, %v2968_v15  ;;  %v3120_v45 = vshrl.u32 %v8628_v46, %v3108_v34  ;;  %v3122_v5 = vshll.u32 %v8628_v46, %v3107_v28  ;;  %v3115_v53 = vor.u32 %v3114_v42, %v3113_v60 }
 0x355   : > { %v2973_v4 = vsel %vm7826_vm2, %v8788_v8, %v2970_v27  ;;  %v7878_v10 = vsub.s32 %v3049_v41, %v3052_v40  ;;  %v3123_v22 = vshrl.u32 %v8630_v29, %v3108_v34  ;;  %v3118_v24 = vor.u32 %v3117_v47, %v3116_v52 }
 0x356   : > { %4244 = vcosq.f32 %v2973_v4  ;;  %v3121_v0 = vor.u32 %v3120_v45, %v3119_v13  ;;  %vm3125_vm7 = vcmp.lt.s32.totalorder %v3106_v33, 1  ;;  %v2978_v44 = vadd.s32 3, %v2974_v54 }
 0x357   : > { %4246 = vsinq.f32 %v2973_v4  ;;  %v3055_v55 = vsub.s32 0, %v7878_v10  ;;  %v3124_v21 = vor.u32 %v3123_v22, %v3122_v5  ;;  %vm3126_vm8 = vcmp.lt.s32.totalorder %v3106_v33, 2 }
 0x358   : > { %vm3127_vm10 = vcmp.lt.s32.totalorder %v3106_v33, 3  ;;  %vm3128_vm1 = vcmp.lt.s32.totalorder %v3106_v33, 4  ;;  %v3141_v28 = vshll.u32 %v3101_v63, 8  ;;  %v3129_v41 = vsel %vm3125_vm7, %v3109_v61, %v3112_v48 }
 0x359   : > { %v3924_v18 = vmin.u32 %v3055_v55, %v7878_v10  ;;  %v3130_v15 = vsel %vm3128_vm1, %v3118_v24, 2102212464  ;;  %v3133_v2 = vsel %vm3125_vm7, %v3112_v48, %v3115_v53  ;;  %v3134_v3 = vsel %vm3128_vm1, %v3121_v0, 920167782 }
 0x35a   : > { %v3131_v34 = vsel %vm3127_vm10, %v3115_v53, %v3130_v15  ;;  %v3137_v60 = vsel %vm3125_vm7, %v3115_v53, %v3118_v24  ;;  %v3138_v31 = vsel %vm3128_vm1, %v3124_v21, 1326507024  ;;  %v1805_v42 = vshll.u32 %v7731_v23, 23 }
 0x35b   : > { %vm2977_vm4 = vweird.f32 %v8788_v8  ;;  %v2979_v52 = vand.u32 3, %v2978_v44  ;;  %v3057_v30 = vclz %v3924_v18  ;;  %v275_v56 = vsel %vm268_vm9, %v7818_v36, %v6999_v37 }
 0x35c   : > { %v3075_v47 = vsub.s32 4, %v7856_v26  ;;  %v3135_v13 = vsel %vm3127_vm10, %v3118_v24, %v3134_v3  ;;  %v3139_v54 = vsel %vm3127_vm10, %v3121_v0, %v3138_v31  ;;  %v3132_v63 = vsel %vm3126_vm8, %v3129_v41, %v3131_v34 }
 0x35d   : > { %v3925_v40 = vadd.s32 4294967294, %v3057_v30  ;;  %v3136_v23 = vsel %vm3126_vm8, %v3133_v2, %v3135_v13  ;;  %v3140_v61 = vsel %vm3126_vm8, %v3137_v60, %v3139_v54  ;;  %vm7898_vm11 = vcmp.eq.s32.totalorder %v3653_v50, 0  ;;  %v8807_v2 = vld [vmem:[#allocation41_spill] sm:$0xff] }
 0x35e   : > { %v7902_v36 = vmul.u32.u64.low %v3141_v28, %v3140_v61  ;;  %v7903_v48 = vmul.u32.u64.high %v3141_v28, %v3140_v61, %v7902_v36  ;;  %v7905_v45 = vmul.u32.u64.low %v3141_v28, %v3136_v23  ;;  %v7906_v5 = vmul.u32.u64.high %v3141_v28, %v3136_v23, %v7905_v45  ;;  %v8808_v13 = vld [vmem:[#allocation21_spill] sm:$0xff] }
 0x35f   : > { %vm2981_vm12 = vcmp.eq.s32.totalorder %v2979_v52, 0  ;;  %vm2991_vm6 = vcmp.lt.s32.totalorder %v8795_v17, 0  ;;  %v3045_v4 = vadd.s32 %v7806_v9, %v7815_v32  ;;  %vm3926_vm13 = vcmp.lt.s32.totalorder %v3925_v40, 0 }
 0x360   : > { %v4245_v33 = vpop.eup %4244  ;;  %vm2984_vm14 = vcmp.eq.s32.totalorder %v2979_v52, 2  ;;  %v3060_v59 = vsel %vm3926_vm13, 0, %v3925_v40  ;;  %v3076_v50 = vsel %vm2991_vm6, %v3075_v47, %v7856_v26  ;;  %v3148_v53 = vmul.u32 %v3141_v28, %v3132_v63 }
 0x361   : > { %v4247_v22 = vpop.eup %4246  ;;  %v2985_v24 = vxor.u32 2147483648, %v4245_v33  ;;  %v3061_v0 = vsub.s32 32, %v3060_v59  ;;  %v3062_v44 = vshll.u32 %v7878_v10, %v3060_v59  ;;  %v3065_v55 = vsub.s32 4294967266, %v3060_v59 }
 0x362   : > { %vm2980_vm5 = vcmp.lt.s32.totalorder %v2979_v52, 2  ;;  %v2982_v21 = vxor.u32 2147483648, %v4247_v22  ;;  %vm3150_vm2 = vc.u32 %v7903_v48, %v7905_v45  ;;  %v3151_v9 = vadd.s32 1, %v7906_v5 }
 0x363   : > { %v2986_v32 = vsel %vm2984_vm14, %v2985_v24, %v4247_v22  ;;  %vm7919_vm3 = vcmp.le.f32.partialorder %v2989_v19, 0.7853982  ;;  %v3063_v26 = vshrl.u32 %v3045_v4, %v3061_v0  ;;  %v3066_v28 = vadd.s32 127, %v3065_v55 }
 0x364   : > { %v2983_v41 = vsel %vm2981_vm12, %v4245_v33, %v2982_v21  ;;  %v3078_v10 = vsel %vm7919_vm3, 0, %v3076_v50  ;;  %v3152_v15 = vsel %vm3150_vm2, %v3151_v9, %v7906_v5  ;;  %v3207_v34 = vadd.s32 1, %v8807_v2 }
 0x365   : > { %v2987_v3 = vsel %vm2980_vm5, %v2983_v41, %v2986_v32  ;;  %v3064_v60 = vor.u32 %v3063_v26, %v3062_v44  ;;  %v3067_v31 = vshll.u32 %v3066_v28, 23  ;;  %v3153_v30 = vadd.s32 %v3152_v15, %v3148_v53 }
 0x366   : > { %v2988_v19 = vsel %vm2977_vm4, nan, %v2987_v3  ;;  %v7931_v47 = vadd.s32 1280, %v8725_v11  ;;  %v3197_v52 = vand.u32 2147483647, %v8808_v13  ;;  %vm3208_vm15 = vcmp.gt.s32.totalorder %v3207_v34, 0 }
 0x367   : > { %v3622_v54 = vmul.f32 %v2988_v19, %v275_v56  ;;  %v3068_v40 = vor.u32 4788187, %v3067_v31  ;;  %v3071_v63 = vcvt.s32.f32 %v3064_v60  ;;  %v3154_v23 = vadd.s32 536870912, %v3153_v30 }
 0x368   : > { %v1720_v61 = vxor.u32 2147483648, %v7563_v51  ;;  %vm1722_vm0 = vcmp.eq.s32.totalorder %v7321_v16, 2  ;;  %v3082_v36 = vadd.s32 3, %v3078_v10  ;;  %v3209_v5 = vsel %vm3208_vm15, %v3207_v34, 0 }
 0x369   : > { %v7939_v8 = vsel %vm1722_vm0, %v1723_v12, %v7563_v51  ;;  %v3685_v4 = vsel %vm7898_vm11, %v6720_v49, %v3622_v54  ;;  %v3069_v33 = vand.u32 2147483647, %v3068_v40  ;;  %v7944_v56 = vshrl.u32 %v3154_v23, 30 }
 0x36a   : > { %v7946_v59 = vor.u32 4788187, %v1805_v42  ;;  %v1809_v50 = vcvt.s32.f32 %v7742_v62  ;;  %3701 = vst [vmem:[%s6994_s29 + $0x48] sm:$0xff] %v3685_v4  ;;  %v3204_v53 = vand.u32 8388607, %v3197_v52  ;;  %v3211_v22 = vand.u32 31, %v3209_v5 }
 0x36b   : > { %v3072_v24 = vmul.f32 %v3071_v63, %v3069_v33  ;;  %v3156_v12 = vshll.u32 %v7944_v56, 30  ;;  %v3654_v0 = vand.u32 1, %v7931_v47  ;;  %v7954_v44 = vshrl.u32 %v3209_v5, 5  ;;  %v8811_v33 = vld [vmem:[#allocation20_spill] sm:$0xff] }
 0x36c   : > { %v7956_v49 = vand.u32 3, %v3082_v36  ;;  %v7959_v27 = vadd.s32 %v7905_v45, %v7903_v48  ;;  %v3212_v42 = vsub.s32 32, %v3211_v22  ;;  %v3214_v55 = vshll.u32 %v8634_v58, %v3211_v22 }
 0x36d   : > { %v3073_v21 = vxor.u32 2147483648, %v3072_v24  ;;  %v7962_v9 = vsub.s32 %v3153_v30, %v3156_v12  ;;  %v3217_v32 = vshll.u32 %v8716_v1, %v3211_v22  ;;  %v3220_v26 = vshll.u32 %v8633_v14, %v3211_v22 }
 0x36e   : > { %v3205_v28 = vor.u32 8388608, %v3204_v53  ;;  %v3215_v41 = vshrl.u32 %v8716_v1, %v3212_v42  ;;  %v3218_v10 = vshrl.u32 %v8633_v14, %v3212_v42  ;;  %v3223_v15 = vshll.u32 %v8715_v43, %v3211_v22 }
 0x36f   : > { %v3074_v48 = vsel %vm2991_vm6, %v3073_v21, %v3072_v24  ;;  %vm3095_vm7 = vcmp.lt.s32.totalorder %v8798_v57, 0  ;;  %v3159_v45 = vsub.s32 0, %v7962_v9  ;;  %v3221_v2 = vshrl.u32 %v8715_v43, %v3212_v42 }
 0x370   : > { %vm3229_vm8 = vcmp.lt.s32.totalorder %v7954_v44, 1  ;;  %v3077_v34 = vsel %vm7919_vm3, %v8795_v17, %v3074_v48  ;;  %v3213_v3 = vshrl.u32 %v8634_v58, %v3212_v42  ;;  %v3216_v60 = vor.u32 %v3215_v41, %v3214_v55 }
 0x371   : > { %v3224_v31 = vshrl.u32 %v8628_v46, %v3212_v42  ;;  %4248 = vcosq.f32 %v3077_v34  ;;  %v3928_v30 = vmin.u32 %v3159_v45, %v7962_v9  ;;  %v3219_v19 = vor.u32 %v3218_v10, %v3217_v32  ;;  %v8812_v10 = vld [vmem:[#allocation40_spill] sm:$0xff] }
 0x372   : > { %v3222_v54 = vor.u32 %v3221_v2, %v3220_v26  ;;  %4250 = vsinq.f32 %v3077_v34  ;;  %v3226_v63 = vshll.u32 %v8628_v46, %v3211_v22  ;;  %v3227_v23 = vshrl.u32 %v8630_v29, %v3212_v42 }
 0x373   : > { %v3225_v40 = vor.u32 %v3224_v31, %v3223_v15  ;;  %vm3088_vm10 = vcmp.eq.s32.totalorder %v7956_v49, 2  ;;  %vm7986_vm1 = vcmp.le.f32.partialorder %v3093_v25, 0.7853982  ;;  %v3161_v36 = vclz %v3928_v30  ;;  %v8015_v30 = vpop.permute.xlu0 %256 }
 0x374   : > { %v3179_v5 = vsub.s32 4, %v7944_v56  ;;  %v7991_v4 = vshll.u32 %v3205_v28, 8  ;;  %v3301_v53 = vand.u32 2147483647, %v8811_v33  ;;  %vm3085_vm4 = vcmp.eq.s32.totalorder %v7956_v49, 0 }
 0x375   : > { %v3228_v22 = vor.u32 %v3227_v23, %v3226_v63  ;;  %vm3230_vm11 = vcmp.lt.s32.totalorder %v7954_v44, 2  ;;  %vm3231_vm12 = vcmp.lt.s32.totalorder %v7954_v44, 3  ;;  %vm3232_vm6 = vcmp.lt.s32.totalorder %v7954_v44, 4 }
 0x376   : > { %vm3084_vm13 = vcmp.lt.s32.totalorder %v7956_v49, 2  ;;  %v3929_v25 = vadd.s32 4294967294, %v3161_v36  ;;  %v3233_v24 = vsel %vm3229_vm8, %v3213_v3, %v3216_v60  ;;  %v3234_v12 = vsel %vm3232_vm6, %v3222_v54, 2102212464 }
 0x377   : > { %v3237_v42 = vsel %vm3229_vm8, %v3216_v60, %v3219_v19  ;;  %vm3081_vm14 = vweird.f32 %v8795_v17  ;;  %v3235_v55 = vsel %vm3231_vm12, %v3219_v19, %v3234_v12  ;;  %v3238_v21 = vsel %vm3232_vm6, %v3225_v40, 920167782 }
 0x378   : > { %v3241_v32 = vsel %vm3229_vm8, %v3219_v19, %v3222_v54  ;;  %v3242_v26 = vsel %vm3232_vm6, %v3228_v22, 1326507024  ;;  %vm3930_vm5 = vcmp.lt.s32.totalorder %v3929_v25, 0  ;;  %v3239_v28 = vsel %vm3231_vm12, %v3222_v54, %v3238_v21 }
 0x379   : > { %v3243_v41 = vsel %vm3231_vm12, %v3225_v40, %v3242_v26  ;;  %v3311_v15 = vadd.s32 1, %v8812_v10  ;;  %v3164_v48 = vsel %vm3930_vm5, 0, %v3929_v25  ;;  %v3180_v45 = vsel %vm3095_vm7, %v3179_v5, %v7944_v56 }
 0x37a   : > { %v3240_v2 = vsel %vm3230_vm11, %v3237_v42, %v3239_v28  ;;  %v3244_v34 = vsel %vm3230_vm11, %v3241_v32, %v3243_v41  ;;  %v3165_v3 = vsub.s32 32, %v3164_v48  ;;  %v3166_v60 = vshll.u32 %v7962_v9, %v3164_v48 }
 0x37b   : > { %v3169_v31 = vsub.s32 4294967266, %v3164_v48  ;;  %v3236_v19 = vsel %vm3230_vm11, %v3233_v24, %v3235_v55  ;;  %v8020_v54 = vmul.u32.u64.low %v7991_v4, %v3244_v34  ;;  %v8021_v40 = vmul.u32.u64.high %v7991_v4, %v3244_v34, %v8020_v54  ;;  %v4249_v23 = vpop.eup %4248 }
 0x37c   : > { %v8024_v56 = vmul.u32.u64.low %v7991_v4, %v3240_v2  ;;  %v8025_v63 = vmul.u32.u64.high %v7991_v4, %v3240_v2, %v8024_v56  ;;  %v3167_v36 = vshrl.u32 %v7959_v27, %v3165_v3  ;;  %vm8031_vm2 = vcmp.eq.s32.totalorder %v3654_v0, 0  ;;  %v4251_v44 = vpop.eup %4250 }
 0x37d   : > { %v3170_v5 = vadd.s32 127, %v3169_v31  ;;  %vm3312_vm3 = vcmp.gt.s32.totalorder %v3311_v15, 0  ;;  %v3089_v22 = vxor.u32 2147483648, %v4249_v23  ;;  %v3182_v25 = vsel %vm7986_vm1, 0, %v3180_v45 }
 0x37e   : > { %v274_v24 = vsel %vm268_vm9, %v6999_v37, %v8015_v30  ;;  %v3313_v12 = vsel %vm3312_vm3, %v3311_v15, 0  ;;  %v3086_v27 = vxor.u32 2147483648, %v4251_v44  ;;  %v3168_v42 = vor.u32 %v3167_v36, %v3166_v60 }
 0x37f   : > { %v3171_v55 = vshll.u32 %v3170_v5, 23  ;;  %v3252_v47 = vmul.u32 %v7991_v4, %v3236_v19  ;;  %v3090_v0 = vsel %vm3088_vm10, %v3089_v22, %v4251_v44  ;;  %vm3254_vm15 = vc.u32 %v8021_v40, %v8024_v56 }
 0x380   : > { %v3255_v21 = vadd.s32 1, %v8025_v63  ;;  %v3308_v32 = vand.u32 8388607, %v3301_v53  ;;  %v3087_v37 = vsel %vm3085_vm4, %v4249_v23, %v3086_v27  ;;  %v3175_v28 = vcvt.s32.f32 %v3168_v42 }
 0x381   : > { %v3172_v26 = vor.u32 4788187, %v3171_v55  ;;  %v3315_v41 = vand.u32 31, %v3313_v12  ;;  %v3091_v4 = vsel %vm3084_vm13, %v3087_v37, %v3090_v0  ;;  %v3186_v10 = vadd.s32 3, %v3182_v25 }
 0x382   : > { %v3256_v15 = vsel %vm3254_vm15, %v3255_v21, %v8025_v63  ;;  %v8054_v48 = vshrl.u32 %v3313_v12, 5  ;;  %v3092_v45 = vsel %vm3081_vm14, nan, %v3091_v4  ;;  %v3309_v31 = vor.u32 8388608, %v3308_v32 }
 0x383   : > { %v3173_v2 = vand.u32 2147483647, %v3172_v26  ;;  %v3257_v34 = vadd.s32 %v3256_v15, %v3252_v47  ;;  %v3316_v3 = vsub.s32 32, %v3315_v41  ;;  %v3623_v60 = vmul.f32 %v3092_v45, %v274_v24 }
 0x384   : > { %v3318_v19 = vshll.u32 %v8634_v58, %v3315_v41  ;;  %v3321_v54 = vshll.u32 %v8716_v1, %v3315_v41  ;;  %v3324_v63 = vshll.u32 %v8633_v14, %v3315_v41  ;;  %v3327_v22 = vshll.u32 %v8715_v43, %v3315_v41 }
 0x385   : > { %v3176_v49 = vmul.f32 %v3175_v28, %v3173_v2  ;;  %v3258_v23 = vadd.s32 536870912, %v3257_v34  ;;  %v3319_v36 = vshrl.u32 %v8716_v1, %v3316_v3  ;;  %v3686_v17 = vsel %vm8031_vm2, %v6723_v35, %v3623_v60 }
 0x386   : > { %v3322_v5 = vshrl.u32 %v8633_v14, %v3316_v3  ;;  %v3325_v44 = vshrl.u32 %v8715_v43, %v3316_v3  ;;  %3702 = vst [vmem:[%s6994_s29 + $0x50] sm:$0xff] %v3686_v17  ;;  %v3328_v12 = vshrl.u32 %v8628_v46, %v3316_v3  ;;  %vm3333_vm0 = vcmp.lt.s32.totalorder %v8054_v48, 1 }
 0x387   : > { %v3177_v25 = vxor.u32 2147483648, %v3176_v49  ;;  %v3259_v24 = vshrl.u32 %v3258_v23, 30  ;;  %vm1719_vm8 = vcmp.eq.s32.totalorder %v7321_v16, 0  ;;  %v3320_v27 = vor.u32 %v3319_v36, %v3318_v19 }
 0x388   : > { %v3323_v42 = vor.u32 %v3322_v5, %v3321_v54  ;;  %v3330_v9 = vshll.u32 %v8628_v46, %v3315_v41  ;;  %v3331_v35 = vshrl.u32 %v8630_v29, %v3316_v3  ;;  %v3317_v0 = vshrl.u32 %v8634_v58, %v3316_v3 }
 0x389   : > { %v3178_v55 = vsel %vm3095_vm7, %v3177_v25, %v3176_v49  ;;  %v3260_v47 = vshll.u32 %v3259_v24, 30  ;;  %v3329_v21 = vor.u32 %v3328_v12, %v3327_v22  ;;  %v3326_v37 = vor.u32 %v3325_v44, %v3324_v63 }
 0x38a   : > { %v3181_v32 = vsel %vm7986_vm1, %v8798_v57, %v3178_v55  ;;  %v3332_v26 = vor.u32 %v3331_v35, %v3330_v9  ;;  %vm3336_vm10 = vcmp.lt.s32.totalorder %v8054_v48, 4  ;;  %vm3335_vm4 = vcmp.lt.s32.totalorder %v8054_v48, 3 }
 0x38b   : > { %4252 = vcosq.f32 %v3181_v32  ;;  %v8081_v28 = vsub.s32 %v3257_v34, %v3260_v47  ;;  %v3349_v41 = vshll.u32 %v3309_v31, 8  ;;  %vm3334_vm7 = vcmp.lt.s32.totalorder %v8054_v48, 2 }
 0x38c   : > { %4254 = vsinq.f32 %v3181_v32  ;;  %v3338_v4 = vsel %vm3336_vm10, %v3326_v37, 2102212464  ;;  %v3341_v18 = vsel %vm3333_vm0, %v3320_v27, %v3323_v42  ;;  %v1807_v15 = vand.u32 2147483647, %v7946_v59 }
 0x38d   : > { %v3639_v45 = vadd.s32 1408, %v8725_v11  ;;  %v3263_v2 = vsub.s32 0, %v8081_v28  ;;  %v3342_v34 = vsel %vm3336_vm10, %v3329_v21, 920167782  ;;  %v3337_v3 = vsel %vm3333_vm0, %v3317_v0, %v3320_v27  ;;  %v8817_v0 = vld [vmem:[#allocation37_spill] sm:$0xff] }
 0x38e   : > { %v3343_v60 = vsel %vm3335_vm4, %v3326_v37, %v3342_v34  ;;  %v3345_v31 = vsel %vm3333_vm0, %v3323_v42, %v3326_v37  ;;  %v3346_v19 = vsel %vm3336_vm10, %v3332_v26, 1326507024  ;;  %v3339_v54 = vsel %vm3335_vm4, %v3323_v42, %v3338_v4 }
 0x38f   : > { %v3932_v59 = vmin.u32 %v3263_v2, %v8081_v28  ;;  %v3344_v49 = vsel %vm3334_vm7, %v3341_v18, %v3343_v60  ;;  %v3347_v23 = vsel %vm3335_vm4, %v3329_v21, %v3346_v19  ;;  %v3187_v36 = vand.u32 3, %v3186_v10 }
 0x390   : > { %v3348_v63 = vsel %vm3334_vm7, %v3345_v31, %v3347_v23  ;;  %v8111_v17 = vmul.u32.u64.low %v3349_v41, %v3344_v49  ;;  %v8112_v5 = vmul.u32.u64.high %v3349_v41, %v3344_v49, %v8111_v17  ;;  %v1721_v44 = vsel %vm1719_vm8, %v7367_v6, %v1720_v61 }
 0x391   : > { %v8122_v22 = vmul.f32 %v1809_v50, %v1807_v15  ;;  %v3265_v25 = vclz %v3932_v59  ;;  %v3283_v12 = vsub.s32 4, %v3259_v24  ;;  %vm3185_vm1 = vweird.f32 %v8798_v57 }
 0x392   : > { %v3340_v10 = vsel %vm3334_vm7, %v3337_v3, %v3339_v54  ;;  %v8127_v27 = vmul.u32.u64.low %v3349_v41, %v3348_v63  ;;  %v8128_v42 = vmul.u32.u64.high %v3349_v41, %v3348_v63, %v8127_v27  ;;  %v3655_v9 = vand.u32 1, %v3639_v45  ;;  %v8820_v3 = vld [vmem:[#allocation23_spill] sm:$0xff]  ;;  %v4292_v54 = vld [vmem:[%s4547_s28 + $0x60] sm:$0xff] }
 0x393   : > { %vm8132_vm11 = vcmp.le.f32.partialorder %v3197_v52, 0.7853982  ;;  %vm3199_vm12 = vcmp.lt.s32.totalorder %v8808_v13, 0  ;;  %v3933_v6 = vadd.s32 4294967294, %v3265_v25  ;;  %vm3188_vm6 = vcmp.lt.s32.totalorder %v3187_v36, 2 }
 0x394   : > { %vm3189_vm13 = vcmp.eq.s32.totalorder %v3187_v36, 0  ;;  %vm3192_vm14 = vcmp.eq.s32.totalorder %v3187_v36, 2  ;;  %v3359_v62 = vadd.s32 1, %v8112_v5  ;;  %v3253_v50 = vadd.s32 %v8024_v56, %v8021_v40 }
 0x395   : > { %v4253_v61 = vpop.eup %4252  ;;  %vm3934_vm5 = vcmp.lt.s32.totalorder %v3933_v6, 0  ;;  %v3284_v48 = vsel %vm3199_vm12, %v3283_v12, %v3259_v24  ;;  %v3356_v52 = vmul.u32 %v3349_v41, %v3340_v10  ;;  %vm3358_vm2 = vc.u32 %v8128_v42, %v8111_v17 }
 0x396   : > { %v4255_v35 = vpop.eup %4254  ;;  %v3193_v55 = vxor.u32 2147483648, %v4253_v61  ;;  %v3268_v47 = vsel %vm3934_vm5, 0, %v3933_v6  ;;  %v3415_v21 = vadd.s32 1, %v8817_v0  ;;  %v273_v56 = vsel %vm268_vm9, %v8015_v30, %v7037_v20 }
 0x397   : > { %v3190_v32 = vxor.u32 2147483648, %v4255_v35  ;;  %v3269_v37 = vsub.s32 32, %v3268_v47  ;;  %v3270_v26 = vshll.u32 %v8081_v28, %v3268_v47  ;;  %v3273_v4 = vsub.s32 4294967266, %v3268_v47 }
 0x398   : > { %v3194_v40 = vsel %vm3192_vm14, %v3193_v55, %v4255_v35  ;;  %v3286_v24 = vsel %vm8132_vm11, 0, %v3284_v48  ;;  %v3360_v41 = vsel %vm3358_vm2, %v3359_v62, %v8112_v5  ;;  %vm8156_vm3 = vcmp.eq.s32.totalorder %v3655_v9, 0 }
 0x399   : > { %v3191_v18 = vsel %vm3189_vm13, %v4253_v61, %v3190_v32  ;;  %v3271_v15 = vshrl.u32 %v3253_v50, %v3269_v37  ;;  %v3274_v45 = vadd.s32 127, %v3273_v4  ;;  %v3361_v2 = vadd.s32 %v3360_v41, %v3356_v52 }
 0x39a   : > { %v3195_v28 = vsel %vm3188_vm6, %v3191_v18, %v3194_v40  ;;  %v3405_v60 = vand.u32 2147483647, %v8820_v3  ;;  %vm3416_vm15 = vcmp.gt.s32.totalorder %v3415_v21, 0  ;;  %v8165_v49 = vmul.f32 %v4292_v54, %v7310_v39 }
 0x39b   : > { %v3196_v30 = vsel %vm3185_vm1, nan, %v3195_v28  ;;  %v3272_v31 = vor.u32 %v3271_v15, %v3270_v26  ;;  %v3275_v19 = vshll.u32 %v3274_v45, 23  ;;  %v3362_v59 = vadd.s32 536870912, %v3361_v2 }
 0x39c   : > { %v3624_v23 = vmul.f32 %v3196_v30, %v273_v56  ;;  %v3290_v36 = vadd.s32 3, %v3286_v24  ;;  %v3417_v63 = vsel %vm3416_vm15, %v3415_v21, 0  ;;  %vm1718_vm0 = vcmp.lt.s32.totalorder %v7321_v16, 2 }
 0x39d   : > { %v3276_v5 = vor.u32 4788187, %v3275_v19  ;;  %v3279_v25 = vcvt.s32.f32 %v3272_v31  ;;  %v8168_v12 = vshrl.u32 %v3362_v59, 30  ;;  %v8171_v57 = vsel %vm1718_vm0, %v1721_v44, %v7939_v8 }
 0x39e   : > { %v1811_v10 = vxor.u32 2147483648, %v8122_v22  ;;  %v3687_v27 = vsel %vm8156_vm3, %v6746_v38, %v3624_v23  ;;  %v3419_v39 = vand.u32 31, %v3417_v63  ;;  %v8180_v16 = vadd.s32 1536, %v8725_v11 }
 0x39f   : > { %3703 = vst [vmem:[%s6994_s29 + $0x58] sm:$0xff] %v3687_v27  ;;  %v3277_v9 = vand.u32 2147483647, %v3276_v5  ;;  %v3364_v6 = vshll.u32 %v8168_v12, 30  ;;  %v3412_v62 = vand.u32 8388607, %v3405_v60  ;;  %v8188_v8 = vadd.s32 %v8111_v17, %v8128_v42 }
 0x3a0   : > { %v8184_v61 = vand.u32 3, %v3290_v36  ;;  %v3418_v44 = vshrl.u32 %v3417_v63, 5  ;;  %v3420_v50 = vsub.s32 32, %v3419_v39  ;;  %v3422_v52 = vshll.u32 %v8634_v58, %v3419_v39 }
 0x3a1   : > { %v3280_v38 = vmul.f32 %v3279_v25, %v3277_v9  ;;  %v8190_v48 = vsub.s32 %v3361_v2, %v3364_v6  ;;  %v3425_v35 = vshll.u32 %v8716_v1, %v3419_v39  ;;  %v3428_v0 = vshll.u32 %v8633_v14, %v3419_v39 }
 0x3a2   : > { %v3423_v55 = vshrl.u32 %v8716_v1, %v3420_v50  ;;  %v3426_v47 = vshrl.u32 %v8633_v14, %v3420_v50  ;;  %v3431_v21 = vshll.u32 %v8715_v43, %v3419_v39  ;;  %v3413_v42 = vor.u32 8388608, %v3412_v62 }
 0x3a3   : > { %v3281_v32 = vxor.u32 2147483648, %v3280_v38  ;;  %v3367_v17 = vsub.s32 0, %v8190_v48  ;;  %v3429_v37 = vshrl.u32 %v8715_v43, %v3420_v50  ;;  %v3421_v26 = vshrl.u32 %v8634_v58, %v3420_v50 }
 0x3a4   : > { %v3432_v4 = vshrl.u32 %v8628_v46, %v3420_v50  ;;  %v3434_v40 = vshll.u32 %v8628_v46, %v3419_v39  ;;  %vm3437_vm8 = vcmp.lt.s32.totalorder %v3418_v44, 1  ;;  %v3424_v41 = vor.u32 %v3423_v55, %v3422_v52  ;;  %v8230_v55 = vpop.permute.xlu0 %260 }
 0x3a5   : > { %v3282_v56 = vsel %vm3199_vm12, %v3281_v32, %v3280_v38  ;;  %v3936_v24 = vmin.u32 %v3367_v17, %v8190_v48  ;;  %v3427_v18 = vor.u32 %v3426_v47, %v3425_v35  ;;  %vm3303_vm10 = vcmp.lt.s32.totalorder %v8811_v33, 0 }
 0x3a6   : > { %v3285_v15 = vsel %vm8132_vm11, %v8808_v13, %v3282_v56  ;;  %v3430_v45 = vor.u32 %v3429_v37, %v3428_v0  ;;  %v3433_v2 = vor.u32 %v3432_v4, %v3431_v21  ;;  %v3435_v28 = vshrl.u32 %v8630_v29, %v3420_v50  ;;  %v8823_v37 = vld [vmem:[#allocation42_spill] sm:$0xff] }
 0x3a7   : > { %4256 = vcosq.f32 %v3285_v15  ;;  %v3369_v34 = vclz %v3936_v24  ;;  %v3387_v30 = vsub.s32 4, %v8168_v12  ;;  %v8212_v31 = vshll.u32 %v3413_v42, 8 }
 0x3a8   : > { %4258 = vsinq.f32 %v3285_v15  ;;  %v3436_v19 = vor.u32 %v3435_v28, %v3434_v40  ;;  %vm3438_vm4 = vcmp.lt.s32.totalorder %v3418_v44, 2  ;;  %vm3439_vm7 = vcmp.lt.s32.totalorder %v3418_v44, 3  ;;  %v8826_v40 = vld [vmem:[#allocation22_spill] sm:$0xff] }
 0x3a9   : > { %vm8216_vm1 = vcmp.le.f32.partialorder %v3301_v53, 0.7853982  ;;  %v3937_v59 = vadd.s32 4294967294, %v3369_v34  ;;  %vm3440_vm11 = vcmp.lt.s32.totalorder %v3418_v44, 4  ;;  %v3441_v54 = vsel %vm3437_vm8, %v3421_v26, %v3424_v41 }
 0x3aa   : > { %v3445_v23 = vsel %vm3437_vm8, %v3424_v41, %v3427_v18  ;;  %vm3293_vm12 = vcmp.eq.s32.totalorder %v8184_v61, 0  ;;  %v3442_v36 = vsel %vm3440_vm11, %v3430_v45, 2102212464  ;;  %v3446_v63 = vsel %vm3440_vm11, %v3433_v2, 920167782 }
 0x3ab   : > { %v3449_v5 = vsel %vm3437_vm8, %v3427_v18, %v3430_v45  ;;  %v3450_v25 = vsel %vm3440_vm11, %v3436_v19, 1326507024  ;;  %vm3292_vm6 = vcmp.lt.s32.totalorder %v8184_v61, 2  ;;  %vm3938_vm13 = vcmp.lt.s32.totalorder %v3937_v59, 0 }
 0x3ac   : > { %v3443_v53 = vsel %vm3439_vm7, %v3427_v18, %v3442_v36  ;;  %v3447_v27 = vsel %vm3439_vm7, %v3430_v45, %v3446_v63  ;;  %v3451_v39 = vsel %vm3439_vm7, %v3433_v2, %v3450_v25  ;;  %vm3289_vm14 = vweird.f32 %v8808_v13 }
 0x3ad   : > { %v3372_v9 = vsel %vm3938_vm13, 0, %v3937_v59  ;;  %v3656_v6 = vand.u32 1, %v8180_v16  ;;  %v3448_v62 = vsel %vm3438_vm4, %v3445_v23, %v3447_v27  ;;  %v3452_v50 = vsel %vm3438_vm4, %v3449_v5, %v3451_v39  ;;  %v8827_v23 = vld [vmem:[#allocation43_spill] sm:$0xff] }
 0x3ae   : > { %v3373_v38 = vsub.s32 32, %v3372_v9  ;;  %v3374_v52 = vshll.u32 %v8190_v48, %v3372_v9  ;;  %v3377_v35 = vsub.s32 4294967266, %v3372_v9  ;;  %v3444_v47 = vsel %vm3438_vm4, %v3441_v54, %v3443_v53 }
 0x3af   : > { %v8234_v0 = vmul.u32.u64.low %v8212_v31, %v3452_v50  ;;  %v8235_v21 = vmul.u32.u64.high %v8212_v31, %v3452_v50, %v8234_v0  ;;  %v8238_v32 = vmul.u32.u64.low %v8212_v31, %v3448_v62  ;;  %v8239_v17 = vmul.u32.u64.high %v8212_v31, %v3448_v62, %v8238_v32 }
 0x3b0   : > { %v3375_v16 = vshrl.u32 %v8188_v8, %v3373_v38  ;;  %v3378_v42 = vadd.s32 127, %v3377_v35  ;;  %v3388_v48 = vsel %vm3303_vm10, %v3387_v30, %v8168_v12  ;;  %v3519_v26 = vadd.s32 1, %v8823_v37 }
 0x3b1   : > { %vm3296_vm5 = vcmp.eq.s32.totalorder %v8184_v61, 2  ;;  %vm8248_vm2 = vcmp.eq.s32.totalorder %v3656_v6, 0  ;;  %v272_v4 = vsel %vm268_vm9, %v7037_v20, %v8230_v55  ;;  %v3509_v8 = vand.u32 2147483647, %v8826_v40  ;;  %v4257_v56 = vpop.eup %4256 }
 0x3b2   : > { %v3376_v24 = vor.u32 %v3375_v16, %v3374_v52  ;;  %v3379_v41 = vshll.u32 %v3378_v42, 23  ;;  %v3460_v12 = vmul.u32 %v8212_v31, %v3444_v47  ;;  %vm3520_vm3 = vcmp.gt.s32.totalorder %v3519_v26, 0  ;;  %v4259_v18 = vpop.eup %4258 }
 0x3b3   : > { %v3297_v15 = vxor.u32 2147483648, %v4257_v56  ;;  %v3390_v45 = vsel %vm8216_vm1, 0, %v3388_v48  ;;  %vm3462_vm15 = vc.u32 %v8235_v21, %v8238_v32  ;;  %v3463_v2 = vadd.s32 1, %v8239_v17 }
 0x3b4   : > { %v3294_v28 = vxor.u32 2147483648, %v4259_v18  ;;  %v3380_v20 = vor.u32 4788187, %v3379_v41  ;;  %v3383_v34 = vcvt.s32.f32 %v3376_v24  ;;  %v3521_v30 = vsel %vm3520_vm3, %v3519_v26, 0 }
 0x3b5   : > { %v3298_v19 = vsel %vm3296_vm5, %v3297_v15, %v4259_v18  ;;  %v3464_v31 = vsel %vm3462_vm15, %v3463_v2, %v8239_v17  ;;  %v3516_v59 = vand.u32 8388607, %v3509_v8  ;;  %v3523_v54 = vand.u32 31, %v3521_v30 }
 0x3b6   : > { %vm1729_vm0 = vcmp.lt.s32.totalorder %v8827_v23, 0  ;;  %v3295_v36 = vsel %vm3293_vm12, %v4257_v56, %v3294_v28  ;;  %v3381_v63 = vand.u32 2147483647, %v3380_v20  ;;  %v3394_v5 = vadd.s32 3, %v3390_v45 }
 0x3b7   : > { %v3465_v25 = vadd.s32 %v3464_v31, %v3460_v12  ;;  %v3299_v53 = vsel %vm3292_vm6, %v3295_v36, %v3298_v19  ;;  %v8273_v27 = vshrl.u32 %v3521_v30, 5  ;;  %v3524_v39 = vsub.s32 32, %v3523_v54 }
 0x3b8   : > { %v3526_v9 = vshll.u32 %v8634_v58, %v3523_v54  ;;  %v3300_v6 = vsel %vm3289_vm14, nan, %v3299_v53  ;;  %v3384_v62 = vmul.f32 %v3383_v34, %v3381_v63  ;;  %v3529_v38 = vshll.u32 %v8716_v1, %v3523_v54  ;;  %v8831_v63 = vld [vmem:[#allocation30_spill] sm:$0xff] }
 0x3b9   : > { %v3466_v50 = vadd.s32 536870912, %v3465_v25  ;;  %v3625_v52 = vmul.f32 %v3300_v6, %v272_v4  ;;  %v3527_v35 = vshrl.u32 %v8716_v1, %v3524_v39  ;;  %v3530_v47 = vshrl.u32 %v8633_v14, %v3524_v39 }
 0x3ba   : > { %v3532_v61 = vshll.u32 %v8633_v14, %v3523_v54  ;;  %v3385_v0 = vxor.u32 2147483648, %v3384_v62  ;;  %v3533_v16 = vshrl.u32 %v8715_v43, %v3524_v39  ;;  %v3535_v13 = vshll.u32 %v8715_v43, %v3523_v54 }
 0x3bb   : > { %v8282_v17 = vshrl.u32 %v3466_v50, 30  ;;  %v3688_v42 = vsel %vm8248_vm2, %v8165_v49, %v3625_v52  ;;  %v3517_v48 = vor.u32 8388608, %v3516_v59  ;;  %v3525_v37 = vshrl.u32 %v8634_v58, %v3524_v39  ;;  %v8828_v59 = vld [vmem:[#allocation49_spill] sm:$0xff] }
 0x3bc   : > { %v3536_v1 = vshrl.u32 %v8628_v46, %v3524_v39  ;;  %vm1716_vm8 = vweird.f32 %v8726_v7  ;;  %v3386_v14 = vsel %vm3303_vm10, %v3385_v0, %v3384_v62  ;;  %3704 = vst [vmem:[%s6994_s29 + $0x60] sm:$0xff] %v3688_v42  ;;  %v3528_v4 = vor.u32 %v3527_v35, %v3526_v9 }
 0x3bd   : > { %v3468_v26 = vshll.u32 %v8282_v17, 30  ;;  %v3531_v56 = vor.u32 %v3530_v47, %v3529_v38  ;;  %v3389_v43 = vsel %vm8216_vm1, %v8811_v33, %v3386_v14  ;;  %v3538_v44 = vshll.u32 %v8628_v46, %v3523_v54  ;;  %v8829_v54 = vld [vmem:[#allocation47_spill] sm:$0xff] }
 0x3be   : > { %v3537_v49 = vor.u32 %v3536_v1, %v3535_v13  ;;  %v3539_v58 = vshrl.u32 %v8630_v29, %v3524_v39  ;;  %4260 = vcosq.f32 %v3389_v43  ;;  %v3534_v41 = vor.u32 %v3533_v16, %v3532_v61 }
 0x3bf   : > { %v8301_v24 = vsub.s32 %v3465_v25, %v3468_v26  ;;  %vm3541_vm10 = vcmp.lt.s32.totalorder %v8273_v27, 1  ;;  %v1812_v12 = vsel %vm1729_vm0, %v1811_v10, %v8122_v22  ;;  %4262 = vsinq.f32 %v3389_v43  ;;  %v8832_v25 = vld [vmem:[#allocation11_spill] sm:$0xff] }
 0x3c0   : > { %v3641_v51 = vadd.s32 1664, %v8725_v11  ;;  %v3540_v18 = vor.u32 %v3539_v58, %v3538_v44  ;;  %vm3542_vm4 = vcmp.lt.s32.totalorder %v8273_v27, 2  ;;  %vm3543_vm7 = vcmp.lt.s32.totalorder %v8273_v27, 3  ;;  %v8837_v58 = vld [vmem:[#allocation28_spill] sm:$0xff] }
 0x3c1   : > { %v3471_v46 = vsub.s32 0, %v8301_v24  ;;  %vm3544_vm1 = vcmp.lt.s32.totalorder %v8273_v27, 4  ;;  %v3549_v15 = vsel %vm3541_vm10, %v3528_v4, %v3531_v56  ;;  %v3557_v2 = vshll.u32 %v3517_v48, 8 }
 0x3c2   : > { %v3546_v29 = vsel %vm3544_vm1, %v3534_v41, 2102212464  ;;  %v3550_v45 = vsel %vm3544_vm1, %v3537_v49, 920167782  ;;  %v3395_v28 = vand.u32 3, %v3394_v5  ;;  %v3545_v10 = vsel %vm3541_vm10, %v3525_v37, %v3528_v4 }
 0x3c3   : > { %v3940_v22 = vmin.u32 %v3471_v46, %v8301_v24  ;;  %v3551_v20 = vsel %vm3543_vm7, %v3534_v41, %v3550_v45  ;;  %v3547_v34 = vsel %vm3543_vm7, %v3531_v56, %v3546_v29  ;;  %v3553_v19 = vsel %vm3541_vm10, %v3531_v56, %v3534_v41 }
 0x3c4   : > { %v3552_v30 = vsel %vm3542_vm4, %v3549_v15, %v3551_v20  ;;  %v3554_v31 = vsel %vm3544_vm1, %v3540_v18, 1326507024  ;;  %v8830_v36 = vshll.u32 %v8828_v59, %v8829_v54  ;;  %v8833_v53 = vshll.u32 %v8832_v25, 23 }
 0x3c5   : > { %v8834_v9 = vand.u32 2147483647, %v8827_v23  ;;  %v3473_v62 = vclz %v3940_v22  ;;  %v1726_v50 = vsel %vm1716_vm8, nan, %v8171_v57  ;;  %v3555_v38 = vsel %vm3543_vm7, %v3537_v49, %v3554_v31 }
 0x3c6   : > { %v1905_v5 = vor.u32 %v8831_v63, %v8830_v36  ;;  %v1909_v39 = vor.u32 4788187, %v8833_v53  ;;  %v8344_v52 = vmul.u32.u64.low %v3557_v2, %v3552_v30  ;;  %v8345_v35 = vmul.u32.u64.high %v3557_v2, %v3552_v30, %v8344_v52  ;;  %v8838_v30 = vld [vmem:[#allocation48_spill] sm:$0xff] }
 0x3c7   : > { %vm8335_vm11 = vcmp.le.f32.partialorder %v8834_v9, 0.7853982  ;;  %v3941_v61 = vadd.s32 4294967294, %v3473_v62  ;;  %v3548_v0 = vsel %vm3542_vm4, %v3545_v10, %v3547_v34  ;;  %v3556_v16 = vsel %vm3542_vm4, %v3553_v19, %v3555_v38 }
 0x3c8   : > { %v1815_v47 = vsel %vm8335_vm11, %v8827_v23, %v1812_v12  ;;  %vm3396_vm12 = vcmp.lt.s32.totalorder %v3395_v28, 2  ;;  %v3657_v7 = vand.u32 1, %v3641_v51  ;;  %v4261_v42 = vpop.eup %4260  ;;  %vm3397_vm6 = vcmp.eq.s32.totalorder %v3395_v28, 0 }
 0x3c9   : > { %v8355_v57 = vmul.u32.u64.low %v3557_v2, %v3556_v16  ;;  %v8356_v13 = vmul.u32.u64.high %v3557_v2, %v3556_v16, %v8355_v57  ;;  %vm3400_vm13 = vcmp.eq.s32.totalorder %v3395_v28, 2  ;;  %v3461_v48 = vadd.s32 %v8238_v32, %v8235_v21  ;;  %v4263_v37 = vpop.eup %4262 }
 0x3ca   : > { %vm3942_vm14 = vcmp.lt.s32.totalorder %v3941_v61, 0  ;;  %v3401_v1 = vxor.u32 2147483648, %v4261_v42  ;;  %v3564_v26 = vmul.u32 %v3557_v2, %v3548_v0  ;;  %v3567_v27 = vadd.s32 1, %v8345_v35  ;;  %v8841_v57 = vld [vmem:[#allocation25_spill] sm:$0xff] }
 0x3cb   : > { %v3476_v14 = vsel %vm3942_vm14, 0, %v3941_v61  ;;  %v3398_v4 = vxor.u32 2147483648, %v4263_v37  ;;  %vm3393_vm5 = vweird.f32 %v8811_v33  ;;  %v271_v21 = vsel %vm268_vm9, %v8230_v55, %v8837_v58 }
 0x3cc   : > { %v3477_v56 = vsub.s32 32, %v3476_v14  ;;  %v3478_v43 = vshll.u32 %v8301_v24, %v3476_v14  ;;  %v3481_v49 = vsub.s32 4294967266, %v3476_v14  ;;  %v3402_v44 = vsel %vm3400_vm13, %v3401_v1, %v4263_v37  ;;  %v4293_v24 = vld [vmem:[%s4547_s28 + $0x68] sm:$0xff] }
 0x3cd   : > { %vm3566_vm2 = vc.u32 %v8356_v13, %v8344_v52  ;;  %v3399_v32 = vsel %vm3397_vm6, %v4261_v42, %v3398_v4  ;;  %4264 = vcosq.f32 %v1815_v47  ;;  %v1946_v18 = vmul.f32 %v4293_v24, %v1726_v50 }
 0x3ce   : > { %v3479_v41 = vshrl.u32 %v3461_v48, %v3477_v56  ;;  %v3482_v12 = vadd.s32 127, %v3481_v49  ;;  %v3568_v51 = vsel %vm3566_vm2, %v3567_v27, %v8345_v35  ;;  %v3403_v33 = vsel %vm3396_vm12, %v3399_v32, %v3402_v44 }
 0x3cf   : > { %v3569_v46 = vadd.s32 %v3568_v51, %v3564_v26  ;;  %v3404_v29 = vsel %vm3393_vm5, nan, %v3403_v33  ;;  %vm3673_vm3 = vcmp.eq.s32.totalorder %v3657_v7, 0  ;;  %v1910_v45 = vand.u32 2147483647, %v1909_v39 }
 0x3d0   : > { %v3480_v15 = vor.u32 %v3479_v41, %v3478_v43  ;;  %v3483_v55 = vshll.u32 %v3482_v12, 23  ;;  %4266 = vsinq.f32 %v1815_v47  ;;  %v3626_v2 = vmul.f32 %v3404_v29, %v271_v21 }
 0x3d1   : > { %v3570_v22 = vadd.s32 536870912, %v3569_v46  ;;  %v1912_v34 = vcvt.s32.f32 %v1905_v5  ;;  %v1813_v19 = vsub.s32 4, %v8838_v30  ;;  %v3491_v54 = vsub.s32 4, %v8282_v17 }
 0x3d2   : > { %v3484_v10 = vor.u32 4788187, %v3483_v55  ;;  %v3487_v20 = vcvt.s32.f32 %v3480_v15  ;;  %v3689_v31 = vsel %vm3673_vm3, %v1946_v18, %v3626_v2  ;;  %vm3407_vm15 = vcmp.lt.s32.totalorder %v8820_v3, 0  ;;  %v265_v55 = vpop.permute.xlu0 %264 }
 0x3d3   : > { %v8374_v59 = vshrl.u32 %v3570_v22, 30  ;;  %3705 = vst [vmem:[%s6994_s29 + $0x68] sm:$0xff] %v3689_v31  ;;  %v1913_v36 = vmul.f32 %v1912_v34, %v1910_v45  ;;  %v1814_v53 = vsel %vm1729_vm0, %v1813_v19, %v8838_v30  ;;  %vm8385_vm8 = vcmp.le.f32.partialorder %v3405_v60, 0.7853982  ;;  %v8845_v30 = vld [vmem:[#allocation44_spill] sm:$0xff] }
 0x3d4   : > { %v3485_v28 = vand.u32 2147483647, %v3484_v10  ;;  %v3492_v62 = vsel %vm3407_vm15, %v3491_v54, %v8282_v17  ;;  %v1816_v47 = vsel %vm8335_vm11, 0, %v1814_v53  ;;  %vm1832_vm0 = vcmp.lt.s32.totalorder %v8841_v57, 0 }
 0x3d5   : > { %v3572_v63 = vshll.u32 %v8374_v59, 30  ;;  %v1914_v38 = vxor.u32 2147483648, %v1913_v36  ;;  %v3494_v60 = vsel %vm8385_vm8, 0, %v3492_v62  ;;  %v1820_v42 = vand.u32 3, %v1816_v47 }
 0x3d6   : > { %v3488_v25 = vmul.f32 %v3487_v20, %v3485_v28  ;;  %v3498_v1 = vadd.s32 3, %v3494_v60  ;;  %v8842_v14 = vand.u32 2147483647, %v8841_v57  ;;  %v3565_v56 = vadd.s32 %v8344_v52, %v8356_v13  ;;  %v4294_v28 = vld [vmem:[%s4547_s28 + $0x70] sm:$0xff] }
 0x3d7   : > { %v3573_v5 = vsub.s32 %v3569_v46, %v3572_v63  ;;  %v4265_v50 = vpop.eup %4264  ;;  %v1915_v17 = vsel %vm1832_vm0, %v1914_v38, %v1913_v36  ;;  %vm1822_vm4 = vcmp.eq.s32.totalorder %v1820_v42, 0  ;;  %vm1825_vm7 = vcmp.eq.s32.totalorder %v1820_v42, 2 }
 0x3d8   : > { %v3489_v9 = vxor.u32 2147483648, %v3488_v25  ;;  %v1826_v37 = vxor.u32 2147483648, %v4265_v50  ;;  %vm8402_vm10 = vcmp.le.f32.partialorder %v8842_v14, 0.7853982  ;;  %v3499_v44 = vand.u32 3, %v3498_v1 }
 0x3d9   : > { %v3575_v35 = vsub.s32 0, %v3573_v5  ;;  %v1918_v4 = vsel %vm8402_vm10, %v8841_v57, %v1915_v17  ;;  %vm1821_vm11 = vcmp.lt.s32.totalorder %v1820_v42, 2  ;;  %v3642_v51 = vadd.s32 1792, %v8725_v11 }
 0x3da   : > { %v3490_v61 = vsel %vm3407_vm15, %v3489_v9, %v3488_v25  ;;  %v4267_v0 = vpop.eup %4266  ;;  %vm1819_vm12 = vweird.f32 %v8827_v23  ;;  %vm3504_vm6 = vcmp.eq.s32.totalorder %v3499_v44, 2  ;;  %vm3501_vm13 = vcmp.eq.s32.totalorder %v3499_v44, 0 }
 0x3db   : > { %v3493_v16 = vsel %vm8385_vm8, %v8820_v3, %v3490_v61  ;;  %v3944_v7 = vmin.u32 %v3575_v35, %v3573_v5  ;;  %v1823_v48 = vxor.u32 2147483648, %v4267_v0  ;;  %v1827_v49 = vsel %vm1825_vm7, %v1826_v37, %v4267_v0 }
 0x3dc   : > { %4268 = vcosq.f32 %v3493_v16  ;;  %vm3500_vm14 = vcmp.lt.s32.totalorder %v3499_v44, 2  ;;  %v3658_v22 = vand.u32 1, %v3642_v51  ;;  %vm3497_vm5 = vweird.f32 %v8820_v3 }
 0x3dd   : > { %4270 = vsinq.f32 %v3493_v16  ;;  %v3577_v6 = vclz %v3944_v7  ;;  %v1824_v43 = vsel %vm1822_vm4, %v4265_v50, %v1823_v48  ;;  %v1916_v19 = vsub.s32 4, %v8845_v30 }
 0x3de   : > { %4272 = vcosq.f32 %v1918_v4  ;;  %v1828_v24 = vsel %vm1821_vm11, %v1824_v43, %v1827_v49  ;;  %v270_v31 = vsel %vm268_vm9, %v8837_v58, %v265_v55  ;;  %v3595_v25 = vsub.s32 4, %v8374_v59  ;;  %v8846_v49 = vld [vmem:[#allocation9_spill] sm:$0xff] }
 0x3df   : > { %v3945_v27 = vadd.s32 4294967294, %v3577_v6  ;;  %4274 = vsinq.f32 %v1918_v4  ;;  %v1829_v45 = vsel %vm1819_vm12, nan, %v1828_v24  ;;  %vm3674_vm2 = vcmp.eq.s32.totalorder %v3658_v22, 0 }
 0x3e0   : > { %v1947_v54 = vmul.f32 %v4294_v28, %v1829_v45  ;;  %v1917_v39 = vsel %vm1832_vm0, %v1916_v19, %v8845_v30  ;;  %vm3511_vm3 = vcmp.lt.s32.totalorder %v8826_v40, 0  ;;  %vm3510_vm15 = vcmp.le.f32.partialorder %v3509_v8, 0.7853982 }
 0x3e1   : > { %vm3946_vm1 = vcmp.lt.s32.totalorder %v3945_v27, 0  ;;  %v3596_v62 = vsel %vm3511_vm3, %v3595_v25, %v8374_v59  ;;  %v1919_v35 = vsel %vm8402_vm10, 0, %v1917_v39  ;;  %v3643_v6 = vadd.s32 1920, %v8725_v11 }
 0x3e2   : > { %v3580_v21 = vsel %vm3946_vm1, 0, %v3945_v27  ;;  %v3598_v0 = vsel %vm3510_vm15, 0, %v3596_v62  ;;  %v1923_v16 = vand.u32 3, %v1919_v35  ;;  %vm1922_vm7 = vweird.f32 %v8841_v57 }
 0x3e3   : > { %v3581_v32 = vsub.s32 32, %v3580_v21  ;;  %v3582_v41 = vshll.u32 %v3573_v5, %v3580_v21  ;;  %v3585_v12 = vsub.s32 4294967266, %v3580_v21  ;;  %v3602_v17 = vadd.s32 3, %v3598_v0  ;;  %v4295_v21 = vld [vmem:[%s4547_s28 + $0x78] sm:$0xff] }
 0x3e4   : > { %vm1925_vm8 = vcmp.eq.s32.totalorder %v1923_v16, 0  ;;  %vm1928_vm0 = vcmp.eq.s32.totalorder %v1923_v16, 2  ;;  %vm1924_vm4 = vcmp.lt.s32.totalorder %v1923_v16, 2  ;;  %v3659_v4 = vand.u32 1, %v3643_v6 }
 0x3e5   : > { %v3583_v18 = vshrl.u32 %v3565_v56, %v3581_v32  ;;  %v3586_v33 = vadd.s32 127, %v3585_v12  ;;  %v3603_v42 = vand.u32 3, %v3602_v17  ;;  %vm3601_vm12 = vweird.f32 %v8826_v40 }
 0x3e6   : > { %v4269_v46 = vpop.eup %4268  ;;  %v269_v44 = vsel %vm268_vm9, %v265_v55, %v8846_v49 }
 0x3e7   : > { %v4271_v52 = vpop.eup %4270  ;;  %v3505_v13 = vxor.u32 2147483648, %v4269_v46  ;;  %v3584_v29 = vor.u32 %v3583_v18, %v3582_v41  ;;  %v3587_v15 = vshll.u32 %v3586_v33, 23  ;;  %vm3608_vm10 = vcmp.eq.s32.totalorder %v3603_v42, 2 }
 0x3e8   : > { %v3502_v2 = vxor.u32 2147483648, %v4271_v52  ;;  %v4273_v9 = vpop.eup %4272  ;;  %vm3605_vm1 = vcmp.eq.s32.totalorder %v3603_v42, 0  ;;  %vm3604_vm11 = vcmp.lt.s32.totalorder %v3603_v42, 2 }
 0x3e9   : > { %v3506_v10 = vsel %vm3504_vm6, %v3505_v13, %v4271_v52  ;;  %v3588_v20 = vor.u32 4788187, %v3587_v15  ;;  %v3591_v34 = vcvt.s32.f32 %v3584_v29  ;;  %v4275_v38 = vpop.eup %4274  ;;  %v1929_v7 = vxor.u32 2147483648, %v4273_v9 }
 0x3ea   : > { %v3503_v23 = vsel %vm3501_vm13, %v4269_v46, %v3502_v2  ;;  %v1926_v60 = vxor.u32 2147483648, %v4275_v38  ;;  %vm3675_vm6 = vcmp.eq.s32.totalorder %v3659_v4, 0 }
 0x3eb   : > { %v3507_v36 = vsel %vm3500_vm14, %v3503_v23, %v3506_v10  ;;  %v3589_v63 = vand.u32 2147483647, %v3588_v20  ;;  %v1930_v59 = vsel %vm1928_vm0, %v1929_v7, %v4275_v38 }
 0x3ec   : > { %v3508_v53 = vsel %vm3497_vm5, nan, %v3507_v36  ;;  %v1927_v8 = vsel %vm1925_vm8, %v4273_v9, %v1926_v60 }
 0x3ed   : > { %v3592_v3 = vmul.f32 %v3591_v34, %v3589_v63  ;;  %v3627_v5 = vmul.f32 %v3508_v53, %v270_v31  ;;  %v1931_v48 = vsel %vm1924_vm4, %v1927_v8, %v1930_v59 }
 0x3ee   : > { %v1932_v26 = vsel %vm1922_vm7, nan, %v1931_v48 }
 0x3ef   : > { %v3593_v58 = vxor.u32 2147483648, %v3592_v3  ;;  %v3690_v50 = vsel %vm3674_vm2, %v1947_v54, %v3627_v5  ;;  %v1948_v32 = vmul.f32 %v4295_v21, %v1932_v26 }
 0x3f0   : > { %3706 = vst [vmem:[%s6994_s29 + $0x70] sm:$0xff] %v3690_v50 }
 0x3f1   : > { %v3594_v47 = vsel %vm3511_vm3, %v3593_v58, %v3592_v3 }
 0x3f2   : > { %v3597_v61 = vsel %vm3510_vm15, %v8826_v40, %v3594_v47 }
 0x3f3   : > { %4276 = vcosq.f32 %v3597_v61 }
 0x3f4   : > { %4278 = vsinq.f32 %v3597_v61 }
 0x3fd   : > { %v4277_v37 = vpop.eup %4276 }
 0x3fe   : > { %v4279_v1 = vpop.eup %4278  ;;  %v3609_v14 = vxor.u32 2147483648, %v4277_v37 }
 0x3ff   : > { %v3606_v27 = vxor.u32 2147483648, %v4279_v1 }
 0x400   : > { %v3610_v56 = vsel %vm3608_vm10, %v3609_v14, %v4279_v1 }
 0x401   : > { %v3607_v43 = vsel %vm3605_vm1, %v4277_v37, %v3606_v27 }
 0x402   : > { %v3611_v57 = vsel %vm3604_vm11, %v3607_v43, %v3610_v56 }
 0x403   : > { %v3612_v41 = vsel %vm3601_vm12, nan, %v3611_v57 }
 0x404   : > { %v3628_v12 = vmul.f32 %v3612_v41, %v269_v44 }
 0x406   : > { %v3691_v11 = vsel %vm3675_vm6, %v1948_v32, %v3628_v12 }
 0x407   : > { %3707 = vst [vmem:[%s6994_s29 + $0x78] sm:$0xff] %v3691_v11 }
 0x408   : > { %4339 = shalt.err (!%p4336_p6)
}
 0x409   : > { %s4340_s17 = scalar_lea.hbm %s8443_s5, 2048  ;;  %s4344_s24 = scalar_lea.hbm %s8494_s1, 4096 }
 0x40a   : > { %p4341_p4 = scmp.ne.s32.totalorder %s8443_s5, %s4340_s17  ;;  %p4345_p1 = scmp.lt.u32.totalorder %s8443_s5, %s8494_s1 }
 0x40b   : > { %p4346_p2 = scmp.lt.u32.totalorder %s4344_s24, %s4340_s17  ;;  %p4348_p8 = scmp.lt.u32.totalorder %s4340_s17, %s8443_s5 }
 0x40c   : > { %p4342_p10 = pnand %p4341_p4, %p8847_p9 }
 0x40d   : > { %p4347_p5 = por %p4346_p2, %p4345_p1 }
 0x40e   : > { %p4343_p12 = pneg %p4342_p10 }
 0x40f   : > { %p4349_p11 = por %p4348_p8, %p4347_p5 }
 0x411   : > { %p4350_p0 = pnand %p4349_p11, %p4343_p12 }
 0x413   : > { %4353 = shalt.err (!%p4350_p0)
}
 0x414   : > { %4084 = dma.vmem_to_hbm [thread:$0]  (%p8847_p9), %s8445_s2, 2048, %s8443_s5, %s3709_s12  }
 0x415 PF: > { %s3737_s28 = sand.u32 1, %s4388_s6   ;;  %p8848_p7 = scmp.ne.s32.totalorder %s8594_s21, 0 }
 0x416   : > { %p8849_p13 = scmp.ge.s32.totalorder %s4408_s11, 2  ;;  %s3738_s27 = scalar_lea.sflag [#allocation4], %s3737_s28 }
 0x418   : > { %p4091_p3 = pnand %p8849_p13, %p8848_p7 }
 0x41a   : > { %4383 = dma.done.wait (!%p4091_p3), %s3738_s27, 2048  }
 0x41b   : > { %4385 = vsyncadd (!%p4091_p3), %s3738_s27, 4294965248  ;;  %s17_s11 = sadd.s32 1, %s4408_s11   ;;  %s8850_s6 = smov %s4392_s7 }
 0x41c   : > { %p14_p6 = scmp.ge.s32.totalorder %s17_s11, 4   ;;  %s8851_s7 = smov %s4396_s8 }
 0x41d   : > { %s8852_s8 = smov %s4486_s20  ;;  %s8853_s9 = smov %s4404_s10 }
 0x41e   : > { %s8854_s10 = smov %s8856_s14  ;;  %16 = sbr.rel (!%p14_p6) target bundleno = 6 (0x6), region = 69 }
 0x425   :  { %3743 = vsyncpa [#allocation3], 1 }
 0x426   :  { %3745 = vsyncpa [#allocation3 + $0x1], 1 }
 0x427   :  { %3746 = vsyncpa [#allocation4], 1 }
 0x428   :  { %3748 = vsyncpa [#allocation4 + $0x1], 1 }

</bundles_post_ra>
